<compile_context>
chip_gen: v7x
topology: tpu7x:2x2x1
jax: 0.10.0
libtpu: 0.0.40
codegen_flags: <defaults>
</compile_context>

<pallas_src>
import jax
import jax.numpy as jnp
from jax import lax
from jax.experimental import pallas as pl
from jax.experimental.pallas import tpu as pltpu

EPS = 1e-5
LANE = 128
VMEM_LIMIT = 48 * 1024 * 1024  # leave headroom on v7x's 64 MiB physical VMEM


def _round_up(v, m):
    return ((v + m - 1) // m) * m


def _band_with_halo(x_pad, th):
    """(N, H+2, W+2, C) -> (N, nH, th+2, W+2, C) overlapping row bands (1-row halo)."""
    _, hp, _, _ = x_pad.shape
    h = hp - 2
    nh = h // th
    return jnp.stack([x_pad[:, i * th:i * th + th + 2] for i in range(nh)], axis=1)


def _conv_stats_pass(x_banded, wmat, scale, shift, *, normalize_input,
                     N, H, W, TH, c_in, c_out):
    """3x3 conv over halo'd row bands, optionally with the previous layer's BN+ReLU
    (and zero re-padding) fused onto the input.  Emits the raw (pre-BN) conv output
    plus per-block per-channel sum / sum-of-squares partials for the following BN."""
    nH = H // TH

    def kernel(xb_ref, w_ref, sc_ref, sh_ref, h_ref, s_ref, q_ref):
        xb = xb_ref[...]                                      # (TH+2, W+2, c_in) f32
        if normalize_input:
            # Fused BN+ReLU of the previous conv's raw output, then re-apply the
            # zero spatial padding via a mask so this conv sees zeros on the border.
            band = pl.program_id(1)
            rows = lax.broadcasted_iota(jnp.int32, xb.shape, 0)
            cols = lax.broadcasted_iota(jnp.int32, xb.shape, 1)
            grow = band * TH + rows                           # global padded row index
            valid = (grow >= 1) & (grow <= H) & (cols >= 1) & (cols <= W)
            xb = jnp.where(valid,
                           jnp.maximum(xb * sc_ref[...] + sh_ref[...], 0.0),
                           0.0)
        # im2col: one big matmul (K = 9*c_in, bf16 operands, f32 accumulation)
        # instead of 9 tiny K=C, N=C matmuls.
        patches = jnp.concatenate(
            [xb[ky:ky + TH, kx:kx + W, :] for ky in range(3) for kx in range(3)],
            axis=-1).reshape(TH * W, 9 * c_in).astype(jnp.bfloat16)
        h = jnp.dot(patches, w_ref[...], preferred_element_type=jnp.float32)
        h_ref[...] = h.reshape(TH, W, c_out)
        # Per-block BN partials (finished as a tiny O(C) reduction in the wrapper).
        s_ref[...] = jnp.sum(h, axis=0, keepdims=True)
        q_ref[...] = jnp.sum(h * h, axis=0, keepdims=True)

    return pl.pallas_call(
        kernel,
        grid=(N, nH),
        in_specs=[
            pl.BlockSpec((None, None, TH + 2, W + 2, c_in),
                         lambda n, i: (n, i, 0, 0, 0)),
            # Weight / BN scale+shift: constant index maps -> fetched once (stationary).
            pl.BlockSpec((9 * c_in, c_out), lambda n, i: (0, 0)),
            pl.BlockSpec((1, c_in), lambda n, i: (0, 0)),
            pl.BlockSpec((1, c_in), lambda n, i: (0, 0)),
        ],
        out_specs=(
            pl.BlockSpec((None, TH, W, c_out), lambda n, i: (n, i, 0, 0)),
            pl.BlockSpec((None, None, 1, c_out), lambda n, i: (n, i, 0, 0)),
            pl.BlockSpec((None, None, 1, c_out), lambda n, i: (n, i, 0, 0)),
        ),
        out_shape=(
            jax.ShapeDtypeStruct((N, H, W, c_out), jnp.float32),
            jax.ShapeDtypeStruct((N, nH, 1, c_out), jnp.float32),
            jax.ShapeDtypeStruct((N, nH, 1, c_out), jnp.float32),
        ),
        compiler_params=pltpu.CompilerParams(
            dimension_semantics=("parallel", "parallel"),
            vmem_limit_bytes=VMEM_LIMIT),
    )(x_banded, wmat, scale, shift)


def _bn_relu_pass(h, scale, shift, *, TH):
    """y = max(h*scale + shift, 0), tiled over (N, H row-bands); lane-dense channels."""
    N, H, W, C = h.shape
    nH = H // TH

    def kernel(h_ref, sc_ref, sh_ref, o_ref):
        o_ref[...] = jnp.maximum(h_ref[...] * sc_ref[...] + sh_ref[...], 0.0)

    return pl.pallas_call(
        kernel,
        grid=(N, nH),
        in_specs=[
            pl.BlockSpec((None, TH, W, C), lambda n, i: (n, i, 0, 0)),
            pl.BlockSpec((1, C), lambda n, i: (0, 0)),
            pl.BlockSpec((1, C), lambda n, i: (0, 0)),
        ],
        out_specs=pl.BlockSpec((None, TH, W, C), lambda n, i: (n, i, 0, 0)),
        out_shape=jax.ShapeDtypeStruct((N, H, W, C), jnp.float32),
        compiler_params=pltpu.CompilerParams(
            dimension_semantics=("parallel", "parallel"),
            vmem_limit_bytes=VMEM_LIMIT),
    )(h, scale, shift)


def _bn_scale_shift(s_part, q_part, gamma, beta, count, c_pad):
    """Fold training-mode BN (biased batch variance) + affine into scale/shift."""
    s = jnp.sum(s_part, axis=(0, 1, 2))
    q = jnp.sum(q_part, axis=(0, 1, 2))
    mean = s / count
    var = jnp.maximum(q / count - mean * mean, 0.0)
    g = jnp.pad(gamma, (0, c_pad - gamma.shape[0]))
    b = jnp.pad(beta, (0, c_pad - beta.shape[0]))
    scale = g * lax.rsqrt(var + EPS)
    shift = b - mean * scale
    return scale.reshape(1, c_pad), shift.reshape(1, c_pad)


def _prep_weight(w, c_in_p, c_out_p):
    """(Cout, Cin, 3, 3) torch layout -> (9*c_in_p, c_out_p) bf16 im2col matrix."""
    c_out, c_in = w.shape[0], w.shape[1]
    w = jnp.transpose(w, (2, 3, 1, 0))                        # (3,3,Cin,Cout)  HWIO
    w = jnp.pad(w, ((0, 0), (0, 0), (0, c_in_p - c_in), (0, c_out_p - c_out)))
    return w.reshape(9 * c_in_p, c_out_p).astype(jnp.bfloat16)


def double_conv(x_nchw, params, band_rows=8):
    """x_nchw: (N, Cin, H, W) f32 -> (N, Cout, H, W) f32 (training-mode BatchNorm)."""
    N, Cin, H, W = x_nchw.shape
    Cout = params["w1"].shape[0]
    cin_p, cout_p = _round_up(Cin, LANE), _round_up(Cout, LANE)
    TH = band_rows if H % band_rows == 0 else H
    count = float(N * H * W)

    # Glue: NCHW->NHWC, channel pad to a lane multiple, zero spatial pad, and the
    # 1-row-halo banding that feeds the BlockSpec pipeline.
    # TODO(synk): fold the NCHW<->NHWC transposes and the halo banding gather into the
    # kernels (manual halo DMA) to remove these extra XLA HBM round trips.
    x = jnp.transpose(x_nchw, (0, 2, 3, 1))
    x = jnp.pad(x, ((0, 0), (1, 1), (1, 1), (0, cin_p - Cin)))
    xb = _band_with_halo(x, TH)

    w1 = _prep_weight(params["w1"], cin_p, cout_p)
    w2 = _prep_weight(params["w2"], cout_p, cout_p)
    # Conv biases are intentionally not applied: with training-mode BN right after the
    # conv, "+ bias" is exactly cancelled by the BN mean subtraction.
    one = jnp.ones((1, cin_p), jnp.float32)
    zero = jnp.zeros((1, cin_p), jnp.float32)

    # Pass 1: conv1 + BN1 partial stats.
    h1, s1, q1 = _conv_stats_pass(xb, w1, one, zero, normalize_input=False,
                                  N=N, H=H, W=W, TH=TH, c_in=cin_p, c_out=cout_p)
    scale1, shift1 = _bn_scale_shift(s1, q1, params["g1"], params["be1"], count, cout_p)

    # Pass 2: fused (BN1 + ReLU + zero re-pad) on the input, then conv2 + BN2 stats.
    h1b = _band_with_halo(jnp.pad(h1, ((0, 0), (1, 1), (1, 1), (0, 0))), TH)
    h2, s2, q2 = _conv_stats_pass(h1b, w2, scale1, shift1, normalize_input=True,
                                  N=N, H=H, W=W, TH=TH, c_in=cout_p, c_out=cout_p)
    scale2, shift2 = _bn_scale_shift(s2, q2, params["g2"], params["be2"], count, cout_p)

    # Pass 3: BN2 + ReLU.
    out = _bn_relu_pass(h2, scale2, shift2, TH=TH)

    # TODO(synk): BatchNorm running_mean/running_var buffer updates (PyTorch training
    # side effect) are not emitted; the forward output does not depend on them.
    return jnp.transpose(out[..., :Cout], (0, 3, 1, 2))


def double_conv_reference(x_nchw, params):
    """Pure-JAX mirror of the PyTorch module (training-mode BN, conv bias included).
    Conv operands are cast to bf16 (f32 accumulation) to match the kernel's MXU path."""
    def block(x, w, b, g, beta):
        w_hwio = jnp.transpose(w, (2, 3, 1, 0)).astype(jnp.bfloat16)
        y = lax.conv_general_dilated(
            x.astype(jnp.bfloat16), w_hwio, window_strides=(1, 1), padding="SAME",
            dimension_numbers=("NHWC", "HWIO", "NHWC"),
            preferred_element_type=jnp.float32) + b
        mean = jnp.mean(y, axis=(0, 1, 2))
        var = jnp.mean((y - mean) ** 2, axis=(0, 1, 2))
        return jnp.maximum((y - mean) * lax.rsqrt(var + EPS) * g + beta, 0.0)

    x = jnp.transpose(x_nchw, (0, 2, 3, 1))
    x = block(x, params["w1"], params["cb1"], params["g1"], params["be1"])
    x = block(x, params["w2"], params["cb2"], params["g2"], params["be2"])
    return jnp.transpose(x, (0, 3, 1, 2))


def init_params(key, in_channels, out_channels):
    ks = jax.random.split(key, 4)
    return {
        # Conv2d(in, out, 3, padding=1) weights (+ biases, which BN cancels exactly)
        "w1": 0.1 * jax.random.normal(ks[0], (out_channels, in_channels, 3, 3), jnp.float32),
        "cb1": 0.1 * jax.random.normal(ks[1], (out_channels,), jnp.float32),
        # BatchNorm2d affine params (perturbed so the affine path is exercised)
        "g1": jnp.ones((out_channels,), jnp.float32) + 0.05,
        "be1": jnp.full((out_channels,), 0.02, jnp.float32),
        "w2": 0.1 * jax.random.normal(ks[2], (out_channels, out_channels, 3, 3), jnp.float32),
        "cb2": 0.1 * jax.random.normal(ks[3], (out_channels,), jnp.float32),
        "g2": jnp.ones((out_channels,), jnp.float32) - 0.03,
        "be2": jnp.full((out_channels,), -0.01, jnp.float32),
    }


if __name__ == "__main__":
    key = jax.random.PRNGKey(0)
    kx, kp = jax.random.split(key)

    N, Cin, Cout, H, W = 2, 4, 8, 16, 16
    x = jax.random.normal(kx, (N, Cin, H, W), jnp.float32)   # NCHW, like PyTorch
    params = init_params(kp, Cin, Cout)

    out = jax.block_until_ready(jax.jit(double_conv)(x, params))
    assert out.shape == (N, Cout, H, W)

    ref = jax.block_until_ready(jax.jit(double_conv_reference)(x, params))
    max_err = float(jnp.max(jnp.abs(out - ref)))
    assert max_err < 2e-2, f"kernel/reference mismatch: max abs err = {max_err}"
    print("KERNEL_OK")
</pallas_src>

<mosaic_0001>
module attributes {stable_mosaic.version = 11 : i64} {
  func.func @kernel(%arg0: i32, %arg1: i32, %arg2: memref<1x8x16x128xf32, #tpu.memory_space<vmem>>, %arg3: memref<1x128xf32, #tpu.memory_space<vmem>>, %arg4: memref<1x128xf32, #tpu.memory_space<vmem>>, %arg5: memref<1x8x16x128xf32, #tpu.memory_space<vmem>>) attributes {dimension_semantics = [#tpu.dimension_semantics<parallel>, #tpu.dimension_semantics<parallel>], iteration_bounds = array<i64: 2, 2>, scalar_prefetch = 0 : i64, scratch_operands = 0 : i64, tpu.core_type = #tpu.core_type<tc>, window_params = [{transform_indices = @transform_0, window_bounds = array<i64: 1, 8, 16, 128>}, {pipeline_mode = #tpu.pipeline_mode<synchronous>, transform_indices = @transform_1, window_bounds = array<i64: 1, 128>}, {pipeline_mode = #tpu.pipeline_mode<synchronous>, transform_indices = @transform_2, window_bounds = array<i64: 1, 128>}, {transform_indices = @transform_3, window_bounds = array<i64: 1, 8, 16, 128>}]} {
    %c0 = arith.constant 0 : index
    %c0_0 = arith.constant 0 : index
    %c0_1 = arith.constant 0 : index
    %c0_2 = arith.constant 0 : index
    %0 = vector.load %arg2[%c0, %c0_0, %c0_1, %c0_2] : memref<1x8x16x128xf32, #tpu.memory_space<vmem>>, vector<1x8x16x128xf32>
    %1 = vector.shape_cast %0 : vector<1x8x16x128xf32> to vector<8x16x128xf32>
    %c0_3 = arith.constant 0 : index
    %c0_4 = arith.constant 0 : index
    %2 = vector.load %arg3[%c0_3, %c0_4] : memref<1x128xf32, #tpu.memory_space<vmem>>, vector<1x128xf32>
    %3 = vector.shape_cast %2 : vector<1x128xf32> to vector<1x1x128xf32>
    %4 = vector.broadcast %3 : vector<1x1x128xf32> to vector<8x16x128xf32>
    %5 = arith.mulf %1, %4 : vector<8x16x128xf32>
    %c0_5 = arith.constant 0 : index
    %c0_6 = arith.constant 0 : index
    %6 = vector.load %arg4[%c0_5, %c0_6] : memref<1x128xf32, #tpu.memory_space<vmem>>, vector<1x128xf32>
    %7 = vector.shape_cast %6 : vector<1x128xf32> to vector<1x1x128xf32>
    %8 = vector.broadcast %7 : vector<1x1x128xf32> to vector<8x16x128xf32>
    %9 = arith.addf %5, %8 : vector<8x16x128xf32>
    %cst = arith.constant 0.000000e+00 : f32
    %10 = vector.broadcast %cst : f32 to vector<8x16x128xf32>
    %11 = arith.maximumf %9, %10 : vector<8x16x128xf32>
    %c0_7 = arith.constant 0 : index
    %c0_8 = arith.constant 0 : index
    %c0_9 = arith.constant 0 : index
    %c0_10 = arith.constant 0 : index
    %12 = vector.load %arg5[%c0_7, %c0_8, %c0_9, %c0_10] : memref<1x8x16x128xf32, #tpu.memory_space<vmem>>, vector<1x8x16x128xf32>
    %13 = vector.shape_cast %12 : vector<1x8x16x128xf32> to vector<8x16x128xf32>
    %14 = vector.shape_cast %11 : vector<8x16x128xf32> to vector<1x8x16x128xf32>
    tpu.vector_store %arg5[%c0_7, %c0_8, %c0_9, %c0_10], %14 {strides = array<i32>} : memref<1x8x16x128xf32, #tpu.memory_space<vmem>>, vector<1x8x16x128xf32>,
    return
  }
  func.func @transform_0(%arg0: i32, %arg1: i32) -> (i32, i32, i32, i32) {
    %c0_i32 = arith.constant 0 : i32
    %c0_i32_0 = arith.constant 0 : i32
    %c0_i32_1 = arith.constant 0 : i32
    return %arg0, %arg1, %c0_i32, %c0_i32_0 : i32, i32, i32, i32
  }
  func.func @transform_1(%arg0: i32, %arg1: i32) -> (i32, i32) {
    %c0_i32 = arith.constant 0 : i32
    %c0_i32_0 = arith.constant 0 : i32
    %c0_i32_1 = arith.constant 0 : i32
    return %c0_i32, %c0_i32_0 : i32, i32
  }
  func.func @transform_2(%arg0: i32, %arg1: i32) -> (i32, i32) {
    %c0_i32 = arith.constant 0 : i32
    %c0_i32_0 = arith.constant 0 : i32
    %c0_i32_1 = arith.constant 0 : i32
    return %c0_i32, %c0_i32_0 : i32, i32
  }
  func.func @transform_3(%arg0: i32, %arg1: i32) -> (i32, i32, i32, i32) {
    %c0_i32 = arith.constant 0 : i32
    %c0_i32_0 = arith.constant 0 : i32
    %c0_i32_1 = arith.constant 0 : i32
    return %arg0, %arg1, %c0_i32, %c0_i32_0 : i32, i32, i32, i32
  }
}

module attributes {stable_mosaic.version = 11 : i64} {
  func.func @kernel(%arg0: i32, %arg1: i32, %arg2: memref<1x1x10x18x128xf32, #tpu.memory_space<vmem>>, %arg3: memref<1152x128xbf16, #tpu.memory_space<vmem>>, %arg4: memref<1x128xf32, #tpu.memory_space<vmem>>, %arg5: memref<1x128xf32, #tpu.memory_space<vmem>>, %arg6: memref<1x8x16x128xf32, #tpu.memory_space<vmem>>, %arg7: memref<1x1x1x128xf32, #tpu.memory_space<vmem>>, %arg8: memref<1x1x1x128xf32, #tpu.memory_space<vmem>>) attributes {dimension_semantics = [#tpu.dimension_semantics<parallel>, #tpu.dimension_semantics<parallel>], iteration_bounds = array<i64: 2, 2>, scalar_prefetch = 0 : i64, scratch_operands = 0 : i64, tpu.core_type = #tpu.core_type<tc>, window_params = [{transform_indices = @transform_0, window_bounds = array<i64: 1, 1, 10, 18, 128>}, {pipeline_mode = #tpu.pipeline_mode<synchronous>, transform_indices = @transform_1, window_bounds = array<i64: 1152, 128>}, {pipeline_mode = #tpu.pipeline_mode<synchronous>, transform_indices = @transform_2, window_bounds = array<i64: 1, 128>}, {pipeline_mode = #tpu.pipeline_mode<synchronous>, transform_indices = @transform_3, window_bounds = array<i64: 1, 128>}, {transform_indices = @transform_4, window_bounds = array<i64: 1, 8, 16, 128>}, {transform_indices = @transform_5, window_bounds = array<i64: 1, 1, 1, 128>}, {transform_indices = @transform_6, window_bounds = array<i64: 1, 1, 1, 128>}]} {
    %c0 = arith.constant 0 : index
    %c0_0 = arith.constant 0 : index
    %c0_1 = arith.constant 0 : index
    %c0_2 = arith.constant 0 : index
    %c0_3 = arith.constant 0 : index
    %0 = vector.load %arg2[%c0, %c0_0, %c0_1, %c0_2, %c0_3] : memref<1x1x10x18x128xf32, #tpu.memory_space<vmem>>, vector<1x1x10x18x128xf32>
    %1 = vector.shape_cast %0 : vector<1x1x10x18x128xf32> to vector<10x18x128xf32>
    %2 = tpu.iota {dimensions = array<i32: 0>} : vector<10x18x128xi32>
    %3 = tpu.iota {dimensions = array<i32: 1>} : vector<10x18x128xi32>
    %c8_i32 = arith.constant 8 : i32
    %4 = arith.muli %arg1, %c8_i32 : i32
    %5 = vector.broadcast %4 : i32 to vector<10x18x128xi32>
    %6 = arith.addi %5, %2 : vector<10x18x128xi32>
    %c1_i32 = arith.constant 1 : i32
    %7 = vector.broadcast %c1_i32 : i32 to vector<10x18x128xi32>
    %8 = arith.cmpi sge, %6, %7 : vector<10x18x128xi32>
    %c16_i32 = arith.constant 16 : i32
    %9 = vector.broadcast %c16_i32 : i32 to vector<10x18x128xi32>
    %10 = arith.cmpi sle, %6, %9 : vector<10x18x128xi32>
    %11 = arith.andi %8, %10 : vector<10x18x128xi1>
    %c1_i32_4 = arith.constant 1 : i32
    %12 = vector.broadcast %c1_i32_4 : i32 to vector<10x18x128xi32>
    %13 = arith.cmpi sge, %3, %12 : vector<10x18x128xi32>
    %14 = arith.andi %11, %13 : vector<10x18x128xi1>
    %c16_i32_5 = arith.constant 16 : i32
    %15 = vector.broadcast %c16_i32_5 : i32 to vector<10x18x128xi32>
    %16 = arith.cmpi sle, %3, %15 : vector<10x18x128xi32>
    %17 = arith.andi %14, %16 : vector<10x18x128xi1>
    %c0_6 = arith.constant 0 : index
    %c0_7 = arith.constant 0 : index
    %18 = vector.load %arg4[%c0_6, %c0_7] : memref<1x128xf32, #tpu.memory_space<vmem>>, vector<1x128xf32>
    %19 = vector.shape_cast %18 : vector<1x128xf32> to vector<1x1x128xf32>
    %20 = vector.broadcast %19 : vector<1x1x128xf32> to vector<10x18x128xf32>
    %21 = arith.mulf %1, %20 : vector<10x18x128xf32>
    %c0_8 = arith.constant 0 : index
    %c0_9 = arith.constant 0 : index
    %22 = vector.load %arg5[%c0_8, %c0_9] : memref<1x128xf32, #tpu.memory_space<vmem>>, vector<1x128xf32>
    %23 = vector.shape_cast %22 : vector<1x128xf32> to vector<1x1x128xf32>
    %24 = vector.broadcast %23 : vector<1x1x128xf32> to vector<10x18x128xf32>
    %25 = arith.addf %21, %24 : vector<10x18x128xf32>
    %cst = arith.constant 0.000000e+00 : f32
    %26 = vector.broadcast %cst : f32 to vector<10x18x128xf32>
    %27 = arith.maximumf %25, %26 : vector<10x18x128xf32>
    %cst_10 = arith.constant 0.000000e+00 : f32
    %28 = vector.broadcast %cst_10 : f32 to vector<10x18x128xf32>
    %29 = arith.select %17, %27, %28 : vector<10x18x128xi1>, vector<10x18x128xf32>
    %30 = vector.extract_strided_slice %29 {offsets = [0, 0, 0], sizes = [8, 16, 128], strides = [1, 1, 1]} : vector<10x18x128xf32> to vector<8x16x128xf32>
    %31 = vector.extract_strided_slice %29 {offsets = [0, 1, 0], sizes = [8, 16, 128], strides = [1, 1, 1]} : vector<10x18x128xf32> to vector<8x16x128xf32>
    %32 = vector.extract_strided_slice %29 {offsets = [0, 2, 0], sizes = [8, 16, 128], strides = [1, 1, 1]} : vector<10x18x128xf32> to vector<8x16x128xf32>
    %33 = vector.extract_strided_slice %29 {offsets = [1, 0, 0], sizes = [8, 16, 128], strides = [1, 1, 1]} : vector<10x18x128xf32> to vector<8x16x128xf32>
    %34 = vector.extract_strided_slice %29 {offsets = [1, 1, 0], sizes = [8, 16, 128], strides = [1, 1, 1]} : vector<10x18x128xf32> to vector<8x16x128xf32>
    %35 = vector.extract_strided_slice %29 {offsets = [1, 2, 0], sizes = [8, 16, 128], strides = [1, 1, 1]} : vector<10x18x128xf32> to vector<8x16x128xf32>
    %36 = vector.extract_strided_slice %29 {offsets = [2, 0, 0], sizes = [8, 16, 128], strides = [1, 1, 1]} : vector<10x18x128xf32> to vector<8x16x128xf32>
    %37 = vector.extract_strided_slice %29 {offsets = [2, 1, 0], sizes = [8, 16, 128], strides = [1, 1, 1]} : vector<10x18x128xf32> to vector<8x16x128xf32>
    %38 = vector.extract_strided_slice %29 {offsets = [2, 2, 0], sizes = [8, 16, 128], strides = [1, 1, 1]} : vector<10x18x128xf32> to vector<8x16x128xf32>
    %39 = tpu.concatenate %30, %31, %32, %33, %34, %35, %36, %37, %38 in 2 : vector<8x16x128xf32>, vector<8x16x128xf32>, vector<8x16x128xf32>, vector<8x16x128xf32>, vector<8x16x128xf32>, vector<8x16x128xf32>, vector<8x16x128xf32>, vector<8x16x128xf32>, vector<8x16x128xf32> -> vector<8x16x1152xf32>
    %40 = vector.shape_cast %39 : vector<8x16x1152xf32> to vector<128x1152xf32>
    %41 = arith.truncf %40 : vector<128x1152xf32> to vector<128x1152xbf16>
    %c0_11 = arith.constant 0 : index
    %c0_12 = arith.constant 0 : index
    %42 = vector.load %arg3[%c0_11, %c0_12] : memref<1152x128xbf16, #tpu.memory_space<vmem>>, vector<1152x128xbf16>
    %cst_13 = arith.constant dense<0.000000e+00> : vector<128x128xf32>
    %43 = tpu.matmul %41, %42, %cst_13 {dimension_numbers = #tpu.dot_dimension_numbers<[1], [0], [0], [1], [0, 0, 1, 1], [], []>} : vector<128x1152xbf16>, vector<1152x128xbf16>, vector<128x128xf32> -> vector<128x128xf32>
    %44 = vector.shape_cast %43 : vector<128x128xf32> to vector<8x16x128xf32>
    %c0_14 = arith.constant 0 : index
    %c0_15 = arith.constant 0 : index
    %c0_16 = arith.constant 0 : index
    %c0_17 = arith.constant 0 : index
    %45 = vector.load %arg6[%c0_14, %c0_15, %c0_16, %c0_17] : memref<1x8x16x128xf32, #tpu.memory_space<vmem>>, vector<1x8x16x128xf32>
    %46 = vector.shape_cast %45 : vector<1x8x16x128xf32> to vector<8x16x128xf32>
    %47 = vector.shape_cast %44 : vector<8x16x128xf32> to vector<1x8x16x128xf32>
    tpu.vector_store %arg6[%c0_14, %c0_15, %c0_16, %c0_17], %47 {strides = array<i32>} : memref<1x8x16x128xf32, #tpu.memory_space<vmem>>, vector<1x8x16x128xf32>,
    %cst_18 = arith.constant dense<0.000000e+00> : vector<128xf32>
    %48 = vector.multi_reduction <add>, %43, %cst_18 [0] : vector<128x128xf32> to vector<128xf32>
    %49 = vector.shape_cast %48 : vector<128xf32> to vector<1x128xf32>
    %c0_19 = arith.constant 0 : index
    %c0_20 = arith.constant 0 : index
    %c0_21 = arith.constant 0 : index
    %c0_22 = arith.constant 0 : index
    %50 = vector.load %arg7[%c0_19, %c0_20, %c0_21, %c0_22] : memref<1x1x1x128xf32, #tpu.memory_space<vmem>>, vector<1x1x1x128xf32>
    %51 = vector.shape_cast %50 : vector<1x1x1x128xf32> to vector<1x128xf32>
    %52 = vector.shape_cast %49 : vector<1x128xf32> to vector<1x1x1x128xf32>
    tpu.vector_store %arg7[%c0_19, %c0_20, %c0_21, %c0_22], %52 {strides = array<i32>} : memref<1x1x1x128xf32, #tpu.memory_space<vmem>>, vector<1x1x1x128xf32>,
    %53 = arith.mulf %43, %43 : vector<128x128xf32>
    %cst_23 = arith.constant dense<0.000000e+00> : vector<128xf32>
    %54 = vector.multi_reduction <add>, %53, %cst_23 [0] : vector<128x128xf32> to vector<128xf32>
    %55 = vector.shape_cast %54 : vector<128xf32> to vector<1x128xf32>
    %c0_24 = arith.constant 0 : index
    %c0_25 = arith.constant 0 : index
    %c0_26 = arith.constant 0 : index
    %c0_27 = arith.constant 0 : index
    %56 = vector.load %arg8[%c0_24, %c0_25, %c0_26, %c0_27] : memref<1x1x1x128xf32, #tpu.memory_space<vmem>>, vector<1x1x1x128xf32>
    %57 = vector.shape_cast %56 : vector<1x1x1x128xf32> to vector<1x128xf32>
    %58 = vector.shape_cast %55 : vector<1x128xf32> to vector<1x1x1x128xf32>
    tpu.vector_store %arg8[%c0_24, %c0_25, %c0_26, %c0_27], %58 {strides = array<i32>} : memref<1x1x1x128xf32, #tpu.memory_space<vmem>>, vector<1x1x1x128xf32>,
    return
  }
  func.func @transform_0(%arg0: i32, %arg1: i32) -> (i32, i32, i32, i32, i32) {
    %c0_i32 = arith.constant 0 : i32
    %c0_i32_0 = arith.constant 0 : i32
    %c0_i32_1 = arith.constant 0 : i32
    %c0_i32_2 = arith.constant 0 : i32
    return %arg0, %arg1, %c0_i32, %c0_i32_0, %c0_i32_1 : i32, i32, i32, i32, i32
  }
  func.func @transform_1(%arg0: i32, %arg1: i32) -> (i32, i32) {
    %c0_i32 = arith.constant 0 : i32
    %c0_i32_0 = arith.constant 0 : i32
    %c0_i32_1 = arith.constant 0 : i32
    return %c0_i32, %c0_i32_0 : i32, i32
  }
  func.func @transform_2(%arg0: i32, %arg1: i32) -> (i32, i32) {
    %c0_i32 = arith.constant 0 : i32
    %c0_i32_0 = arith.constant 0 : i32
    %c0_i32_1 = arith.constant 0 : i32
    return %c0_i32, %c0_i32_0 : i32, i32
  }
  func.func @transform_3(%arg0: i32, %arg1: i32) -> (i32, i32) {
    %c0_i32 = arith.constant 0 : i32
    %c0_i32_0 = arith.constant 0 : i32
    %c0_i32_1 = arith.constant 0 : i32
    return %c0_i32, %c0_i32_0 : i32, i32
  }
  func.func @transform_4(%arg0: i32, %arg1: i32) -> (i32, i32, i32, i32) {
    %c0_i32 = arith.constant 0 : i32
    %c0_i32_0 = arith.constant 0 : i32
    %c0_i32_1 = arith.constant 0 : i32
    return %arg0, %arg1, %c0_i32, %c0_i32_0 : i32, i32, i32, i32
  }
  func.func @transform_5(%arg0: i32, %arg1: i32) -> (i32, i32, i32, i32) {
    %c0_i32 = arith.constant 0 : i32
    %c0_i32_0 = arith.constant 0 : i32
    %c0_i32_1 = arith.constant 0 : i32
    return %arg0, %arg1, %c0_i32, %c0_i32_0 : i32, i32, i32, i32
  }
  func.func @transform_6(%arg0: i32, %arg1: i32) -> (i32, i32, i32, i32) {
    %c0_i32 = arith.constant 0 : i32
    %c0_i32_0 = arith.constant 0 : i32
    %c0_i32_1 = arith.constant 0 : i32
    return %arg0, %arg1, %c0_i32, %c0_i32_0 : i32, i32, i32, i32
  }
}

module attributes {stable_mosaic.version = 11 : i64} {
  func.func @kernel(%arg0: i32, %arg1: i32, %arg2: memref<1x1x10x18x128xf32, #tpu.memory_space<vmem>>, %arg3: memref<1152x128xbf16, #tpu.memory_space<vmem>>, %arg4: memref<1x128xf32, #tpu.memory_space<vmem>>, %arg5: memref<1x128xf32, #tpu.memory_space<vmem>>, %arg6: memref<1x8x16x128xf32, #tpu.memory_space<vmem>>, %arg7: memref<1x1x1x128xf32, #tpu.memory_space<vmem>>, %arg8: memref<1x1x1x128xf32, #tpu.memory_space<vmem>>) attributes {dimension_semantics = [#tpu.dimension_semantics<parallel>, #tpu.dimension_semantics<parallel>], iteration_bounds = array<i64: 2, 2>, scalar_prefetch = 0 : i64, scratch_operands = 0 : i64, tpu.core_type = #tpu.core_type<tc>, window_params = [{transform_indices = @transform_0, window_bounds = array<i64: 1, 1, 10, 18, 128>}, {pipeline_mode = #tpu.pipeline_mode<synchronous>, transform_indices = @transform_1, window_bounds = array<i64: 1152, 128>}, {pipeline_mode = #tpu.pipeline_mode<synchronous>, transform_indices = @transform_2, window_bounds = array<i64: 1, 128>}, {pipeline_mode = #tpu.pipeline_mode<synchronous>, transform_indices = @transform_3, window_bounds = array<i64: 1, 128>}, {transform_indices = @transform_4, window_bounds = array<i64: 1, 8, 16, 128>}, {transform_indices = @transform_5, window_bounds = array<i64: 1, 1, 1, 128>}, {transform_indices = @transform_6, window_bounds = array<i64: 1, 1, 1, 128>}]} {
    %c0 = arith.constant 0 : index
    %c0_0 = arith.constant 0 : index
    %c0_1 = arith.constant 0 : index
    %c0_2 = arith.constant 0 : index
    %c0_3 = arith.constant 0 : index
    %0 = vector.load %arg2[%c0, %c0_0, %c0_1, %c0_2, %c0_3] : memref<1x1x10x18x128xf32, #tpu.memory_space<vmem>>, vector<1x1x10x18x128xf32>
    %1 = vector.shape_cast %0 : vector<1x1x10x18x128xf32> to vector<10x18x128xf32>
    %2 = vector.extract_strided_slice %1 {offsets = [0, 0, 0], sizes = [8, 16, 128], strides = [1, 1, 1]} : vector<10x18x128xf32> to vector<8x16x128xf32>
    %3 = vector.extract_strided_slice %1 {offsets = [0, 1, 0], sizes = [8, 16, 128], strides = [1, 1, 1]} : vector<10x18x128xf32> to vector<8x16x128xf32>
    %4 = vector.extract_strided_slice %1 {offsets = [0, 2, 0], sizes = [8, 16, 128], strides = [1, 1, 1]} : vector<10x18x128xf32> to vector<8x16x128xf32>
    %5 = vector.extract_strided_slice %1 {offsets = [1, 0, 0], sizes = [8, 16, 128], strides = [1, 1, 1]} : vector<10x18x128xf32> to vector<8x16x128xf32>
    %6 = vector.extract_strided_slice %1 {offsets = [1, 1, 0], sizes = [8, 16, 128], strides = [1, 1, 1]} : vector<10x18x128xf32> to vector<8x16x128xf32>
    %7 = vector.extract_strided_slice %1 {offsets = [1, 2, 0], sizes = [8, 16, 128], strides = [1, 1, 1]} : vector<10x18x128xf32> to vector<8x16x128xf32>
    %8 = vector.extract_strided_slice %1 {offsets = [2, 0, 0], sizes = [8, 16, 128], strides = [1, 1, 1]} : vector<10x18x128xf32> to vector<8x16x128xf32>
    %9 = vector.extract_strided_slice %1 {offsets = [2, 1, 0], sizes = [8, 16, 128], strides = [1, 1, 1]} : vector<10x18x128xf32> to vector<8x16x128xf32>
    %10 = vector.extract_strided_slice %1 {offsets = [2, 2, 0], sizes = [8, 16, 128], strides = [1, 1, 1]} : vector<10x18x128xf32> to vector<8x16x128xf32>
    %11 = tpu.concatenate %2, %3, %4, %5, %6, %7, %8, %9, %10 in 2 : vector<8x16x128xf32>, vector<8x16x128xf32>, vector<8x16x128xf32>, vector<8x16x128xf32>, vector<8x16x128xf32>, vector<8x16x128xf32>, vector<8x16x128xf32>, vector<8x16x128xf32>, vector<8x16x128xf32> -> vector<8x16x1152xf32>
    %12 = vector.shape_cast %11 : vector<8x16x1152xf32> to vector<128x1152xf32>
    %13 = arith.truncf %12 : vector<128x1152xf32> to vector<128x1152xbf16>
    %c0_4 = arith.constant 0 : index
    %c0_5 = arith.constant 0 : index
    %14 = vector.load %arg3[%c0_4, %c0_5] : memref<1152x128xbf16, #tpu.memory_space<vmem>>, vector<1152x128xbf16>
    %cst = arith.constant dense<0.000000e+00> : vector<128x128xf32>
    %15 = tpu.matmul %13, %14, %cst {dimension_numbers = #tpu.dot_dimension_numbers<[1], [0], [0], [1], [0, 0, 1, 1], [], []>} : vector<128x1152xbf16>, vector<1152x128xbf16>, vector<128x128xf32> -> vector<128x128xf32>
    %16 = vector.shape_cast %15 : vector<128x128xf32> to vector<8x16x128xf32>
    %c0_6 = arith.constant 0 : index
    %c0_7 = arith.constant 0 : index
    %c0_8 = arith.constant 0 : index
    %c0_9 = arith.constant 0 : index
    %17 = vector.load %arg6[%c0_6, %c0_7, %c0_8, %c0_9] : memref<1x8x16x128xf32, #tpu.memory_space<vmem>>, vector<1x8x16x128xf32>
    %18 = vector.shape_cast %17 : vector<1x8x16x128xf32> to vector<8x16x128xf32>
    %19 = vector.shape_cast %16 : vector<8x16x128xf32> to vector<1x8x16x128xf32>
    tpu.vector_store %arg6[%c0_6, %c0_7, %c0_8, %c0_9], %19 {strides = array<i32>} : memref<1x8x16x128xf32, #tpu.memory_space<vmem>>, vector<1x8x16x128xf32>,
    %cst_10 = arith.constant dense<0.000000e+00> : vector<128xf32>
    %20 = vector.multi_reduction <add>, %15, %cst_10 [0] : vector<128x128xf32> to vector<128xf32>
    %21 = vector.shape_cast %20 : vector<128xf32> to vector<1x128xf32>
    %c0_11 = arith.constant 0 : index
    %c0_12 = arith.constant 0 : index
    %c0_13 = arith.constant 0 : index
    %c0_14 = arith.constant 0 : index
    %22 = vector.load %arg7[%c0_11, %c0_12, %c0_13, %c0_14] : memref<1x1x1x128xf32, #tpu.memory_space<vmem>>, vector<1x1x1x128xf32>
    %23 = vector.shape_cast %22 : vector<1x1x1x128xf32> to vector<1x128xf32>
    %24 = vector.shape_cast %21 : vector<1x128xf32> to vector<1x1x1x128xf32>
    tpu.vector_store %arg7[%c0_11, %c0_12, %c0_13, %c0_14], %24 {strides = array<i32>} : memref<1x1x1x128xf32, #tpu.memory_space<vmem>>, vector<1x1x1x128xf32>,
    %25 = arith.mulf %15, %15 : vector<128x128xf32>
    %cst_15 = arith.constant dense<0.000000e+00> : vector<128xf32>
    %26 = vector.multi_reduction <add>, %25, %cst_15 [0] : vector<128x128xf32> to vector<128xf32>
    %27 = vector.shape_cast %26 : vector<128xf32> to vector<1x128xf32>
    %c0_16 = arith.constant 0 : index
    %c0_17 = arith.constant 0 : index
    %c0_18 = arith.constant 0 : index
    %c0_19 = arith.constant 0 : index
    %28 = vector.load %arg8[%c0_16, %c0_17, %c0_18, %c0_19] : memref<1x1x1x128xf32, #tpu.memory_space<vmem>>, vector<1x1x1x128xf32>
    %29 = vector.shape_cast %28 : vector<1x1x1x128xf32> to vector<1x128xf32>
    %30 = vector.shape_cast %27 : vector<1x128xf32> to vector<1x1x1x128xf32>
    tpu.vector_store %arg8[%c0_16, %c0_17, %c0_18, %c0_19], %30 {strides = array<i32>} : memref<1x1x1x128xf32, #tpu.memory_space<vmem>>, vector<1x1x1x128xf32>,
    return
  }
  func.func @transform_0(%arg0: i32, %arg1: i32) -> (i32, i32, i32, i32, i32) {
    %c0_i32 = arith.constant 0 : i32
    %c0_i32_0 = arith.constant 0 : i32
    %c0_i32_1 = arith.constant 0 : i32
    %c0_i32_2 = arith.constant 0 : i32
    return %arg0, %arg1, %c0_i32, %c0_i32_0, %c0_i32_1 : i32, i32, i32, i32, i32
  }
  func.func @transform_1(%arg0: i32, %arg1: i32) -> (i32, i32) {
    %c0_i32 = arith.constant 0 : i32
    %c0_i32_0 = arith.constant 0 : i32
    %c0_i32_1 = arith.constant 0 : i32
    return %c0_i32, %c0_i32_0 : i32, i32
  }
  func.func @transform_2(%arg0: i32, %arg1: i32) -> (i32, i32) {
    %c0_i32 = arith.constant 0 : i32
    %c0_i32_0 = arith.constant 0 : i32
    %c0_i32_1 = arith.constant 0 : i32
    return %c0_i32, %c0_i32_0 : i32, i32
  }
  func.func @transform_3(%arg0: i32, %arg1: i32) -> (i32, i32) {
    %c0_i32 = arith.constant 0 : i32
    %c0_i32_0 = arith.constant 0 : i32
    %c0_i32_1 = arith.constant 0 : i32
    return %c0_i32, %c0_i32_0 : i32, i32
  }
  func.func @transform_4(%arg0: i32, %arg1: i32) -> (i32, i32, i32, i32) {
    %c0_i32 = arith.constant 0 : i32
    %c0_i32_0 = arith.constant 0 : i32
    %c0_i32_1 = arith.constant 0 : i32
    return %arg0, %arg1, %c0_i32, %c0_i32_0 : i32, i32, i32, i32
  }
  func.func @transform_5(%arg0: i32, %arg1: i32) -> (i32, i32, i32, i32) {
    %c0_i32 = arith.constant 0 : i32
    %c0_i32_0 = arith.constant 0 : i32
    %c0_i32_1 = arith.constant 0 : i32
    return %arg0, %arg1, %c0_i32, %c0_i32_0 : i32, i32, i32, i32
  }
  func.func @transform_6(%arg0: i32, %arg1: i32) -> (i32, i32, i32, i32) {
    %c0_i32 = arith.constant 0 : i32
    %c0_i32_0 = arith.constant 0 : i32
    %c0_i32_1 = arith.constant 0 : i32
    return %arg0, %arg1, %c0_i32, %c0_i32_0 : i32, i32, i32, i32
  }
}

</mosaic_0001>

<bundles_post_ra>
// kernel: double_conv.5
= control target key start
LH: loop header
LB: loop body
LE: loop exit
PB: predicated region body
PF: predicated region fallthrough
CT: control target
= control target key end

     0   :  { %s525_s12 = smov 0   ;;  %s527_s13 = smov 0   ;;  %s654_s0 = inlined_call_operand.vmem [shape: f32[2,16,16,128], index: 0, kind: input, shape index: {}]   ;;  %s655_s1 = inlined_call_operand.vmem [shape: f32[1,128], index: 1, kind: input, shape index: {}]   ;;  %s656_s2 = inlined_call_operand.vmem [shape: f32[1,128], index: 2, kind: input, shape index: {}]   ;;  %s657_s3 = inlined_call_operand.vmem [shape: f32[2,16,16,128], index: 3, kind: output, shape index: {}]  }
   0x1   :  { %s529_s14 = smov 0   ;;  %s531_s15 = smov 0  }
   0x2   :  { %s533_s16 = smov 0  }
   0x3 LB: > { %s22_s17 = sadd.s32 1, %s495_s14  ;;  %s25_s18 = sadd.s32 1, %s499_s15  ;;  %s503_s16 = sphi %s533_s16, %s13_s16   ;;  %s499_s15 = sphi %s531_s15, %s661_s15   ;;  %s495_s14 = sphi %s529_s14, %s660_s14   ;;  %s491_s13 = sphi %s527_s13, %s659_s13   ;;  %s487_s12 = sphi %s525_s12, %s658_s12  }
   0x4   : > { %p23_p0 = scmp.ge.s32.totalorder %s22_s17, 2  ;;  %p412_p1 = scmp.ge.s32.totalorder %s503_s16, 1 }
   0x5   : > { %p159_p2 = scmp.lt.s32.totalorder %s503_s16, 5 }
   0x6   : > { %s663_s17 = smov (%p23_p0, %s22_s17), 0  ;;  %s665_s18 = smov (!%p23_p0, %s25_s18), %s499_s15 }
   0x7   : > { %p160_p3 = pnand %p412_p1, %p159_p2  ;;  %p27_p4 = scmp.ge.s32.totalorder %s665_s18, 2 }
   0x8   : > { %s413_s19 = sshll.u32 (!%p160_p3), %s487_s12, 3  ;;  %p194_p5 = scmp.lt.s32.totalorder (!%p160_p3), %s491_s13, 1  ;;  %v558_v0 = vld [vmem:[%s655_s1] ss:$0 sm:$0xff] (!%p160_p3) }
   0x9   : > { %s667_s18 = smov (%p27_p4, %s665_s18), 0  ;;  %163 = sbr.rel (%p160_p3) target bundleno = 39 (0x27), region = 32 }
   0xa   : > { %p196_p6 = scmp.lt.s32.totalorder (!%p160_p3), %s413_s19, 15  ;;  %v568_v1 = vld [vmem:[%s656_s2] ss:$0 sm:$0xff] (!%p160_p3) }
  0x10   : > { %s669_s13 = smov (!%p194_p5, %s491_s13), 1  ;;  %s671_s19 = smov (!%p196_p6, %s413_s19), 15 }
  0x11   : > { %s415_s20 = sshll.u32 %s669_s13, 5  ;;  %s414_s21 = sshll.u32 %s671_s19, 1 }
  0x12   : > { %s200_s22 = sadd.s32 %s415_s20, %s414_s21 }
  0x13   : > { %s416_s23 = sshll.u32 %s200_s22, 3 }
  0x14   : > { %s563_s28 = scalar_lea.vmem %s654_s0, %s416_s23  ;;  %s591_s6 = scalar_lea.vmem %s657_s3, %s416_s23 }
  0x15   : > { %v215_v2 = vld [vmem:[%s563_s28] sm:$0xff]  ;;  %v216_v3 = vld [vmem:[%s563_s28 + $0x8] sm:$0xff]  ;;  %v217_v4 = vld [vmem:[%s563_s28 + $0x10] sm:$0xff] }
  0x16   : > { %v238_v5 = vmul.f32 %v558_v0, %v215_v2  ;;  %v239_v6 = vmul.f32 %v558_v0, %v216_v3  ;;  %v240_v7 = vmul.f32 %v558_v0, %v217_v4  ;;  %v218_v8 = vld [vmem:[%s563_s28 + $0x18] sm:$0xff]  ;;  %v219_v9 = vld [vmem:[%s563_s28 + $0x20] sm:$0xff]  ;;  %v220_v10 = vld [vmem:[%s563_s28 + $0x28] sm:$0xff] }
  0x17   : > { %v241_v11 = vmul.f32 %v558_v0, %v218_v8  ;;  %v242_v12 = vmul.f32 %v558_v0, %v219_v9  ;;  %v243_v13 = vmul.f32 %v558_v0, %v220_v10  ;;  %v221_v14 = vld [vmem:[%s563_s28 + $0x30] sm:$0xff]  ;;  %v222_v15 = vld [vmem:[%s563_s28 + $0x38] sm:$0xff]  ;;  %v223_v24 = vld [vmem:[%s563_s28 + $0x40] sm:$0xff] }
  0x18   : > { %v261_v16 = vadd.f32 %v568_v1, %v238_v5  ;;  %v262_v17 = vadd.f32 %v568_v1, %v239_v6  ;;  %v263_v18 = vadd.f32 %v568_v1, %v240_v7  ;;  %v244_v19 = vmul.f32 %v558_v0, %v221_v14  ;;  %v224_v25 = vld [vmem:[%s563_s28 + $0x48] sm:$0xff]  ;;  %v225_v26 = vld [vmem:[%s563_s28 + $0x50] sm:$0xff]  ;;  %v226_v31 = vld [vmem:[%s563_s28 + $0x58] sm:$0xff] }
  0x19   : > { %v264_v20 = vadd.f32 %v568_v1, %v241_v11  ;;  %v265_v21 = vadd.f32 %v568_v1, %v242_v12  ;;  %v266_v22 = vadd.f32 %v568_v1, %v243_v13  ;;  %v245_v23 = vmul.f32 %v558_v0, %v222_v15  ;;  %v227_v32 = vld [vmem:[%s563_s28 + $0x60] sm:$0xff]  ;;  %v228_v33 = vld [vmem:[%s563_s28 + $0x68] sm:$0xff]  ;;  %v229_v38 = vld [vmem:[%s563_s28 + $0x70] sm:$0xff] }
  0x1a   : > { %v277_v27 = vmax.f32 %v261_v16, 0.0  ;;  %v278_v28 = vmax.f32 %v262_v17, 0.0  ;;  %v279_v29 = vmax.f32 %v263_v18, 0.0  ;;  %v267_v30 = vadd.f32 %v568_v1, %v244_v19  ;;  %v230_v43 = vld [vmem:[%s563_s28 + $0x78] sm:$0xff] }
  0x1b   : > { %v280_v34 = vmax.f32 %v264_v20, 0.0  ;;  %v281_v35 = vmax.f32 %v265_v21, 0.0  ;;  %v282_v36 = vmax.f32 %v266_v22, 0.0  ;;  %v268_v37 = vadd.f32 %v568_v1, %v245_v23 }
  0x1c   : > { %293 = vst [vmem:[%s591_s6] sm:$0xff] %v277_v27  ;;  %294 = vst [vmem:[%s591_s6 + $0x8] sm:$0xff] %v278_v28  ;;  %v283_v39 = vmax.f32 %v267_v30, 0.0  ;;  %v246_v40 = vmul.f32 %v558_v0, %v223_v24  ;;  %v247_v41 = vmul.f32 %v558_v0, %v224_v25  ;;  %v248_v42 = vmul.f32 %v558_v0, %v225_v26 }
  0x1d   : > { %295 = vst [vmem:[%s591_s6 + $0x10] sm:$0xff] %v279_v29  ;;  %296 = vst [vmem:[%s591_s6 + $0x18] sm:$0xff] %v280_v34  ;;  %v284_v44 = vmax.f32 %v268_v37, 0.0  ;;  %v249_v45 = vmul.f32 %v558_v0, %v226_v31  ;;  %v250_v46 = vmul.f32 %v558_v0, %v227_v32  ;;  %v251_v47 = vmul.f32 %v558_v0, %v228_v33 }
  0x1e   : > { %297 = vst [vmem:[%s591_s6 + $0x20] sm:$0xff] %v281_v35  ;;  %298 = vst [vmem:[%s591_s6 + $0x28] sm:$0xff] %v282_v36  ;;  %v269_v48 = vadd.f32 %v568_v1, %v246_v40  ;;  %v270_v49 = vadd.f32 %v568_v1, %v247_v41  ;;  %v271_v50 = vadd.f32 %v568_v1, %v248_v42 }
  0x1f   : > { %299 = vst [vmem:[%s591_s6 + $0x30] sm:$0xff] %v283_v39  ;;  %v252_v51 = vmul.f32 %v558_v0, %v229_v38  ;;  %300 = vst [vmem:[%s591_s6 + $0x38] sm:$0xff] %v284_v44  ;;  %v272_v52 = vadd.f32 %v568_v1, %v249_v45  ;;  %v273_v53 = vadd.f32 %v568_v1, %v250_v46 }
  0x20   : > { %v274_v54 = vadd.f32 %v568_v1, %v251_v47  ;;  %v253_v55 = vmul.f32 %v558_v0, %v230_v43  ;;  %v285_v56 = vmax.f32 %v269_v48, 0.0  ;;  %v286_v57 = vmax.f32 %v270_v49, 0.0 }
  0x21   : > { %v287_v58 = vmax.f32 %v271_v50, 0.0  ;;  %v275_v59 = vadd.f32 %v568_v1, %v252_v51  ;;  %v288_v60 = vmax.f32 %v272_v52, 0.0  ;;  %v289_v61 = vmax.f32 %v273_v53, 0.0 }
  0x22   : > { %v290_v62 = vmax.f32 %v274_v54, 0.0  ;;  %v276_v63 = vadd.f32 %v568_v1, %v253_v55  ;;  %301 = vst [vmem:[%s591_s6 + $0x40] sm:$0xff] %v285_v56  ;;  %302 = vst [vmem:[%s591_s6 + $0x48] sm:$0xff] %v286_v57 }
  0x23   : > { %303 = vst [vmem:[%s591_s6 + $0x50] sm:$0xff] %v287_v58  ;;  %v291_v2 = vmax.f32 %v275_v59, 0.0  ;;  %304 = vst [vmem:[%s591_s6 + $0x58] sm:$0xff] %v288_v60 }
  0x24   : > { %305 = vst [vmem:[%s591_s6 + $0x60] sm:$0xff] %v289_v61  ;;  %306 = vst [vmem:[%s591_s6 + $0x68] sm:$0xff] %v290_v62  ;;  %v292_v0 = vmax.f32 %v276_v63, 0.0 }
  0x25   : > { %307 = vst [vmem:[%s591_s6 + $0x70] sm:$0xff] %v291_v2 }
  0x26   : > { %308 = vst [vmem:[%s591_s6 + $0x78] sm:$0xff] %v292_v0 }
  0x27 PF: > { %s13_s16 = sadd.s32 1, %s503_s16   ;;  %s658_s12 = smov %s495_s14 }
  0x28   : > { %p10_p7 = scmp.ge.s32.totalorder %s13_s16, 6   ;;  %s659_s13 = smov %s499_s15 }
  0x29   : > { %s660_s14 = smov %s663_s17  ;;  %s661_s15 = smov %s667_s18 }
  0x2a   :  { %12 = sbr.rel (!%p10_p7) target bundleno = 3 (0x3), region = 62 }

// kernel: double_conv.3
= control target key start
LH: loop header
LB: loop body
LE: loop exit
PB: predicated region body
PF: predicated region fallthrough
CT: control target
= control target key end

     0   :  { %s2474_s21 = smov 0   ;;  %s2476_s22 = smov 0   ;;  %s3156_s0 = inlined_call_operand.vmem [shape: f32[2,2,10,18,128], index: 0, kind: input, shape index: {}]   ;;  %s3157_s1 = inlined_call_operand.vmem [shape: bf16[1152,128], index: 1, kind: input, shape index: {}]   ;;  %s3158_s2 = inlined_call_operand.vmem [shape: f32[1,128], index: 2, kind: input, shape index: {}]   ;;  %s3159_s3 = inlined_call_operand.vmem [shape: f32[1,128], index: 3, kind: input, shape index: {}]   ;;  %s3160_s4 = inlined_call_operand.vmem [shape: f32[2,16,16,128], index: 4, kind: output, shape index: {0}]   ;;  %s3161_s5 = inlined_call_operand.vmem [shape: f32[2,2,1,128], index: 5, kind: output, shape index: {1}]   ;;  %s3162_s6 = inlined_call_operand.vmem [shape: f32[2,2,1,128], index: 6, kind: output, shape index: {2}]  }
   0x1   :  { %s2478_s23 = smov 0   ;;  %s2480_s24 = smov 0  }
   0x2   :  { %s2482_s2 = smov 0  }
   0x3 LB: > { %s26_s3 = sadd.s32 1, %s2429_s23  ;;  %s29_s25 = sadd.s32 1, %s2433_s24  ;;  %s2437_s2 = sphi %s2482_s2, %s17_s2   ;;  %s2433_s24 = sphi %s2480_s24, %s3166_s24   ;;  %s2429_s23 = sphi %s2478_s23, %s3165_s23   ;;  %s2425_s22 = sphi %s2476_s22, %s3164_s22   ;;  %s2421_s21 = sphi %s2474_s21, %s3163_s21  }
   0x4   : > { %p27_p0 = scmp.ge.s32.totalorder %s26_s3, 2  ;;  %p1883_p1 = scmp.ge.s32.totalorder %s2437_s2, 1 }
   0x5   : > { %p241_p2 = scmp.lt.s32.totalorder %s2437_s2, 5 }
   0x6   : > { %s3168_s3 = smov (%p27_p0, %s26_s3), 0  ;;  %s3170_s25 = smov (!%p27_p0, %s29_s25), %s2433_s24 }
   0x7   : > { %p242_p3 = pnand %p1883_p1, %p241_p2  ;;  %p31_p4 = scmp.ge.s32.totalorder %s3170_s25, 2 }
   0x8   : > { %v2327_v0 = vld [vmem:[%s3157_s1 + $0x40] sm:$0xff] (!%p242_p3)   ;;  %v2331_v4 = vld [vmem:[%s3157_s1 + $0x48] sm:$0xff] (!%p242_p3)   ;;  %v2335_v8 = vld [vmem:[%s3157_s1 + $0x50] sm:$0xff] (!%p242_p3)   ;;  %p294_p5 = scmp.lt.s32.totalorder (!%p242_p3), %s2425_s22, 1  ;;  %p296_p6 = scmp.lt.s32.totalorder (!%p242_p3), %s2421_s21, 1  ;;  %vm383_vm0 = vcmask (!%p242_p3), 1046528  }
   0x9   : > { %s3172_s25 = smov (%p31_p4, %s3170_s25), 0  ;;  %245 = sbr.rel (%p242_p3) target bundleno = 434 (0x1b2), region = 36 }
   0xa   : > { %v2328_v1 = vld [vmem:[%s3157_s1 + $0xc0] sm:$0xff] (!%p242_p3)   ;;  %1965 = vmatprep.subr.bf16.mxu0 (!%p242_p3), %v2327_v0  ;;  %v2332_v5 = vld [vmem:[%s3157_s1 + $0xc8] sm:$0xff] (!%p242_p3)   ;;  %v2336_v9 = vld [vmem:[%s3157_s1 + $0xd0] sm:$0xff] (!%p242_p3)   ;;  %vm440_vm1 = vcmask (!%p242_p3), 1045504   ;;  %s1885_s11 = sshll.u32 (!%p242_p3), %s2421_s21, 3 }
   0xb   : > { %v2329_v2 = vld [vmem:[%s3157_s1] sm:$0xff] (!%p242_p3)   ;;  %2029 = vmatprep.subr.bf16.mxu1 (!%p242_p3), %v2328_v1  ;;  %v2333_v6 = vld [vmem:[%s3157_s1 + $0x8] sm:$0xff] (!%p242_p3)   ;;  %v2337_v10 = vld [vmem:[%s3157_s1 + $0x10] sm:$0xff] (!%p242_p3)   ;;  %p306_p7 = scmp.lt.s32.totalorder (!%p242_p3), %s1885_s11, 15 }
   0xc   : > { %v2330_v3 = vld [vmem:[%s3157_s1 + $0x80] sm:$0xff] (!%p242_p3)   ;;  %1966 = vmatpush3.bf16.msra.mxu0 (!%p242_p3), %v2329_v2  ;;  %v2334_v7 = vld [vmem:[%s3157_s1 + $0x88] sm:$0xff] (!%p242_p3)   ;;  %v2338_v11 = vld [vmem:[%s3157_s1 + $0x90] sm:$0xff] (!%p242_p3)  }
   0xd   : > { %2030 = vmatpush3.bf16.msra.mxu1 (!%p242_p3), %v2330_v3  ;;  %1967 = vmatprep.subr.bf16.mxu0 (!%p242_p3), %v2331_v4  ;;  %v2339_v12 = vld [vmem:[%s3157_s1 + $0x58] sm:$0xff] (!%p242_p3)   ;;  %v2343_v16 = vld [vmem:[%s3157_s1 + $0x60] sm:$0xff] (!%p242_p3)   ;;  %v2347_v20 = vld [vmem:[%s3157_s1 + $0x68] sm:$0xff] (!%p242_p3)  }
   0xe   : > { %2031 = vmatprep.subr.bf16.mxu1 (!%p242_p3), %v2332_v5  ;;  %v2340_v13 = vld [vmem:[%s3157_s1 + $0xd8] sm:$0xff] (!%p242_p3)   ;;  %v2344_v17 = vld [vmem:[%s3157_s1 + $0xe0] sm:$0xff] (!%p242_p3)   ;;  %v2348_v21 = vld [vmem:[%s3157_s1 + $0xe8] sm:$0xff] (!%p242_p3)  }
   0xf   : > { %v2341_v14 = vld [vmem:[%s3157_s1 + $0x18] sm:$0xff] (!%p242_p3)   ;;  %v2345_v18 = vld [vmem:[%s3157_s1 + $0x20] sm:$0xff] (!%p242_p3)   ;;  %v2349_v22 = vld [vmem:[%s3157_s1 + $0x28] sm:$0xff] (!%p242_p3)  }
  0x10   : > { %1968 = vmatpush3.bf16.msra.mxu0 %v2333_v6  ;;  %s3174_s22 = smov (!%p294_p5, %s2425_s22), 1  ;;  %v2342_v15 = vld [vmem:[%s3157_s1 + $0x98] sm:$0xff]   ;;  %v2346_v19 = vld [vmem:[%s3157_s1 + $0xa0] sm:$0xff]   ;;  %v2350_v23 = vld [vmem:[%s3157_s1 + $0xa8] sm:$0xff]   ;;  %s3176_s11 = smov (!%p306_p7, %s1885_s11), 15 }
  0x11   : > { %2032 = vmatpush3.bf16.msra.mxu1 %v2334_v7  ;;  %1969 = vmatprep.subr.bf16.mxu0 %v2335_v8  ;;  %s2562_s15 = scalar_select %p296_p6, %s2421_s21, 1  ;;  %v2351_v24 = vld [vmem:[%s3157_s1 + $0x70] sm:$0xff]   ;;  %v2355_v28 = vld [vmem:[%s3157_s1 + $0x78] sm:$0xff]   ;;  %v2359_v48 = vld [vmem:[%s3157_s1 + $0x140] sm:$0xff]  }
  0x12   : > { %2033 = vmatprep.subr.bf16.mxu1 %v2336_v9  ;;  %s2286_s27 = smul.u32 60, %s3174_s22  ;;  %v2352_v25 = vld [vmem:[%s3157_s1 + $0xf0] sm:$0xff]   ;;  %v2356_v29 = vld [vmem:[%s3157_s1 + $0xf8] sm:$0xff]   ;;  %v2360_v52 = vld [vmem:[%s3157_s1 + $0x100] sm:$0xff]   ;;  %s1886_s21 = sshll.u32 %s3176_s11, 1 }
  0x13   : > { %s2285_s30 = smul.u32 30, %s2562_s15  ;;  %v2353_v26 = vld [vmem:[%s3157_s1 + $0x30] sm:$0xff]   ;;  %v2357_v30 = vld [vmem:[%s3157_s1 + $0x38] sm:$0xff]   ;;  %v2361_v59 = vld [vmem:[%s3157_s1 + $0x148] sm:$0xff]   ;;  %s1887_s12 = sshll.u32 %s3174_s22, 5 }
  0x14   : > { %1970 = vmatpush3.bf16.msra.mxu0 %v2337_v10  ;;  %v2354_v27 = vld [vmem:[%s3157_s1 + $0xb0] sm:$0xff]   ;;  %v2358_v31 = vld [vmem:[%s3157_s1 + $0xb8] sm:$0xff]   ;;  %v2362_v4 = vld [vmem:[%s3157_s1 + $0x108] sm:$0xff]   ;;  %s310_s14 = sadd.s32 %s1887_s12, %s1886_s21  ;;  %s1889_s19 = sshll.u32 %s3174_s22, 1 }
  0x15   : > { %2034 = vmatpush3.bf16.msra.mxu1 %v2338_v11  ;;  %1971 = vmatprep.subr.bf16.mxu0 %v2339_v12  ;;  %s300_s16 = sadd.s32 %s2286_s27, %s2285_s30  ;;  %v2363_v10 = vld [vmem:[%s3157_s1 + $0x150] sm:$0xff]   ;;  %s319_s20 = sadd.s32 %s1889_s19, %s2562_s15 }
  0x16   : > { %2035 = vmatprep.subr.bf16.mxu1 %v2340_v13  ;;  %s1884_s29 = sshll.u32 %s300_s16, 3  ;;  %s1888_s16 = sshll.u32 %s310_s14, 3 }
  0x17   : > { %s2611_s13 = scalar_lea.vmem %s3156_s0, %s1884_s29  ;;  %s3097_s18 = scalar_lea.vmem %s3160_s4, %s1888_s16 }
  0x18   : > { %1972 = vmatpush3.bf16.msra.mxu0 %v2341_v14  ;;  %v329_v32 = vld [vmem:[%s2611_s13] sm:$0xff]  ;;  %v330_v33 = vld [vmem:[%s2611_s13 + $0x8] sm:$0xff]  ;;  %v331_v34 = vld [vmem:[%s2611_s13 + $0x10] sm:$0x3]  ;;  %s320_s29 = scalar_lea.vmem %s3161_s5, %s319_s20  ;;  %s327_s27 = scalar_lea.vmem %s3162_s6, %s319_s20 }
  0x19   : > { %2036 = vmatpush3.bf16.msra.mxu1 %v2342_v15  ;;  %1973 = vmatprep.subr.bf16.mxu0 %v2343_v16  ;;  %v384_v35 = vrot.slane %v329_v32, 1  ;;  %v385_v36 = vrot.slane %v330_v33, 1  ;;  %v387_v37 = vrot.slane %v331_v34, 1  ;;  %v332_v38 = vld [vmem:[%s2611_s13 + $0x18] sm:$0xff]  ;;  %v333_v39 = vld [vmem:[%s2611_s13 + $0x20] sm:$0xff]  ;;  %v444_v40 = vrot.slane %v331_v34, 2 }
  0x1a   : > { %2037 = vmatprep.subr.bf16.mxu1 %v2344_v17  ;;  %v389_v41 = vrot.slane %v332_v38, 1  ;;  %v390_v42 = vrot.slane %v333_v39, 1  ;;  %v446_v43 = vrot.slane %v332_v38, 2  ;;  %v534_v46 = vpack.c.bf16 %v333_v39, %v332_v38  ;;  %v2633_v53 = vld [vmem:[%s2611_s13 + $0x30] sm:$0xff]  ;;  %v334_v55 = vld [vmem:[%s2611_s13 + $0x28] sm:$0x3] }
  0x1b   : > { %v386_v44 = vsel %vm383_vm0, %v384_v35, %v385_v36  ;;  %v388_v45 = vsel %vm383_vm0, %v385_v36, %v387_v37  ;;  %v531_v47 = vpack.c.bf16 %v330_v33, %v329_v32  ;;  %v441_v50 = vrot.slane %v329_v32, 2  ;;  %v336_v57 = vld [vmem:[%s2611_s13 + $0x38] sm:$0xff]  ;;  %v337_v5 = vld [vmem:[%s2611_s13 + $0x40] sm:$0x3]  ;;  %v2656_v9 = vld [vmem:[%s2611_s13 + $0x48] sm:$0xff] }
  0x1c   : > { %1974 = vmatpush3.bf16.msra.mxu0 %v2345_v18  ;;  %v532_v49 = vpack.c.bf16 %v388_v45, %v386_v44  ;;  %v442_v51 = vrot.slane %v330_v33, 2  ;;  %v447_v54 = vrot.slane %v333_v39, 2  ;;  %1266 = vmatprep.mubr.bf16.mxu1 %v534_v46  ;;  %v391_v56 = vsel %vm383_vm0, %v389_v41, %v390_v42  ;;  %v2666_v14 = vld [vmem:[%s2611_s13 + $0x50] sm:$0xff]  ;;  %v2364_v15 = vld [vmem:[%s3157_s1 + $0x1c0] sm:$0xff]   ;;  %v2368_v32 = vld [vmem:[%s3157_s1 + $0x1c8] sm:$0xff]  }
  0x1d   : > { %2038 = vmatpush3.bf16.msra.mxu1 %v2346_v19  ;;  %1975 = vmatprep.subr.bf16.mxu0 %v2347_v20  ;;  %v394_v58 = vrot.slane %v2633_v53, 1  ;;  %v392_v62 = vrot.slane %v334_v55, 1  ;;  %v395_v63 = vrot.slane %v336_v57, 1  ;;  %v2645_v1 = vpack.c.bf16 %v336_v57, %v2633_v53  ;;  %v2365_v18 = vld [vmem:[%s3157_s1 + $0x110] sm:$0xff]   ;;  %v2369_v35 = vld [vmem:[%s3157_s1 + $0x118] sm:$0xff]   ;;  %v2710_v36 = vld [vmem:[%s2611_s13 + $0x68] sm:$0xff] }
  0x1e   : > { %2039 = vmatprep.subr.bf16.mxu1 %v2348_v21  ;;  %1169 = vmatprep.mubr.bf16.mxu0 %v532_v49  ;;  %v443_v60 = vsel %vm440_vm1, %v441_v50, %v442_v51  ;;  %v445_v61 = vsel %vm440_vm1, %v442_v51, %v444_v40  ;;  %v449_v2 = vrot.slane %v334_v55, 2  ;;  %v397_v8 = vrot.slane %v337_v5, 1  ;;  %v2370_v37 = vld [vmem:[%s3157_s1 + $0x188] sm:$0xff]   ;;  %v343_v38 = vld [vmem:[%s2611_s13 + $0x70] sm:$0x3]  ;;  %v2373_v50 = vld [vmem:[%s3157_s1 + $0x120] sm:$0xff]  }
  0x1f   : > { %v533_v0 = vpack.c.bf16 %v445_v61, %v443_v60  ;;  %v393_v3 = vsel %vm383_vm0, %v390_v42, %v392_v62  ;;  %v396_v7 = vsel %vm383_vm0, %v394_v58, %v395_v63  ;;  %v451_v11 = vrot.slane %v2633_v53, 2  ;;  %v2372_v49 = vld [vmem:[%s3157_s1 + $0x1d0] sm:$0xff]   ;;  %v2755_v58 = vld [vmem:[%s2611_s13 + $0x88] sm:$0x3]  ;;  %v2376_v62 = vld [vmem:[%s3157_s1 + $0x1d8] sm:$0xff]  }
  0x20   : > { %1976 = vmatpush3.bf16.msra.mxu0 %v2349_v22  ;;  %v2652_v6 = vpack.c.bf16 %v393_v3, %v391_v56  ;;  %v448_v12 = vsel %vm440_vm1, %v446_v43, %v447_v54  ;;  %v450_v13 = vsel %vm440_vm1, %v447_v54, %v449_v2  ;;  %v398_v16 = vsel %vm383_vm0, %v395_v63, %v397_v8  ;;  %v2366_v22 = vld [vmem:[%s3157_s1 + $0x180] sm:$0xff]   ;;  %v2374_v51 = vld [vmem:[%s3157_s1 + $0x190] sm:$0xff]   ;;  %v2746_v54 = vld [vmem:[%s2611_s13 + $0x78] sm:$0xff] }
  0x21   : > { %2040 = vmatpush3.bf16.msra.mxu1 %v2350_v23  ;;  %1977 = vmatprep.subr.bf16.mxu0 %v2351_v24  ;;  %v399_v17 = vrot.slane %v2656_v9, 1  ;;  %v2677_v19 = vpack.c.bf16 %v398_v16, %v396_v7  ;;  %v2679_v20 = vpack.c.bf16 %v450_v13, %v448_v12  ;;  %v400_v21 = vrot.slane %v2666_v14, 1  ;;  %v340_v23 = vld [vmem:[%s2611_s13 + $0x58] sm:$0x3]  ;;  %v2371_v43 = vld [vmem:[%s3157_s1 + $0x160] sm:$0xff]   ;;  %v2375_v61 = vld [vmem:[%s3157_s1 + $0x168] sm:$0xff]  }
  0x22   : > { %2041 = vmatprep.subr.bf16.mxu1 %v2352_v25  ;;  %v452_v24 = vrot.slane %v336_v57, 2  ;;  %v2688_v25 = vpack.c.bf16 %v2666_v14, %v2656_v9  ;;  %v456_v39 = vrot.slane %v2656_v9, 2  ;;  %v457_v40 = vrot.slane %v2666_v14, 2  ;;  %v2752_v57 = vld [vmem:[%s2611_s13 + $0x80] sm:$0xff]  ;;  %v2377_v3 = vld [vmem:[%s3157_s1 + $0x128] sm:$0xff]   ;;  %v2378_v9 = vld [vmem:[%s3157_s1 + $0x198] sm:$0xff]  }
  0x23   : > { %v405_v45 = vrot.slane %v2710_v36, 1  ;;  %v410_v60 = vrot.slane %v2752_v57, 1  ;;  %v412_v2 = vrot.slane %v2755_v58, 1  ;;  %v2777_v7 = vpack.c.bf16 %v2752_v57, %v2746_v54  ;;  %v2794_v14 = vld [vmem:[%s2611_s13 + $0x98] sm:$0xff] }
  0x24   : > { %1978 = vmatpush3.bf16.msra.mxu0 %v2353_v26  ;;  %v454_v26 = vrot.slane %v337_v5, 2  ;;  %v453_v33 = vsel %vm440_vm1, %v451_v11, %v452_v24  ;;  %v458_v55 = vsel %vm440_vm1, %v456_v39, %v457_v40  ;;  %v462_v5 = vrot.slane %v2710_v36, 2  ;;  %v2788_v11 = vld [vmem:[%s2611_s13 + $0xa0] sm:$0x3] }
  0x25   : > { %2042 = vmatpush3.bf16.msra.mxu1 %v2354_v27  ;;  %1979 = vmatprep.subr.bf16.mxu0 %v2355_v28  ;;  %v402_v27 = vrot.slane %v340_v23, 1  ;;  %v2367_v28 = vld [vmem:[%s3157_s1 + $0x158] sm:$0xff]   ;;  %v464_v8 = vrot.slane %v343_v38, 2  ;;  %v413_v13 = vsel %vm383_vm0, %v410_v60, %v412_v2  ;;  %v472_v39 = vrot.slane %v2794_v14, 2 }
  0x26   : > { %2043 = vmatprep.subr.bf16.mxu1 %v2356_v29  ;;  %v401_v29 = vsel %vm383_vm0, %v399_v17, %v400_v21  ;;  %v455_v34 = vsel %vm440_vm1, %v452_v24, %v454_v26  ;;  %v415_v24 = vrot.slane %v2794_v14, 1  ;;  %v2382_v26 = vld [vmem:[%s3157_s1 + $0x1a0] sm:$0xff]  }
  0x27   : > { %v2724_v44 = vpack.c.bf16 %v455_v34, %v453_v33  ;;  %v465_v17 = vsel %vm440_vm1, %v462_v5, %v464_v8  ;;  %v469_v33 = vrot.slane %v2755_v58, 2  ;;  %v2384_v34 = vld [vmem:[%s3157_s1 + $0x1a8] sm:$0xff]   ;;  %v353_v58 = vld [vmem:[%s2611_s13 + $0xc0] sm:$0xff] }
  0x28   : > { %1980 = vmatpush3.bf16.msra.mxu0 %v2357_v30  ;;  %v403_v30 = vsel %vm383_vm0, %v400_v21, %v402_v27 }
  0x29   : > { %2044 = vmatpush3.bf16.msra.mxu1 %v2358_v31  ;;  %2093 = vmatprep.subr.bf16.mxu0 %v2359_v48  ;;  %v2698_v31 = vld [vmem:[%s2611_s13 + $0x60] sm:$0xff]  ;;  %v2718_v41 = vpack.c.bf16 %v403_v30, %v401_v29  ;;  %v459_v48 = vrot.slane %v340_v23, 2  ;;  %v2383_v29 = vld [vmem:[%s3157_s1 + $0x1e8] sm:$0xff]   ;;  %v466_v30 = vrot.slane %v2746_v54, 2 }
  0x2a   : > { %2157 = vmatprep.subr.bf16.mxu1 %v2364_v15  ;;  %v404_v42 = vrot.slane %v2698_v31, 1  ;;  %v2379_v15 = vld [vmem:[%s3157_s1 + $0x170] sm:$0xff]  }
  0x2b   : > { %1170 = vmatmul.mubr.bf16.vlgmr.msra.gmra.mrb[0].mxu0 %v531_v47  ;;  %v2729_v47 = vpack.c.bf16 %v2710_v36, %v2698_v31  ;;  %v460_v56 = vsel %vm440_vm1, %v457_v40, %v459_v48  ;;  %v2385_v36 = vld [vmem:[%s3157_s1 + $0x178] sm:$0xff]  }
  0x2c   : > { %2094 = vmatpush3.bf16.msra.mxu0 %v2360_v52  ;;  %1267 = vmatmul.mubr.bf16.vlgmr.msra.gmra.mrb[0].mxu1 %v533_v0  ;;  %v406_v52 = vsel %vm383_vm0, %v404_v42, %v405_v45  ;;  %v2767_v0 = vpack.c.bf16 %v460_v56, %v458_v55  ;;  %v2389_v55 = vld [vmem:[%s3157_s1 + $0x1f8] sm:$0xff]  }
  0x2d   : > { %2095 = vmatprep.subr.bf16.mxu0 %v2361_v59  ;;  %1274 = vmatprep.mubr.bf16.mxu1 %v2645_v1  ;;  %v409_v59 = vrot.slane %v2746_v54, 1 }
  0x2e   : > { %1177 = vmatprep.mubr.bf16.mxu0 %v2652_v6  ;;  %2158 = vmatpush3.bf16.msra.mxu1 %v2366_v22  ;;  %v2381_v22 = vld [vmem:[%s3157_s1 + $0x130] sm:$0xff]  }
  0x2f   : > { %2159 = vmatprep.subr.bf16.mxu1 %v2368_v32  ;;  %v411_v12 = vsel %vm383_vm0, %v409_v59, %v410_v60  ;;  %v2390_v59 = vld [vmem:[%s3157_s1 + $0x1b8] sm:$0xff]  }
  0x30   : > { %2096 = vmatpush3.bf16.msra.mxu0 %v2362_v4  ;;  %v461_v4 = vrot.slane %v2698_v31, 2  ;;  %v2809_v23 = vpack.c.bf16 %v413_v13, %v411_v12  ;;  %v467_v31 = vrot.slane %v2752_v57, 2 }
  0x31   : > { %2097 = vmatprep.subr.bf16.mxu0 %v2363_v10  ;;  %v2785_v10 = vld [vmem:[%s2611_s13 + $0x90] sm:$0xff] }
  0x32   : > { %2160 = vmatpush3.bf16.msra.mxu1 %v2370_v37  ;;  %v463_v16 = vsel %vm440_vm1, %v461_v4, %v462_v5  ;;  %v414_v21 = vrot.slane %v2785_v10, 1  ;;  %v2825_v32 = vpack.c.bf16 %v2794_v14, %v2785_v10  ;;  %v2838_v37 = vld [vmem:[%s2611_s13 + $0xa8] sm:$0xff]  ;;  %v470_v48 = vsel %vm440_vm1, %v467_v31, %v469_v33 }
  0x33   : > { %1178 = vmatmul.mubr.bf16.gmra.mrb[4].mxu0 %v534_v46  ;;  %v407_v46 = vrot.slane %v343_v38, 1  ;;  %2161 = vmatprep.subr.bf16.mxu1 %v2372_v49  ;;  %v2815_v27 = vpack.c.bf16 %v465_v17, %v463_v16  ;;  %v2841_v38 = vld [vmem:[%s2611_s13 + $0xb8] sm:$0x3]  ;;  %v474_v49 = vrot.slane %v2788_v11, 2  ;;  %v500_v4 = vrot.slane %v353_v58, 1 }
  0x34   : > { %1185 = vmatprep.mubr.bf16.mxu0 %v2677_v19  ;;  %2098 = vmatpush3.bf16.msra.mxu0 %v2365_v18  ;;  %v2380_v18 = vld [vmem:[%s3157_s1 + $0x1e0] sm:$0xff]   ;;  %v416_v40 = vsel %vm383_vm0, %v414_v21, %v415_v24  ;;  %v422_v57 = vrot.slane %v2841_v38, 1  ;;  %v507_v5 = vrot.slane %v353_v58, 2  ;;  %v476_v12 = vrot.slane %v2838_v37, 2  ;;  %v355_v17 = vld [vmem:[%s2611_s13 + $0xd0] sm:$0x3] }
  0x35   : > { %1275 = vmatmul.mubr.bf16.gmra.mrb[4].mxu1 %v2679_v20  ;;  %2099 = vmatprep.subr.bf16.mxu0 %v2367_v28  ;;  %v408_v53 = vsel %vm383_vm0, %v405_v45, %v407_v46  ;;  %v417_v28 = vrot.slane %v2788_v11, 1  ;;  %v2386_v45 = vld [vmem:[%s3157_s1 + $0x1f0] sm:$0xff]   ;;  %v468_v46 = vsel %vm440_vm1, %v466_v30, %v467_v31  ;;  %v479_v14 = vrot.slane %v2841_v38, 2  ;;  %v358_v30 = vld [vmem:[%s2611_s13 + $0xe8] sm:$0x3] }
  0x36   : > { %1282 = vmatprep.mubr.bf16.mxu1 %v2688_v25  ;;  %2162 = vmatpush3.bf16.msra.mxu1 %v2374_v51  ;;  %v2765_v63 = vpack.c.bf16 %v408_v53, %v406_v52  ;;  %v419_v51 = vrot.slane %v2838_v37, 1  ;;  %v2388_v52 = vld [vmem:[%s3157_s1 + $0x1b0] sm:$0xff]   ;;  %v2870_v56 = vpack.c.bf16 %v470_v48, %v468_v46  ;;  %v503_v21 = vrot.slane %v355_v17, 1 }
  0x37   : > { %2163 = vmatprep.subr.bf16.mxu1 %v2376_v62  ;;  %v418_v42 = vsel %vm383_vm0, %v415_v24, %v417_v28  ;;  %v354_v62 = vld [vmem:[%s2611_s13 + $0xc8] sm:$0xff]  ;;  %v510_v24 = vrot.slane %v355_v17, 2  ;;  %v2911_v28 = vld [vmem:[%s2611_s13 + $0xe0] sm:$0xff] }
  0x38   : > { %2100 = vmatpush3.bf16.msra.mxu0 %v2369_v35  ;;  %v471_v35 = vrot.slane %v2785_v10, 2  ;;  %v2864_v53 = vpack.c.bf16 %v418_v42, %v416_v40  ;;  %v501_v10 = vrot.slane %v354_v62, 1  ;;  %v508_v11 = vrot.slane %v354_v62, 2 }
  0x39   : > { %2101 = vmatprep.subr.bf16.mxu0 %v2371_v43  ;;  %v2848_v43 = vld [vmem:[%s2611_s13 + $0xb0] sm:$0xff]  ;;  %v518_v33 = vrot.slane %v2911_v28, 1  ;;  %v525_v42 = vrot.slane %v2911_v28, 2 }
  0x3a   : > { %2164 = vmatpush3.bf16.msra.mxu1 %v2378_v9  ;;  %v420_v54 = vrot.slane %v2848_v43, 1  ;;  %v2879_v60 = vpack.c.bf16 %v2848_v43, %v2838_v37  ;;  %v473_v2 = vsel %vm440_vm1, %v471_v35, %v472_v39  ;;  %v477_v13 = vrot.slane %v2848_v43, 2 }
  0x3b   : > { %1186 = vmatmul.mubr.bf16.gmra.mrb[8].mxu0 %v2645_v1  ;;  %2165 = vmatprep.subr.bf16.mxu1 %v2380_v18  ;;  %v502_v18 = vsel %vm383_vm0, %v500_v4, %v501_v10  ;;  %v511_v35 = vsel %vm440_vm1, %v508_v11, %v510_v24 }
  0x3c   : > { %1193 = vmatprep.mubr.bf16.mxu0 %v2718_v41  ;;  %2102 = vmatpush3.bf16.msra.mxu0 %v2373_v50  ;;  %v2387_v50 = vld [vmem:[%s3157_s1 + $0x138] sm:$0xff]   ;;  %v421_v8 = vsel %vm383_vm0, %v419_v51, %v420_v54  ;;  %v423_v9 = vsel %vm383_vm0, %v420_v54, %v422_v57  ;;  %v478_v46 = vsel %vm440_vm1, %v476_v12, %v477_v13 }
  0x3d   : > { %1283 = vmatmul.mubr.bf16.gmra.mrb[8].mxu1 %v2724_v44  ;;  %2103 = vmatprep.subr.bf16.mxu0 %v2375_v61  ;;  %v2884_v61 = vld [vmem:[%s3157_s1 + $0x200] sm:$0xff]   ;;  %v2902_v16 = vpack.c.bf16 %v423_v9, %v421_v8  ;;  %v480_v48 = vsel %vm440_vm1, %v477_v13, %v479_v14 }
  0x3e   : > { %1290 = vmatprep.mubr.bf16.mxu1 %v2729_v47  ;;  %2166 = vmatpush3.bf16.msra.mxu1 %v2382_v26  ;;  %v2908_v26 = vld [vmem:[%s2611_s13 + $0xd8] sm:$0xff]  ;;  %v2948_v54 = vpack.c.bf16 %v480_v48, %v478_v46 }
  0x3f   : > { %2167 = vmatprep.subr.bf16.mxu1 %v2383_v29  ;;  %v2913_v29 = vpack.c.bf16 %v354_v62, %v353_v58  ;;  %v517_v31 = vrot.slane %v2908_v26, 1  ;;  %v524_v37 = vrot.slane %v2908_v26, 2 }
  0x40   : > { %2104 = vmatpush3.bf16.msra.mxu0 %v2377_v3  ;;  %v475_v3 = vsel %vm440_vm1, %v472_v39, %v474_v49 }
  0x41   : > { %2105 = vmatprep.subr.bf16.mxu0 %v2379_v15  ;;  %v2900_v15 = vpack.c.bf16 %v475_v3, %v473_v2  ;;  %v2928_v40 = vsel %vm383_vm0, %v517_v31, %v518_v33 }
  0x42   : > { %2168 = vmatpush3.bf16.msra.mxu1 %v2384_v34  ;;  %v504_v34 = vsel %vm383_vm0, %v501_v10, %v503_v21 }
  0x43   : > { %1194 = vmatmul.mubr.bf16.gmra.mrb[12].mxu0 %v2688_v25  ;;  %2169 = vmatprep.subr.bf16.mxu1 %v2386_v45  ;;  %v2923_v38 = vpack.c.bf16 %v504_v34, %v502_v18  ;;  %v527_v45 = vrot.slane %v358_v30, 2 }
  0x44   : > { %1201 = vmatprep.mubr.bf16.mxu0 %v2765_v63  ;;  %2106 = vmatpush3.bf16.msra.mxu0 %v2381_v22  ;;  %v509_v22 = vsel %vm440_vm1, %v507_v5, %v508_v11 }
  0x45   : > { %1291 = vmatmul.mubr.bf16.gmra.mrb[12].mxu1 %v2767_v0  ;;  %2107 = vmatprep.subr.bf16.mxu0 %v2385_v36  ;;  %v520_v36 = vrot.slane %v358_v30, 1  ;;  %v2925_v39 = vpack.c.bf16 %v511_v35, %v509_v22  ;;  %v2944_v51 = vsel %vm440_vm1, %v525_v42, %v527_v45 }
  0x46   : > { %1298 = vmatprep.mubr.bf16.mxu1 %v2777_v7  ;;  %2170 = vmatpush3.bf16.msra.mxu1 %v2388_v52 }
  0x47   : > { %2171 = vmatprep.subr.bf16.mxu1 %v2389_v55  ;;  %v2933_v43 = vsel %vm383_vm0, %v518_v33, %v520_v36  ;;  %v2392_v55 = vld [vmem:[%s3157_s1 + $0x208] sm:$0xff]  }
  0x48   : > { %2108 = vmatpush3.bf16.msra.mxu0 %v2387_v50  ;;  %v559_v49 = vpack.c.bf16 %v2933_v43, %v2928_v40  ;;  %v2941_v50 = vsel %vm440_vm1, %v524_v37, %v525_v42 }
  0x49   : > { %2237 = vmatprep.subr.bf16.mxu0 %v2884_v61  ;;  %v560_v52 = vpack.c.bf16 %v2944_v51, %v2941_v50 }
  0x4a   : > { %2172 = vmatpush3.bf16.msra.mxu1 %v2390_v59 }
  0x4b   : > { %1202 = vmatmul.mubr.bf16.gmra.mrb[16].mxu0 %v2729_v47  ;;  %2269 = vmatprep.subr.bf16.mxu1 %v2884_v61 }
  0x4c   : > { %1209 = vmatprep.mubr.bf16.mxu0 %v2809_v23 }
  0x4d   : > { %1299 = vmatmul.mubr.bf16.gmra.mrb[16].mxu1 %v2815_v27 }
  0x4e   : > { %1306 = vmatprep.mubr.bf16.mxu1 %v2825_v32 }
  0x53   : > { %1210 = vmatmul.mubr.bf16.gmra.mrb[20].mxu0 %v2777_v7 }
  0x54   : > { %1217 = vmatprep.mubr.bf16.mxu0 %v2864_v53 }
  0x55   : > { %1307 = vmatmul.mubr.bf16.gmra.mrb[20].mxu1 %v2870_v56 }
  0x56   : > { %1314 = vmatprep.mubr.bf16.mxu1 %v2879_v60 }
  0x5b   : > { %1218 = vmatmul.mubr.bf16.gmra.mrb[24].mxu0 %v2825_v32 }
  0x5c   : > { %1225 = vmatprep.mubr.bf16.mxu0 %v2902_v16 }
  0x5d   : > { %1315 = vmatmul.mubr.bf16.gmra.mrb[24].mxu1 %v2900_v15 }
  0x5e   : > { %1322 = vmatprep.mubr.bf16.mxu1 %v2913_v29 }
  0x63   : > { %1226 = vmatmul.mubr.bf16.gmra.mrb[28].mxu0 %v2879_v60 }
  0x64   : > { %1363 = vmatprep.mubr.bf16.mxu0 %v2679_v20  ;;  %v2393_v20 = vld [vmem:[%s3157_s1 + $0x210] sm:$0xff]  }
  0x65   : > { %1323 = vmatmul.mubr.bf16.gmra.mrb[28].mxu1 %v2948_v54 }
  0x66   : > { %1460 = vmatprep.mubr.bf16.mxu1 %v2677_v19 }
  0x6b   : > { %1364 = vmatmul.mubr.bf16.vlgmr.msra.gmra.mrb[32].mxu0 %v2652_v6  ;;  %v2394_v6 = vld [vmem:[%s3157_s1 + $0x218] sm:$0xff]  }
  0x6c   : > { %2238 = vmatpush3.bf16.msra.mxu0 %v2884_v61  ;;  %1371 = vmatprep.mubr.bf16.mxu0 %v2724_v44 }
  0x6d   : > { %1461 = vmatmul.mubr.bf16.vlgmr.msra.gmra.mrb[32].mxu1 %v2645_v1  ;;  %2239 = vmatprep.subr.bf16.mxu0 %v2392_v55  ;;  %v2395_v1 = vld [vmem:[%s3157_s1 + $0x220] sm:$0xff]  }
  0x6e   : > { %1468 = vmatprep.mubr.bf16.mxu1 %v2718_v41  ;;  %2277 = vmatpush3.bf16.msra.mxu1 %v2884_v61 }
  0x6f   : > { %2270 = vmatprep.subr.bf16.mxu1 %v2392_v55 }
  0x70   : > { %2240 = vmatpush3.bf16.msra.mxu0 %v2392_v55 }
  0x71   : > { %2241 = vmatprep.subr.bf16.mxu0 %v2393_v20 }
  0x72   : > { %2278 = vmatpush3.bf16.msra.mxu1 %v2392_v55 }
  0x73   : > { %1372 = vmatmul.mubr.bf16.gmra.mrb[36].mxu0 %v2677_v19  ;;  %2271 = vmatprep.subr.bf16.mxu1 %v2393_v20  ;;  %v2396_v19 = vld [vmem:[%s3157_s1 + $0x228] sm:$0xff]  }
  0x74   : > { %1379 = vmatprep.mubr.bf16.mxu0 %v2767_v0  ;;  %2242 = vmatpush3.bf16.msra.mxu0 %v2393_v20 }
  0x75   : > { %1469 = vmatmul.mubr.bf16.gmra.mrb[36].mxu1 %v2688_v25  ;;  %2243 = vmatprep.subr.bf16.mxu0 %v2394_v6  ;;  %v2397_v25 = vld [vmem:[%s3157_s1 + $0x230] sm:$0xff]  }
  0x76   : > { %1476 = vmatprep.mubr.bf16.mxu1 %v2765_v63  ;;  %2279 = vmatpush3.bf16.msra.mxu1 %v2393_v20 }
  0x77   : > { %2272 = vmatprep.subr.bf16.mxu1 %v2394_v6 }
  0x78   : > { %2244 = vmatpush3.bf16.msra.mxu0 %v2394_v6 }
  0x79   : > { %2245 = vmatprep.subr.bf16.mxu0 %v2395_v1 }
  0x7a   : > { %2280 = vmatpush3.bf16.msra.mxu1 %v2394_v6 }
  0x7b   : > { %1380 = vmatmul.mubr.bf16.gmra.mrb[40].mxu0 %v2718_v41  ;;  %2273 = vmatprep.subr.bf16.mxu1 %v2395_v1  ;;  %v2398_v41 = vld [vmem:[%s3157_s1 + $0x238] sm:$0xff]  }
  0x7c   : > { %1387 = vmatprep.mubr.bf16.mxu0 %v2815_v27  ;;  %2246 = vmatpush3.bf16.msra.mxu0 %v2395_v1 }
  0x7d   : > { %1477 = vmatmul.mubr.bf16.gmra.mrb[40].mxu1 %v2729_v47  ;;  %2247 = vmatprep.subr.bf16.mxu0 %v2396_v19  ;;  %v558_v47 = vpack.c.bf16 %v2911_v28, %v2908_v26 }
  0x7e   : > { %1484 = vmatprep.mubr.bf16.mxu1 %v2809_v23  ;;  %2281 = vmatpush3.bf16.msra.mxu1 %v2395_v1 }
  0x7f   : > { %2274 = vmatprep.subr.bf16.mxu1 %v2396_v19 }
  0x80   : > { %2248 = vmatpush3.bf16.msra.mxu0 %v2396_v19 }
  0x81   : > { %2249 = vmatprep.subr.bf16.mxu0 %v2397_v25 }
  0x82   : > { %2282 = vmatpush3.bf16.msra.mxu1 %v2396_v19 }
  0x83   : > { %1388 = vmatmul.mubr.bf16.gmra.mrb[44].mxu0 %v2765_v63  ;;  %2275 = vmatprep.subr.bf16.mxu1 %v2397_v25 }
  0x84   : > { %1395 = vmatprep.mubr.bf16.mxu0 %v2870_v56  ;;  %2250 = vmatpush3.bf16.msra.mxu0 %v2397_v25 }
  0x85   : > { %1485 = vmatmul.mubr.bf16.gmra.mrb[44].mxu1 %v2777_v7  ;;  %2251 = vmatprep.subr.bf16.mxu0 %v2398_v41 }
  0x86   : > { %1492 = vmatprep.mubr.bf16.mxu1 %v2864_v53  ;;  %2283 = vmatpush3.bf16.msra.mxu1 %v2397_v25 }
  0x87   : > { %2276 = vmatprep.subr.bf16.mxu1 %v2398_v41 }
  0x88   : > { %2252 = vmatpush3.bf16.msra.mxu0 %v2398_v41 }
  0x8a   : > { %2284 = vmatpush3.bf16.msra.mxu1 %v2398_v41 }
  0x8b   : > { %1396 = vmatmul.mubr.bf16.gmra.mrb[48].mxu0 %v2809_v23 }
  0x8c   : > { %1403 = vmatprep.mubr.bf16.mxu0 %v2900_v15 }
  0x8d   : > { %1493 = vmatmul.mubr.bf16.gmra.mrb[48].mxu1 %v2825_v32 }
  0x8e   : > { %1500 = vmatprep.mubr.bf16.mxu1 %v2902_v16 }
  0x93   : > { %1404 = vmatmul.mubr.bf16.gmra.mrb[52].mxu0 %v2864_v53 }
  0x94   : > { %1411 = vmatprep.mubr.bf16.mxu0 %v2948_v54 }
  0x95   : > { %1501 = vmatmul.mubr.bf16.gmra.mrb[52].mxu1 %v2879_v60 }
  0x96   : > { %1508 = vmatprep.mubr.bf16.mxu1 %v2923_v38 }
  0x9b   : > { %1412 = vmatmul.mubr.bf16.gmra.mrb[56].mxu0 %v2902_v16 }
  0x9c   : > { %1419 = vmatprep.mubr.bf16.mxu0 %v2925_v39 }
  0x9d   : > { %1509 = vmatmul.mubr.bf16.gmra.mrb[56].mxu1 %v2913_v29 }
  0x9e   : > { %1516 = vmatprep.mubr.bf16.mxu1 %v559_v49 }
  0xa3   : > { %1420 = vmatmul.mubr.bf16.gmra.mrb[60].mxu0 %v2923_v38 }
  0xa4   : > { %2253 = vmatprep.mubr.bf16.mxu0 %v2724_v44 }
  0xa5   : > { %1517 = vmatmul.mubr.bf16.gmra.mrb[60].mxu1 %v558_v47 }
  0xa6   : > { %2261 = vmatprep.mubr.bf16.mxu1 %v2900_v15 }
  0xab   : > { %2254 = vmatmul.mubr.bf16.vlgmr.msra.gmra.mrb[64].mxu0 %v2767_v0 }
  0xac   : > { %2257 = vmatprep.mubr.bf16.mxu0 %v2815_v27 }
  0xad   : > { %2262 = vmatmul.mubr.bf16.vlgmr.msra.gmra.mrb[64].mxu1 %v2948_v54 }
  0xae   : > { %2265 = vmatprep.mubr.bf16.mxu1 %v2925_v39 }
  0xb3   : > { %2258 = vmatmul.mubr.bf16.gmra.mrb[68].mxu0 %v2870_v56 }
  0xb5   : > { %2266 = vmatmul.mubr.bf16.gmra.mrb[68].mxu1 %v560_v52 }
  0xfe   : > { %v1981_v63 = vpop.f32.mrb[0].mxu0 }
  0xff   : > { %v1982_v7 = vpop.f32.mrb[1].mxu0  ;;  %v2045_v44 = vpop.f32.mrb[0].mxu1 }
 0x100   : > { %v1983_v23 = vadd.f32 %v1982_v7, %v1981_v63  ;;  %v1984_v32 = vpop.f32.mrb[2].mxu0  ;;  %v2046_v53 = vpop.f32.mrb[1].mxu1 }
 0x101   : > { %v1985_v57 = vpop.f32.mrb[3].mxu0  ;;  %v2047_v0 = vadd.f32 %v2046_v53, %v2045_v44  ;;  %v2048_v58 = vpop.f32.mrb[2].mxu1 }
 0x102   : > { %v1986_v27 = vadd.f32 %v1985_v57, %v1984_v32  ;;  %v2049_v59 = vpop.f32.mrb[3].mxu1 }
 0x103   : > { %v3020_v60 = vadd.f32 %v2047_v0, %v1983_v23  ;;  %v2050_v61 = vadd.f32 %v2049_v59, %v2048_v58 }
 0x105   : > { %v3022_v62 = vadd.f32 %v2050_v61, %v1986_v27 }
 0x106   : > { %v1987_v56 = vpop.f32.mrb[4].mxu0 }
 0x107   : > { %v1988_v2 = vpop.f32.mrb[5].mxu0 }
 0x108   : > { %v2051_v3 = vpop.f32.mrb[4].mxu1  ;;  %v1989_v4 = vadd.f32 %v1988_v2, %v1987_v56  ;;  %v1990_v5 = vpop.f32.mrb[6].mxu0 }
 0x109   : > { %v2052_v8 = vpop.f32.mrb[5].mxu1  ;;  %v1991_v9 = vpop.f32.mrb[7].mxu0 }
 0x10a   : > { %v2053_v10 = vadd.f32 %v2052_v8, %v2051_v3  ;;  %v2054_v11 = vpop.f32.mrb[6].mxu1  ;;  %v1992_v12 = vadd.f32 %v1991_v9, %v1990_v5 }
 0x10b   : > { %v2055_v13 = vpop.f32.mrb[7].mxu1 }
 0x10c   : > { %v3024_v14 = vadd.f32 %v2053_v10, %v1989_v4  ;;  %v2056_v15 = vadd.f32 %v2055_v13, %v2054_v11 }
 0x10e   : > { %v3026_v16 = vadd.f32 %v2056_v15, %v1992_v12  ;;  %v1993_v17 = vpop.f32.mrb[8].mxu0 }
 0x10f   : > { %v1994_v18 = vpop.f32.mrb[9].mxu0 }
 0x110   : > { %v2057_v21 = vpop.f32.mrb[8].mxu1  ;;  %v1995_v22 = vadd.f32 %v1994_v18, %v1993_v17  ;;  %v1996_v24 = vpop.f32.mrb[10].mxu0 }
 0x111   : > { %v2058_v26 = vpop.f32.mrb[9].mxu1  ;;  %v1997_v28 = vpop.f32.mrb[11].mxu0 }
 0x112   : > { %v2059_v29 = vadd.f32 %v2058_v26, %v2057_v21  ;;  %v2060_v30 = vpop.f32.mrb[10].mxu1  ;;  %v1998_v31 = vadd.f32 %v1997_v28, %v1996_v24 }
 0x113   : > { %v2061_v33 = vpop.f32.mrb[11].mxu1 }
 0x114   : > { %v3028_v34 = vadd.f32 %v2059_v29, %v1995_v22  ;;  %v2062_v35 = vadd.f32 %v2061_v33, %v2060_v30 }
 0x116   : > { %v3030_v36 = vadd.f32 %v2062_v35, %v1998_v31  ;;  %v1999_v37 = vpop.f32.mrb[12].mxu0 }
 0x117   : > { %v2000_v38 = vpop.f32.mrb[13].mxu0 }
 0x118   : > { %v2063_v39 = vpop.f32.mrb[12].mxu1  ;;  %v2001_v40 = vadd.f32 %v2000_v38, %v1999_v37  ;;  %v2002_v42 = vpop.f32.mrb[14].mxu0 }
 0x119   : > { %v2064_v43 = vpop.f32.mrb[13].mxu1  ;;  %v2003_v45 = vpop.f32.mrb[15].mxu0 }
 0x11a   : > { %v2065_v46 = vadd.f32 %v2064_v43, %v2063_v39  ;;  %v2066_v48 = vpop.f32.mrb[14].mxu1  ;;  %v2004_v49 = vadd.f32 %v2003_v45, %v2002_v42 }
 0x11b   : > { %v2067_v50 = vpop.f32.mrb[15].mxu1 }
 0x11c   : > { %v3032_v51 = vadd.f32 %v2065_v46, %v2001_v40  ;;  %v2068_v52 = vadd.f32 %v2067_v50, %v2066_v48 }
 0x11e   : > { %v3034_v54 = vadd.f32 %v2068_v52, %v2004_v49  ;;  %v2005_v55 = vpop.f32.mrb[16].mxu0 }
 0x11f   : > { %v2006_v20 = vpop.f32.mrb[17].mxu0 }
 0x120   : > { %v2069_v6 = vpop.f32.mrb[16].mxu1  ;;  %v2007_v1 = vadd.f32 %v2006_v20, %v2005_v55  ;;  %v2008_v19 = vpop.f32.mrb[18].mxu0 }
 0x121   : > { %v2070_v25 = vpop.f32.mrb[17].mxu1  ;;  %v2009_v41 = vpop.f32.mrb[19].mxu0 }
 0x122   : > { %v2071_v47 = vadd.f32 %v2070_v25, %v2069_v6  ;;  %v2072_v63 = vpop.f32.mrb[18].mxu1  ;;  %v2010_v7 = vadd.f32 %v2009_v41, %v2008_v19 }
 0x123   : > { %v2073_v44 = vpop.f32.mrb[19].mxu1 }
 0x124   : > { %v3036_v23 = vadd.f32 %v2071_v47, %v2007_v1  ;;  %v2074_v32 = vadd.f32 %v2073_v44, %v2072_v63 }
 0x126   : > { %v3038_v53 = vadd.f32 %v2074_v32, %v2010_v7  ;;  %v2011_v57 = vpop.f32.mrb[20].mxu0 }
 0x127   : > { %v2012_v0 = vpop.f32.mrb[21].mxu0 }
 0x128   : > { %v2075_v58 = vpop.f32.mrb[20].mxu1  ;;  %v2013_v27 = vadd.f32 %v2012_v0, %v2011_v57  ;;  %v2014_v59 = vpop.f32.mrb[22].mxu0 }
 0x129   : > { %v2076_v61 = vpop.f32.mrb[21].mxu1  ;;  %v2015_v56 = vpop.f32.mrb[23].mxu0 }
 0x12a   : > { %v2077_v2 = vadd.f32 %v2076_v61, %v2075_v58  ;;  %v2078_v3 = vpop.f32.mrb[22].mxu1  ;;  %v2016_v4 = vadd.f32 %v2015_v56, %v2014_v59 }
 0x12b   : > { %v2079_v5 = vpop.f32.mrb[23].mxu1 }
 0x12c   : > { %v3040_v8 = vadd.f32 %v2077_v2, %v2013_v27  ;;  %v2080_v9 = vadd.f32 %v2079_v5, %v2078_v3 }
 0x12e   : > { %v3042_v10 = vadd.f32 %v2080_v9, %v2016_v4  ;;  %v2017_v11 = vpop.f32.mrb[24].mxu0 }
 0x12f   : > { %v2018_v12 = vpop.f32.mrb[25].mxu0 }
 0x130   : > { %v2081_v13 = vpop.f32.mrb[24].mxu1  ;;  %v2019_v15 = vadd.f32 %v2018_v12, %v2017_v11  ;;  %v2020_v17 = vpop.f32.mrb[26].mxu0 }
 0x131   : > { %v2082_v18 = vpop.f32.mrb[25].mxu1  ;;  %v2021_v21 = vpop.f32.mrb[27].mxu0 }
 0x132   : > { %v2083_v22 = vadd.f32 %v2082_v18, %v2081_v13  ;;  %v2084_v24 = vpop.f32.mrb[26].mxu1  ;;  %v2022_v26 = vadd.f32 %v2021_v21, %v2020_v17 }
 0x133   : > { %v2085_v28 = vpop.f32.mrb[27].mxu1 }
 0x134   : > { %v3044_v29 = vadd.f32 %v2083_v22, %v2019_v15  ;;  %v2086_v30 = vadd.f32 %v2085_v28, %v2084_v24 }
 0x136   : > { %v3046_v31 = vadd.f32 %v2086_v30, %v2022_v26  ;;  %v2023_v33 = vpop.f32.mrb[28].mxu0 }
 0x137   : > { %v2024_v35 = vpop.f32.mrb[29].mxu0 }
 0x138   : > { %v2087_v37 = vpop.f32.mrb[28].mxu1  ;;  %v2025_v38 = vadd.f32 %v2024_v35, %v2023_v33  ;;  %v2026_v39 = vpop.f32.mrb[30].mxu0 }
 0x139   : > { %v2088_v40 = vpop.f32.mrb[29].mxu1  ;;  %v2027_v42 = vpop.f32.mrb[31].mxu0 }
 0x13a   : > { %v2089_v43 = vadd.f32 %v2088_v40, %v2087_v37  ;;  %v2090_v45 = vpop.f32.mrb[30].mxu1  ;;  %v2028_v46 = vadd.f32 %v2027_v42, %v2026_v39 }
 0x13b   : > { %v2091_v48 = vpop.f32.mrb[31].mxu1 }
 0x13c   : > { %v3048_v49 = vadd.f32 %v2089_v43, %v2025_v38  ;;  %v2092_v50 = vadd.f32 %v2091_v48, %v2090_v45 }
 0x13e   : > { %v3050_v52 = vadd.f32 %v2092_v50, %v2028_v46  ;;  %v2109_v55 = vpop.f32.mrb[32].mxu0 }
 0x13f   : > { %v2110_v20 = vpop.f32.mrb[33].mxu0 }
 0x140   : > { %v2111_v6 = vadd.f32 %v2110_v20, %v2109_v55  ;;  %v2112_v1 = vpop.f32.mrb[34].mxu0  ;;  %v2173_v19 = vpop.f32.mrb[32].mxu1 }
 0x141   : > { %v2113_v25 = vpop.f32.mrb[35].mxu0  ;;  %v2174_v41 = vpop.f32.mrb[33].mxu1 }
 0x142   : > { %v1366_v47 = vadd.f32 %v2111_v6, %v3020_v60  ;;  %v2114_v63 = vadd.f32 %v2113_v25, %v2112_v1  ;;  %v2175_v7 = vadd.f32 %v2174_v41, %v2173_v19  ;;  %v2176_v44 = vpop.f32.mrb[34].mxu1 }
 0x143   : > { %v2177_v32 = vpop.f32.mrb[35].mxu1 }
 0x144   : > { %v1369_v57 = vadd.f32 %v2114_v63, %v3022_v62  ;;  %v2178_v0 = vadd.f32 %v2177_v32, %v2176_v44  ;;  %v3054_v58 = vadd.f32 %v2175_v7, %v1366_v47 }
 0x146   : > { %v2115_v27 = vpop.f32.mrb[36].mxu0  ;;  %v3056_v59 = vadd.f32 %v2178_v0, %v1369_v57 }
 0x147   : > { %v2116_v61 = vpop.f32.mrb[37].mxu0 }
 0x148   : > { %v2117_v56 = vadd.f32 %v2116_v61, %v2115_v27  ;;  %v2118_v2 = vpop.f32.mrb[38].mxu0  ;;  %v2179_v3 = vpop.f32.mrb[36].mxu1 }
 0x149   : > { %v2119_v4 = vpop.f32.mrb[39].mxu0  ;;  %v2180_v5 = vpop.f32.mrb[37].mxu1 }
 0x14a   : > { %v1374_v60 = vadd.f32 %v2117_v56, %v3024_v14  ;;  %v2120_v9 = vadd.f32 %v2119_v4, %v2118_v2  ;;  %v2181_v11 = vadd.f32 %v2180_v5, %v2179_v3  ;;  %v2182_v12 = vpop.f32.mrb[38].mxu1 }
 0x14b   : > { %v2183_v13 = vpop.f32.mrb[39].mxu1 }
 0x14c   : > { %v1377_v62 = vadd.f32 %v2120_v9, %v3026_v16  ;;  %v2184_v15 = vadd.f32 %v2183_v13, %v2182_v12  ;;  %v3060_v17 = vadd.f32 %v2181_v11, %v1374_v60 }
 0x14e   : > { %v2121_v18 = vpop.f32.mrb[40].mxu0  ;;  %v3062_v21 = vadd.f32 %v2184_v15, %v1377_v62 }
 0x14f   : > { %v2122_v22 = vpop.f32.mrb[41].mxu0 }
 0x150   : > { %v2123_v24 = vadd.f32 %v2122_v22, %v2121_v18  ;;  %v2124_v26 = vpop.f32.mrb[42].mxu0  ;;  %v2185_v28 = vpop.f32.mrb[40].mxu1 }
 0x151   : > { %v2125_v30 = vpop.f32.mrb[43].mxu0  ;;  %v2186_v33 = vpop.f32.mrb[41].mxu1 }
 0x152   : > { %v1382_v14 = vadd.f32 %v2123_v24, %v3028_v34  ;;  %v2126_v35 = vadd.f32 %v2125_v30, %v2124_v26  ;;  %v2187_v37 = vadd.f32 %v2186_v33, %v2185_v28  ;;  %v2188_v38 = vpop.f32.mrb[42].mxu1 }
 0x153   : > { %v2189_v39 = vpop.f32.mrb[43].mxu1 }
 0x154   : > { %v1385_v16 = vadd.f32 %v2126_v35, %v3030_v36  ;;  %v2190_v40 = vadd.f32 %v2189_v39, %v2188_v38  ;;  %v3066_v42 = vadd.f32 %v2187_v37, %v1382_v14 }
 0x156   : > { %v2127_v43 = vpop.f32.mrb[44].mxu0  ;;  %v3068_v45 = vadd.f32 %v2190_v40, %v1385_v16 }
 0x157   : > { %v2128_v46 = vpop.f32.mrb[45].mxu0 }
 0x158   : > { %v2129_v48 = vadd.f32 %v2128_v46, %v2127_v43  ;;  %v2130_v50 = vpop.f32.mrb[46].mxu0  ;;  %v2191_v55 = vpop.f32.mrb[44].mxu1 }
 0x159   : > { %v2131_v20 = vpop.f32.mrb[47].mxu0  ;;  %v2192_v6 = vpop.f32.mrb[45].mxu1 }
 0x15a   : > { %v1390_v34 = vadd.f32 %v2129_v48, %v3032_v51  ;;  %v2132_v1 = vadd.f32 %v2131_v20, %v2130_v50  ;;  %v2193_v19 = vadd.f32 %v2192_v6, %v2191_v55  ;;  %v2194_v25 = vpop.f32.mrb[46].mxu1 }
 0x15b   : > { %v2195_v41 = vpop.f32.mrb[47].mxu1 }
 0x15c   : > { %v1393_v36 = vadd.f32 %v2132_v1, %v3034_v54  ;;  %v2196_v47 = vadd.f32 %v2195_v41, %v2194_v25  ;;  %v3072_v63 = vadd.f32 %v2193_v19, %v1390_v34 }
 0x15e   : > { %v2133_v7 = vpop.f32.mrb[48].mxu0  ;;  %v3074_v44 = vadd.f32 %v2196_v47, %v1393_v36 }
 0x15f   : > { %v2134_v32 = vpop.f32.mrb[49].mxu0 }
 0x160   : > { %v2135_v57 = vadd.f32 %v2134_v32, %v2133_v7  ;;  %v2136_v0 = vpop.f32.mrb[50].mxu0  ;;  %v2197_v27 = vpop.f32.mrb[48].mxu1 }
 0x161   : > { %v2137_v61 = vpop.f32.mrb[51].mxu0  ;;  %v2198_v56 = vpop.f32.mrb[49].mxu1 }
 0x162   : > { %v1398_v51 = vadd.f32 %v2135_v57, %v3036_v23  ;;  %v2138_v2 = vadd.f32 %v2137_v61, %v2136_v0  ;;  %v2199_v3 = vadd.f32 %v2198_v56, %v2197_v27  ;;  %v2200_v4 = vpop.f32.mrb[50].mxu1 }
 0x163   : > { %v2201_v5 = vpop.f32.mrb[51].mxu1 }
 0x164   : > { %v1401_v54 = vadd.f32 %v2138_v2, %v3038_v53  ;;  %v2202_v60 = vadd.f32 %v2201_v5, %v2200_v4  ;;  %v3078_v9 = vadd.f32 %v2199_v3, %v1398_v51 }
 0x166   : > { %v2139_v11 = vpop.f32.mrb[52].mxu0  ;;  %v3080_v12 = vadd.f32 %v2202_v60, %v1401_v54 }
 0x167   : > { %v2140_v13 = vpop.f32.mrb[53].mxu0 }
 0x168   : > { %v2141_v62 = vadd.f32 %v2140_v13, %v2139_v11  ;;  %v2142_v15 = vpop.f32.mrb[54].mxu0  ;;  %v2203_v18 = vpop.f32.mrb[52].mxu1 }
 0x169   : > { %v2143_v22 = vpop.f32.mrb[55].mxu0  ;;  %v2204_v24 = vpop.f32.mrb[53].mxu1 }
 0x16a   : > { %v1406_v23 = vadd.f32 %v2141_v62, %v3040_v8  ;;  %v2144_v26 = vadd.f32 %v2143_v22, %v2142_v15  ;;  %v2205_v28 = vadd.f32 %v2204_v24, %v2203_v18  ;;  %v2206_v30 = vpop.f32.mrb[54].mxu1 }
 0x16b   : > { %v2207_v33 = vpop.f32.mrb[55].mxu1 }
 0x16c   : > { %v1409_v53 = vadd.f32 %v2144_v26, %v3042_v10  ;;  %v2208_v14 = vadd.f32 %v2207_v33, %v2206_v30  ;;  %v1503_v35 = vadd.f32 %v2205_v28, %v1406_v23 }
 0x16e   : > { %v2145_v37 = vpop.f32.mrb[56].mxu0  ;;  %v1506_v38 = vadd.f32 %v2208_v14, %v1409_v53 }
 0x16f   : > { %v2146_v39 = vpop.f32.mrb[57].mxu0 }
 0x170   : > { %v2147_v16 = vadd.f32 %v2146_v39, %v2145_v37  ;;  %v2148_v40 = vpop.f32.mrb[58].mxu0  ;;  %v2209_v43 = vpop.f32.mrb[56].mxu1 }
 0x171   : > { %v2149_v46 = vpop.f32.mrb[59].mxu0  ;;  %v2210_v48 = vpop.f32.mrb[57].mxu1 }
 0x172   : > { %v1414_v8 = vadd.f32 %v2147_v16, %v3044_v29  ;;  %v2150_v50 = vadd.f32 %v2149_v46, %v2148_v40  ;;  %v2211_v55 = vadd.f32 %v2210_v48, %v2209_v43  ;;  %v2212_v20 = vpop.f32.mrb[58].mxu1 }
 0x173   : > { %v2213_v6 = vpop.f32.mrb[59].mxu1 }
 0x174   : > { %v1417_v10 = vadd.f32 %v2150_v50, %v3046_v31  ;;  %v2214_v34 = vadd.f32 %v2213_v6, %v2212_v20  ;;  %v3087_v1 = vadd.f32 %v2211_v55, %v1414_v8 }
 0x176   : > { %v2151_v19 = vpop.f32.mrb[60].mxu0  ;;  %v3090_v25 = vadd.f32 %v2214_v34, %v1417_v10 }
 0x177   : > { %v2152_v41 = vpop.f32.mrb[61].mxu0 }
 0x178   : > { %v2153_v36 = vadd.f32 %v2152_v41, %v2151_v19  ;;  %v2154_v47 = vpop.f32.mrb[62].mxu0  ;;  %v2215_v7 = vpop.f32.mrb[60].mxu1 }
 0x179   : > { %v2155_v29 = vpop.f32.mrb[63].mxu0  ;;  %v2216_v32 = vpop.f32.mrb[61].mxu1 }
 0x17a   : > { %v1422_v57 = vadd.f32 %v2153_v36, %v3048_v49  ;;  %v2156_v0 = vadd.f32 %v2155_v29, %v2154_v47  ;;  %v2217_v27 = vadd.f32 %v2216_v32, %v2215_v7  ;;  %v2218_v31 = vpop.f32.mrb[62].mxu1 }
 0x17b   : > { %v2219_v61 = vpop.f32.mrb[63].mxu1 }
 0x17c   : > { %v1425_v56 = vadd.f32 %v2156_v0, %v3050_v52  ;;  %v2220_v51 = vadd.f32 %v2219_v61, %v2218_v31  ;;  %v1519_v2 = vadd.f32 %v2217_v27, %v1422_v57 }
 0x17e   : > { %v2255_v3 = vpop.f32.mrb[64].mxu0  ;;  %v1522_v4 = vadd.f32 %v2220_v51, %v1425_v56 }
 0x17f   : > { %v1568_v49 = vadd.f32 %v2255_v3, %v3060_v17  ;;  %v1559_v5 = vpop.f32.mrb[65].mxu0 }
 0x180   : > { %v2263_v54 = vpop.f32.mrb[64].mxu1  ;;  %v1560_v60 = vadd.f32 %v1559_v5, %v3054_v58  ;;  %v2256_v52 = vpop.f32.mrb[66].mxu0 }
 0x181   : > { %1624 = vst [vmem:[%s3097_s18 + $0x10] sm:$0xff] %v1568_v49  ;;  %v3102_v11 = vadd.f32 %v2263_v54, %v1503_v35  ;;  %v1591_v13 = vpop.f32.mrb[65].mxu1  ;;  %v1571_v62 = vadd.f32 %v2256_v52, %v3062_v21  ;;  %v1562_v15 = vpop.f32.mrb[67].mxu0  ;;  %v1662_v30 = vmul.f32 %v1568_v49, %v1568_v49 }
 0x182   : > { %1622 = vst [vmem:[%s3097_s18] sm:$0xff] %v1560_v60  ;;  %v1592_v18 = vadd.f32 %v1591_v13, %v3078_v9  ;;  %v2264_v22 = vpop.f32.mrb[66].mxu1  ;;  %v1563_v17 = vadd.f32 %v1562_v15, %v3056_v59  ;;  %v1660_v23 = vmul.f32 %v1560_v60, %v1560_v60 }
 0x183   : > { %1632 = vst [vmem:[%s3097_s18 + $0x50] sm:$0xff] %v3102_v11  ;;  %1625 = vst [vmem:[%s3097_s18 + $0x18] sm:$0xff] %v1571_v62  ;;  %v1603_v58 = vadd.f32 %v2264_v22, %v1506_v38  ;;  %v1594_v24 = vpop.f32.mrb[67].mxu1  ;;  %v1663_v35 = vmul.f32 %v1571_v62, %v1571_v62 }
 0x184   : > { %1630 = vst [vmem:[%s3097_s18 + $0x40] sm:$0xff] %v1592_v18  ;;  %1623 = vst [vmem:[%s3097_s18 + $0x8] sm:$0xff] %v1563_v17  ;;  %v1638_v26 = vadd.f32 %v1563_v17, %v1560_v60  ;;  %v1661_v28 = vmul.f32 %v1563_v17, %v1563_v17  ;;  %v1595_v21 = vadd.f32 %v1594_v24, %v3080_v12 }
 0x185   : > { %1633 = vst [vmem:[%s3097_s18 + $0x58] sm:$0xff] %v1603_v58  ;;  %v1668_v57 = vmul.f32 %v1592_v18, %v1592_v18 }
 0x186   : > { %v1639_v9 = vadd.f32 %v1638_v26, %v1568_v49  ;;  %v1676_v33 = vadd.f32 %v1661_v28, %v1660_v23  ;;  %1631 = vst [vmem:[%s3097_s18 + $0x48] sm:$0xff] %v1595_v21  ;;  %v2259_v59 = vpop.f32.mrb[68].mxu0 }
 0x187   : > { %v1584_v53 = vadd.f32 %v2259_v59, %v3072_v63  ;;  %v1575_v14 = vpop.f32.mrb[69].mxu0 }
 0x188   : > { %v1677_v37 = vadd.f32 %v1676_v33, %v1662_v30  ;;  %v2267_v38 = vpop.f32.mrb[68].mxu1  ;;  %v1576_v39 = vadd.f32 %v1575_v14, %v3066_v42  ;;  %v1640_v16 = vadd.f32 %v1639_v9, %v1571_v62  ;;  %v2260_v40 = vpop.f32.mrb[70].mxu0 }
 0x189   : > { %1628 = vst [vmem:[%s3097_s18 + $0x30] sm:$0xff] %v1584_v53  ;;  %v1616_v12 = vadd.f32 %v2267_v38, %v1519_v2  ;;  %v1607_v43 = vpop.f32.mrb[69].mxu1  ;;  %v1587_v46 = vadd.f32 %v2260_v40, %v3074_v44  ;;  %v1578_v48 = vpop.f32.mrb[71].mxu0  ;;  %v1666_v36 = vmul.f32 %v1584_v53, %v1584_v53  ;;  %v1671_v2 = vmul.f32 %v1603_v58, %v1603_v58 }
 0x18a   : > { %1626 = vst [vmem:[%s3097_s18 + $0x20] sm:$0xff] %v1576_v39  ;;  %v1641_v63 = vadd.f32 %v1640_v16, %v1576_v39  ;;  %v1664_v8 = vmul.f32 %v1576_v39, %v1576_v39  ;;  %v1678_v50 = vadd.f32 %v1677_v37, %v1663_v35  ;;  %v1608_v55 = vadd.f32 %v1607_v43, %v3087_v1  ;;  %v2268_v20 = vpop.f32.mrb[70].mxu1 }
 0x18b   : > { %1636 = vst [vmem:[%s3097_s18 + $0x70] sm:$0xff] %v1616_v12  ;;  %1629 = vst [vmem:[%s3097_s18 + $0x38] sm:$0xff] %v1587_v46  ;;  %v1619_v42 = vadd.f32 %v2268_v20, %v1522_v4  ;;  %v1579_v6 = vadd.f32 %v1578_v48, %v3068_v45  ;;  %v1610_v10 = vpop.f32.mrb[71].mxu1  ;;  %v1667_v1 = vmul.f32 %v1587_v46, %v1587_v46 }
 0x18c   : > { %v1679_v34 = vadd.f32 %v1678_v50, %v1664_v8  ;;  %1634 = vst [vmem:[%s3097_s18 + $0x60] sm:$0xff] %v1608_v55  ;;  %v1611_v44 = vadd.f32 %v1610_v10, %v3090_v25  ;;  %v1669_v45 = vmul.f32 %v1595_v21, %v1595_v21  ;;  %v1670_v25 = vmul.f32 %v3102_v11, %v3102_v11 }
 0x18d   : > { %1637 = vst [vmem:[%s3097_s18 + $0x78] sm:$0xff] %v1619_v42  ;;  %1627 = vst [vmem:[%s3097_s18 + $0x28] sm:$0xff] %v1579_v6  ;;  %v1642_v19 = vadd.f32 %v1641_v63, %v1579_v6  ;;  %v1665_v41 = vmul.f32 %v1579_v6, %v1579_v6  ;;  %v1672_v49 = vmul.f32 %v1608_v55, %v1608_v55 }
 0x18e   : > { %1635 = vst [vmem:[%s3097_s18 + $0x68] sm:$0xff] %v1611_v44  ;;  %v1673_v52 = vmul.f32 %v1611_v44, %v1611_v44  ;;  %v1674_v62 = vmul.f32 %v1616_v12, %v1616_v12  ;;  %v1675_v22 = vmul.f32 %v1619_v42, %v1619_v42 }
 0x18f   : > { %v1643_v47 = vadd.f32 %v1642_v19, %v1584_v53  ;;  %v1680_v7 = vadd.f32 %v1679_v34, %v1665_v41 }
 0x191   : > { %v1644_v29 = vadd.f32 %v1643_v47, %v1587_v46  ;;  %v1681_v32 = vadd.f32 %v1680_v7, %v1666_v36 }
 0x193   : > { %v1645_v0 = vadd.f32 %v1644_v29, %v1592_v18  ;;  %v1682_v27 = vadd.f32 %v1681_v32, %v1667_v1 }
 0x195   : > { %v1683_v31 = vadd.f32 %v1682_v27, %v1668_v57  ;;  %v1646_v61 = vadd.f32 %v1645_v0, %v1595_v21 }
 0x197   : > { %v1647_v56 = vadd.f32 %v1646_v61, %v3102_v11  ;;  %v1684_v51 = vadd.f32 %v1683_v31, %v1669_v45 }
 0x199   : > { %v1648_v3 = vadd.f32 %v1647_v56, %v1603_v58  ;;  %v1685_v4 = vadd.f32 %v1684_v51, %v1670_v25 }
 0x19b   : > { %v1649_v5 = vadd.f32 %v1648_v3, %v1608_v55  ;;  %v1686_v54 = vadd.f32 %v1685_v4, %v1671_v2 }
 0x19d   : > { %v1650_v60 = vadd.f32 %v1649_v5, %v1611_v44  ;;  %v1687_v13 = vadd.f32 %v1686_v54, %v1672_v49 }
 0x19f   : > { %v1651_v15 = vadd.f32 %v1650_v60, %v1616_v12  ;;  %v1688_v18 = vadd.f32 %v1687_v13, %v1673_v52 }
 0x1a1   : > { %v1652_v17 = vadd.f32 %v1651_v15, %v1619_v42  ;;  %v1689_v24 = vadd.f32 %v1688_v18, %v1674_v62 }
 0x1a3   : > { %v1653_v23 = vrot.slane %v1652_v17, 4  ;;  %v1690_v11 = vadd.f32 %v1689_v24, %v1675_v22 }
 0x1a5   : > { %v1654_v26 = vadd.f32 %v1653_v23, %v1652_v17  ;;  %v1691_v28 = vrot.slane %v1690_v11, 4 }
 0x1a7   : > { %v1655_v58 = vrot.slane %v1654_v26, 2  ;;  %v1692_v21 = vadd.f32 %v1691_v28, %v1690_v11 }
 0x1a9   : > { %v1656_v30 = vadd.f32 %v1655_v58, %v1654_v26  ;;  %v1693_v9 = vrot.slane %v1692_v21, 2 }
 0x1ab   : > { %v1657_v33 = vrot.slane %v1656_v30, 1  ;;  %v1694_v59 = vadd.f32 %v1693_v9, %v1692_v21 }
 0x1ad   : > { %v1658_v53 = vadd.f32 %v1657_v33, %v1656_v30  ;;  %v1695_v14 = vrot.slane %v1694_v59, 1 }
 0x1af   : > { %1659 = vst [vmem:[%s320_s29] sm:$0x1] %v1658_v53  ;;  %v1696_v35 = vadd.f32 %v1695_v14, %v1694_v59 }
 0x1b1   : > { %1697 = vst [vmem:[%s327_s27] sm:$0x1] %v1696_v35 }
 0x1b2 PF: > { %s17_s2 = sadd.s32 1, %s2437_s2   ;;  %s3163_s21 = smov %s2429_s23 }
 0x1b3   : > { %p14_p8 = scmp.ge.s32.totalorder %s17_s2, 6   ;;  %s3164_s22 = smov %s2433_s24 }
 0x1b4   : > { %s3165_s23 = smov %s3168_s3  ;;  %s3166_s24 = smov %s3172_s25 }
 0x1b5   :  { %16 = sbr.rel (!%p14_p8) target bundleno = 3 (0x3), region = 90 }

// kernel: double_conv.4
= control target key start
LH: loop header
LB: loop body
LE: loop exit
PB: predicated region body
PF: predicated region fallthrough
CT: control target
= control target key end

     0   :  { %s2794_s21 = smov 0   ;;  %s2796_s22 = smov 0   ;;  %s3940_s0 = inlined_call_operand.vmem [shape: f32[2,2,10,18,128], index: 0, kind: input, shape index: {}]   ;;  %s3941_s1 = inlined_call_operand.vmem [shape: bf16[1152,128], index: 1, kind: input, shape index: {}]   ;;  %s3942_s2 = inlined_call_operand.vmem [shape: f32[1,128], index: 2, kind: input, shape index: {}]   ;;  %s3943_s3 = inlined_call_operand.vmem [shape: f32[1,128], index: 3, kind: input, shape index: {}]   ;;  %s3944_s4 = inlined_call_operand.vmem [shape: f32[2,16,16,128], index: 4, kind: output, shape index: {0}]   ;;  %s3945_s5 = inlined_call_operand.vmem [shape: f32[2,2,1,128], index: 5, kind: output, shape index: {1}]   ;;  %s3946_s6 = inlined_call_operand.vmem [shape: f32[2,2,1,128], index: 6, kind: output, shape index: {2}]  }
   0x1   :  { %s2798_s23 = smov 0   ;;  %s2800_s24 = smov 0  }
   0x2   :  { %s2802_s25 = smov 0  }
   0x3 LB: > { %s26_s26 = sadd.s32 1, %s2749_s23  ;;  %s29_s27 = sadd.s32 1, %s2753_s24  ;;  %s2757_s25 = sphi %s2802_s25, %s17_s25   ;;  %s2753_s24 = sphi %s2800_s24, %s4028_s24   ;;  %s2749_s23 = sphi %s2798_s23, %s4027_s23   ;;  %s2745_s22 = sphi %s2796_s22, %s4026_s22   ;;  %s2741_s21 = sphi %s2794_s21, %s4025_s21  }
   0x4   : > { %p27_p0 = scmp.ge.s32.totalorder %s26_s26, 2  ;;  %p2128_p1 = scmp.ge.s32.totalorder %s2757_s25, 1 }
   0x5   : > { %p241_p2 = scmp.lt.s32.totalorder %s2757_s25, 5 }
   0x6   : > { %s4030_s26 = smov (%p27_p0, %s26_s26), 0  ;;  %s4032_s27 = smov (!%p27_p0, %s29_s27), %s2753_s24 }
   0x7   : > { %p242_p3 = pnand %p2128_p1, %p241_p2  ;;  %p31_p4 = scmp.ge.s32.totalorder %s4032_s27, 2 }
   0x8   : > { %v2647_v0 = vld [vmem:[%s3941_s1 + $0x40] sm:$0xff] (!%p242_p3)   ;;  %v2651_v4 = vld [vmem:[%s3941_s1 + $0x48] sm:$0xff] (!%p242_p3)   ;;  %v2655_v8 = vld [vmem:[%s3941_s1 + $0x50] sm:$0xff] (!%p242_p3)   ;;  %p294_p5 = scmp.lt.s32.totalorder (!%p242_p3), %s2745_s22, 1  ;;  %p296_p6 = scmp.lt.s32.totalorder (!%p242_p3), %s2741_s21, 1  ;;  %v359_v18 = vlaneseq (!%p242_p3)  ;;  %vm628_vm4 = vcmask (!%p242_p3), 1046528  }
   0x9   : > { %s4034_s27 = smov (%p31_p4, %s4032_s27), 0  ;;  %245 = sbr.rel (%p242_p3) target bundleno = 434 (0x1b2), region = 36 }
   0xa   : > { %v2648_v1 = vld [vmem:[%s3941_s1 + $0xc0] sm:$0xff] (!%p242_p3)   ;;  %2285 = vmatprep.subr.bf16.mxu0 (!%p242_p3), %v2647_v0  ;;  %v2652_v5 = vld [vmem:[%s3941_s1 + $0xc8] sm:$0xff] (!%p242_p3)   ;;  %v2656_v9 = vld [vmem:[%s3941_s1 + $0xd0] sm:$0xff] (!%p242_p3)   ;;  %s2902_s16 = sshll.u32 (!%p242_p3), %s2741_s21, 3  ;;  %v2907_v23 = vshrl.u32 (!%p242_p3), %v359_v18, 7  ;;  %vm685_vm9 = vcmask (!%p242_p3), 1045504  }
   0xb   : > { %v2649_v2 = vld [vmem:[%s3941_s1] sm:$0xff] (!%p242_p3)   ;;  %2349 = vmatprep.subr.bf16.mxu1 (!%p242_p3), %v2648_v1  ;;  %v2653_v6 = vld [vmem:[%s3941_s1 + $0x8] sm:$0xff] (!%p242_p3)   ;;  %v2657_v10 = vld [vmem:[%s3941_s1 + $0x10] sm:$0xff] (!%p242_p3)   ;;  %v2916_v26 = vstv (!%p242_p3), %s2902_s16  ;;  %p306_p7 = scmp.lt.s32.totalorder (!%p242_p3), %s2902_s16, 15 }
   0xc   : > { %v2650_v3 = vld [vmem:[%s3941_s1 + $0x80] sm:$0xff] (!%p242_p3)   ;;  %2286 = vmatpush3.bf16.msra.mxu0 (!%p242_p3), %v2649_v2  ;;  %v2654_v7 = vld [vmem:[%s3941_s1 + $0x88] sm:$0xff] (!%p242_p3)   ;;  %v2658_v11 = vld [vmem:[%s3941_s1 + $0x90] sm:$0xff] (!%p242_p3)   ;;  %v2925_v29 = vadd.s32 (!%p242_p3), 16, %v2907_v23  ;;  %vm374_vm0 = vcmp.ge.s32.totalorder (!%p242_p3), %v2916_v26, 1  ;;  %vm384_vm1 = vcmp.le.s32.totalorder (!%p242_p3), %v2916_v26, 16 }
   0xd   : > { %2350 = vmatpush3.bf16.msra.mxu1 (!%p242_p3), %v2650_v3  ;;  %2287 = vmatprep.subr.bf16.mxu0 (!%p242_p3), %v2651_v4  ;;  %v2659_v12 = vld [vmem:[%s3941_s1 + $0x58] sm:$0xff] (!%p242_p3)   ;;  %v2663_v16 = vld [vmem:[%s3941_s1 + $0x60] sm:$0xff] (!%p242_p3)   ;;  %v2667_v21 = vld [vmem:[%s3941_s1 + $0x68] sm:$0xff] (!%p242_p3)   ;;  %vm404_vm2 = vcmp.ge.s32.totalorder (!%p242_p3), %v2907_v23, 1  ;;  %v365_v34 = vadd.s32 (!%p242_p3), 1, %v2916_v26  ;;  %v366_v37 = vadd.s32 (!%p242_p3), 2, %v2916_v26 }
   0xe   : > { %2351 = vmatprep.subr.bf16.mxu1 (!%p242_p3), %v2652_v5  ;;  %v2660_v13 = vld [vmem:[%s3941_s1 + $0xd8] sm:$0xff] (!%p242_p3)   ;;  %v2664_v17 = vld [vmem:[%s3941_s1 + $0xe0] sm:$0xff] (!%p242_p3)   ;;  %v2668_v22 = vld [vmem:[%s3941_s1 + $0xe8] sm:$0xff] (!%p242_p3)   ;;  %vm3947_vm3 = vcmp.le.s32.totalorder (!%p242_p3), %v2925_v29, 16  ;;  %v2960_v41 = vadd.s32 (!%p242_p3), 3, %v2916_v26  ;;  %v3030_v0 = vadd.s32 (!%p242_p3), 4, %v2916_v26 }
   0xf   : > { %v2661_v14 = vld [vmem:[%s3941_s1 + $0x18] sm:$0xff] (!%p242_p3)   ;;  %v2665_v19 = vld [vmem:[%s3941_s1 + $0x20] sm:$0xff] (!%p242_p3)   ;;  %v2669_v24 = vld [vmem:[%s3941_s1 + $0x28] sm:$0xff] (!%p242_p3)   ;;  %vm375_vm6 = vcmp.ge.s32.totalorder (!%p242_p3), %v365_v34, 1  ;;  %vm385_vm7 = vcmp.le.s32.totalorder (!%p242_p3), %v365_v34, 16  ;;  %vm376_vm11 = vcmp.ge.s32.totalorder (!%p242_p3), %v366_v37, 1 }
  0x10   : > { %2288 = vmatpush3.bf16.msra.mxu0 %v2653_v6  ;;  %s4036_s22 = smov (!%p294_p5, %s2745_s22), 1  ;;  %v2662_v15 = vld [vmem:[%s3941_s1 + $0x98] sm:$0xff]   ;;  %v2666_v20 = vld [vmem:[%s3941_s1 + $0xa0] sm:$0xff]   ;;  %v2670_v25 = vld [vmem:[%s3941_s1 + $0xa8] sm:$0xff]   ;;  %vm386_vm12 = vcmp.le.s32.totalorder %v366_v37, 16  ;;  %vm387_vm15 = vcmp.le.s32.totalorder %v2960_v41, 16 }
  0x11   : > { %2352 = vmatpush3.bf16.msra.mxu1 %v2654_v7  ;;  %2289 = vmatprep.subr.bf16.mxu0 %v2655_v8  ;;  %s2876_s15 = scalar_select %p296_p6, %s2741_s21, 1  ;;  %v2671_v27 = vld [vmem:[%s3941_s1 + $0x70] sm:$0xff]   ;;  %v2675_v32 = vld [vmem:[%s3941_s1 + $0x78] sm:$0xff]   ;;  %vm2966_vm5 = vmand %vm374_vm0, %vm384_vm1  ;;  %v3033_v1 = vadd.s32 5, %v2916_v26 }
  0x12   : > { %2353 = vmatprep.subr.bf16.mxu1 %v2656_v9  ;;  %s2606_s29 = smul.u32 60, %s4036_s22  ;;  %v2672_v28 = vld [vmem:[%s3941_s1 + $0xf0] sm:$0xff]   ;;  %v2676_v33 = vld [vmem:[%s3941_s1 + $0xf8] sm:$0xff]   ;;  %v2973_v43 = vld [vmem:[%s3942_s2] ss:$0 sm:$0xff]  ;;  %s4038_s16 = smov (!%p306_p7, %s2902_s16), 15 }
  0x13   : > { %s2605_s8 = smul.u32 30, %s2876_s15  ;;  %v2673_v30 = vld [vmem:[%s3941_s1 + $0x30] sm:$0xff]   ;;  %v2677_v35 = vld [vmem:[%s3941_s1 + $0x38] sm:$0xff]   ;;  %v2978_v44 = vld [vmem:[%s3943_s3] ss:$0 sm:$0xff]  ;;  %s2131_s20 = sshll.u32 %s4038_s16, 1 }
  0x14   : > { %2290 = vmatpush3.bf16.msra.mxu0 %v2657_v10  ;;  %v2674_v31 = vld [vmem:[%s3941_s1 + $0xb0] sm:$0xff]   ;;  %v2678_v36 = vld [vmem:[%s3941_s1 + $0xb8] sm:$0xff]   ;;  %vm2984_vm8 = vmand %vm2966_vm5, %vm404_vm2  ;;  %s2132_s28 = sshll.u32 %s4036_s22, 5 }
  0x15   : > { %2354 = vmatpush3.bf16.msra.mxu1 %v2658_v11  ;;  %2291 = vmatprep.subr.bf16.mxu0 %v2659_v12  ;;  %s300_s19 = sadd.s32 %s2606_s29, %s2605_s8  ;;  %vm2997_vm10 = vmand %vm2966_vm5, %vm3947_vm3  ;;  %v2679_v60 = vld [vmem:[%s3941_s1 + $0x140] sm:$0xff]   ;;  %v3047_v11 = vadd.s32 6, %v2916_v26  ;;  %s2134_s8 = sshll.u32 %s4036_s22, 1 }
  0x16   : > { %2355 = vmatprep.subr.bf16.mxu1 %v2660_v13  ;;  %s2129_s29 = sshll.u32 %s300_s19, 3  ;;  %vm3009_vm13 = vmand %vm375_vm6, %vm385_vm7  ;;  %v2684_v42 = vld [vmem:[%s3941_s1 + $0x1c0] sm:$0xff]   ;;  %s319_s10 = sadd.s32 %s2134_s8, %s2876_s15 }
  0x17   : > { %s2945_s7 = scalar_lea.vmem %s3940_s0, %s2129_s29  ;;  %vm3023_vm0 = vmand %vm3009_vm13, %vm404_vm2  ;;  %s320_s12 = scalar_lea.vmem %s3945_s5, %s319_s10 }
  0x18   : > { %2292 = vmatpush3.bf16.msra.mxu0 %v2661_v14  ;;  %v329_v38 = vld [vmem:[%s2945_s7] sm:$0xff]  ;;  %v330_v39 = vld [vmem:[%s2945_s7 + $0x8] sm:$0xff]  ;;  %v331_v40 = vld [vmem:[%s2945_s7 + $0x10] sm:$0x3]  ;;  %s327_s17 = scalar_lea.vmem %s3946_s6, %s319_s10 }
  0x19   : > { %2356 = vmatpush3.bf16.msra.mxu1 %v2662_v15  ;;  %2293 = vmatprep.subr.bf16.mxu0 %v2663_v16  ;;  %v477_v46 = vmul.f32 %v2973_v43, %v329_v38  ;;  %v478_v47 = vmul.f32 %v2973_v43, %v330_v39  ;;  %v479_v48 = vmul.f32 %v2973_v43, %v331_v40  ;;  %v332_v49 = vld [vmem:[%s2945_s7 + $0x18] sm:$0xff]  ;;  %v333_v50 = vld [vmem:[%s2945_s7 + $0x20] sm:$0xff]  ;;  %v334_v52 = vld [vmem:[%s2945_s7 + $0x28] sm:$0x3] }
  0x1a   : > { %2357 = vmatprep.subr.bf16.mxu1 %v2664_v17  ;;  %v480_v53 = vmul.f32 %v2973_v43, %v332_v49  ;;  %v481_v54 = vmul.f32 %v2973_v43, %v333_v50  ;;  %v482_v59 = vmul.f32 %v2973_v43, %v334_v52  ;;  %v335_v6 = vld [vmem:[%s2945_s7 + $0x30] sm:$0xff]  ;;  %vm3041_vm1 = vmand %vm3009_vm13, %vm3947_vm3  ;;  %v336_v34 = vld [vmem:[%s2945_s7 + $0x38] sm:$0xff] }
  0x1b   : > { %v514_v55 = vadd.f32 %v2978_v44, %v477_v46  ;;  %v515_v56 = vadd.f32 %v2978_v44, %v478_v47  ;;  %v516_v57 = vadd.f32 %v2978_v44, %v479_v48  ;;  %v483_v10 = vmul.f32 %v2973_v43, %v335_v6  ;;  %vm2214_vm6 = vmpackc.low %vm3009_vm13, %vm3023_vm0  ;;  %v2681_v40 = vld [vmem:[%s3941_s1 + $0x148] sm:$0xff]   ;;  %v337_v46 = vld [vmem:[%s2945_s7 + $0x40] sm:$0x3] }
  0x1c   : > { %2294 = vmatpush3.bf16.msra.mxu0 %v2665_v19  ;;  %v517_v62 = vadd.f32 %v2978_v44, %v480_v53  ;;  %v518_v63 = vadd.f32 %v2978_v44, %v481_v54  ;;  %v519_v5 = vadd.f32 %v2978_v44, %v482_v59  ;;  %vm3061_vm7 = vmand %vm376_vm11, %vm386_vm12  ;;  %v338_v51 = vld [vmem:[%s2945_s7 + $0x48] sm:$0xff]  ;;  %v339_v59 = vld [vmem:[%s2945_s7 + $0x50] sm:$0xff]  ;;  %v3154_v6 = vadd.s32 7, %v2916_v26 }
  0x1d   : > { %2358 = vmatpush3.bf16.msra.mxu1 %v2666_v20  ;;  %2295 = vmatprep.subr.bf16.mxu0 %v2667_v21  ;;  %v544_v2 = vmax.f32 %v514_v55, 0.0  ;;  %v545_v3 = vmax.f32 %v515_v56, 0.0  ;;  %v546_v4 = vmax.f32 %v516_v57, 0.0  ;;  %vm3078_vm11 = vmand %vm3061_vm7, %vm404_vm2  ;;  %v484_v55 = vmul.f32 %v2973_v43, %v336_v34  ;;  %v2682_v56 = vld [vmem:[%s3941_s1 + $0x108] sm:$0xff]   ;;  %v2714_v39 = vld [vmem:[%s3941_s1 + $0x218] sm:$0xff]  }
  0x1e   : > { %2359 = vmatprep.subr.bf16.mxu1 %v2668_v22  ;;  %v547_v8 = vmax.f32 %v517_v62, 0.0  ;;  %v548_v9 = vmax.f32 %v518_v63, 0.0  ;;  %v549_v15 = vmax.f32 %v519_v5, 0.0  ;;  %vm2211_vm12 = vmpackc.low %vm2966_vm5, %vm2984_vm8  ;;  %v486_v5 = vmul.f32 %v2973_v43, %v338_v51  ;;  %v2689_v51 = vld [vmem:[%s3941_s1 + $0x118] sm:$0xff]  }
  0x1f   : > { %v574_v12 = vsel %vm2984_vm8, %v544_v2, 0.0  ;;  %v575_v13 = vsel %vm2966_vm5, %v545_v3, 0.0  ;;  %v576_v14 = vsel %vm2997_vm10, %v546_v4, 0.0  ;;  %vm3095_vm14 = vmpackc.low %vm3061_vm7, %vm3078_vm11  ;;  %v2212_v48 = vpack.c.bf16 %v545_v3, %v544_v2 }
  0x20   : > { %2296 = vmatpush3.bf16.msra.mxu0 %v2669_v24  ;;  %v629_v16 = vrot.slane %v574_v12, 1  ;;  %v630_v17 = vrot.slane %v575_v13, 1  ;;  %v632_v18 = vrot.slane %v576_v14, 1  ;;  %v686_v19 = vrot.slane %v574_v12, 2  ;;  %v2686_v12 = vld [vmem:[%s3941_s1 + $0x180] sm:$0xff]  }
  0x21   : > { %2360 = vmatpush3.bf16.msra.mxu1 %v2670_v25  ;;  %2297 = vmatprep.subr.bf16.mxu0 %v2671_v27  ;;  %v687_v21 = vrot.slane %v575_v13, 2  ;;  %v689_v22 = vrot.slane %v576_v14, 2  ;;  %v577_v24 = vsel %vm3023_vm0, %v547_v8, 0.0  ;;  %v578_v25 = vsel %vm3009_vm13, %v548_v9, 0.0  ;;  %v2680_v27 = vld [vmem:[%s3941_s1 + $0x100] sm:$0xff]  }
  0x22   : > { %2361 = vmatprep.subr.bf16.mxu1 %v2672_v28  ;;  %v691_v37 = vrot.slane %v577_v24, 2  ;;  %v692_v38 = vrot.slane %v578_v25, 2  ;;  %v3103_v47 = vpack.c.bf16 %v548_v9, %v547_v8  ;;  %v485_v2 = vmul.f32 %v2973_v43, %v337_v46  ;;  %v2717_v46 = vld [vmem:[%s3941_s1 + $0x230] sm:$0xff]  }
  0x23   : > { %v688_v49 = vsel %vm685_vm9, %v686_v19, %v687_v21  ;;  %v690_v50 = vsel %vm685_vm9, %v687_v21, %v689_v22  ;;  %v521_v4 = vadd.f32 %v2978_v44, %v484_v55  ;;  %vm389_vm5 = vcmp.le.s32.totalorder %v3033_v1, 16  ;;  %v341_v19 = vld [vmem:[%s2945_s7 + $0x60] sm:$0xff]  ;;  %v346_v55 = vld [vmem:[%s2945_s7 + $0x88] sm:$0x3] }
  0x24   : > { %2298 = vmatpush3.bf16.msra.mxu0 %v2673_v30  ;;  %v631_v30 = vsel %vm628_vm4, %v629_v16, %v630_v17  ;;  %v778_v52 = vpack.c.bf16 %v690_v50, %v688_v49  ;;  %2237 = vmatprep.mubr.msk.bf16.mxu1 %vm2214_vm6, %v3103_v47  ;;  %v693_v62 = vsel %vm685_vm9, %v691_v37, %v692_v38  ;;  %vm3982_vm13 = vcmp.le.s32.totalorder %v2925_v29, 16 }
  0x25   : > { %2362 = vmatpush3.bf16.msra.mxu1 %v2674_v31  ;;  %2299 = vmatprep.subr.bf16.mxu0 %v2675_v32  ;;  %v633_v31 = vsel %vm628_vm4, %v630_v17, %v632_v18  ;;  %v579_v32 = vsel %vm3041_vm1, %v549_v15, 0.0  ;;  %vm3117_vm1 = vmand %vm3061_vm7, %vm3947_vm3  ;;  %vm3969_vm3 = vcmp.ge.s32.totalorder %v2960_v41, 1  ;;  %v2683_v41 = vld [vmem:[%s3941_s1 + $0x150] sm:$0xff]   ;;  %v551_v13 = vmax.f32 %v521_v4, 0.0  ;;  %v340_v18 = vld [vmem:[%s2945_s7 + $0x58] sm:$0x3] }
  0x26   : > { %2363 = vmatprep.subr.bf16.mxu1 %v2676_v33  ;;  %v634_v33 = vrot.slane %v577_v24, 1  ;;  %v637_v54 = vrot.slane %v579_v32, 1  ;;  %v694_v63 = vrot.slane %v579_v32, 2  ;;  %vm3140_vm10 = vmand %vm3969_vm3, %vm387_vm15  ;;  %vm379_vm3 = vcmp.ge.s32.totalorder %v3033_v1, 1  ;;  %v2685_v24 = vld [vmem:[%s3941_s1 + $0x110] sm:$0xff]  }
  0x27   : > { %vm3171_vm8 = vmand %vm3140_vm10, %vm404_vm2  ;;  %v487_v16 = vmul.f32 %v2973_v43, %v339_v59  ;;  %v523_v17 = vadd.f32 %v2978_v44, %v486_v5  ;;  %v581_v28 = vsel %vm3061_vm7, %v551_v13, 0.0  ;;  %vm3974_vm15 = vcmp.le.s32.totalorder %v3030_v0, 16 }
  0x28   : > { %2300 = vmatpush3.bf16.msra.mxu0 %v2677_v35  ;;  %v777_v35 = vpack.c.bf16 %v633_v31, %v631_v30  ;;  %v695_v9 = vsel %vm685_vm9, %v692_v38, %v694_v63  ;;  %v489_v30 = vmul.f32 %v2973_v43, %v341_v19  ;;  %v640_v37 = vrot.slane %v581_v28, 1  ;;  %vm3216_vm7 = vmpackc.low %vm3140_vm10, %vm3171_vm8 }
  0x29   : > { %2364 = vmatpush3.bf16.msra.mxu1 %v2678_v36  ;;  %2413 = vmatprep.subr.bf16.mxu0 %v2679_v60  ;;  %v635_v36 = vrot.slane %v578_v25, 1  ;;  %v520_v60 = vadd.f32 %v2978_v44, %v483_v10  ;;  %v522_v10 = vadd.f32 %v2978_v44, %v485_v2  ;;  %v3165_v14 = vpack.c.bf16 %v695_v9, %v693_v62  ;;  %vm3250_vm0 = vmand %vm3140_vm10, %vm3982_vm13 }
  0x2a   : > { %1414 = vmatprep.mubr.bf16.mxu0 %v777_v35  ;;  %2477 = vmatprep.subr.bf16.mxu1 %v2684_v42  ;;  %v488_v25 = vmul.f32 %v2973_v43, %v340_v18  ;;  %v2687_v35 = vld [vmem:[%s3941_s1 + $0x158] sm:$0xff]   ;;  %v524_v38 = vadd.f32 %v2978_v44, %v487_v16  ;;  %v553_v20 = vmax.f32 %v523_v17, 0.0  ;;  %v2690_v42 = vld [vmem:[%s3941_s1 + $0x188] sm:$0xff]   ;;  %v345_v17 = vld [vmem:[%s2945_s7 + $0x80] sm:$0xff] }
  0x2b   : > { %v636_v53 = vsel %vm628_vm4, %v634_v33, %v635_v36  ;;  %2213 = vmatmul.mubr.msk.bf16.vlgmr.msra.gmra.mrb[0].mxu0 %vm2211_vm12, %v2212_v48  ;;  %v638_v45 = vsel %vm628_vm4, %v635_v36, %v637_v54  ;;  %v550_v8 = vmax.f32 %v520_v60, 0.0  ;;  %v552_v22 = vmax.f32 %v522_v10, 0.0  ;;  %v344_v10 = vld [vmem:[%s2945_s7 + $0x78] sm:$0xff]  ;;  %v2691_v18 = vld [vmem:[%s3941_s1 + $0x160] sm:$0xff]  }
  0x2c   : > { %1512 = vmatmul.mubr.bf16.vlgmr.msra.gmra.mrb[0].mxu1 %v778_v52  ;;  %2414 = vmatpush3.bf16.msra.mxu0 %v2680_v27  ;;  %v3156_v7 = vpack.c.bf16 %v638_v45, %v636_v53  ;;  %v342_v27 = vld [vmem:[%s2945_s7 + $0x68] sm:$0xff]  ;;  %v697_v48 = vrot.slane %v581_v28, 2  ;;  %v525_v50 = vadd.f32 %v2978_v44, %v488_v25  ;;  %v554_v53 = vmax.f32 %v524_v38, 0.0  ;;  %v343_v45 = vld [vmem:[%s2945_s7 + $0x70] sm:$0x3] }
  0x2d   : > { %2415 = vmatprep.subr.bf16.mxu0 %v2681_v40  ;;  %v580_v21 = vsel %vm3078_vm11, %v550_v8, 0.0  ;;  %2478 = vmatpush3.bf16.msra.mxu1 %v2686_v12  ;;  %v3188_v33 = vpack.c.bf16 %v551_v13, %v550_v8  ;;  %vm3975_vm11 = vcmp.ge.s32.totalorder %v3030_v0, 1  ;;  %v582_v36 = vsel %vm3117_vm1, %v552_v22, 0.0  ;;  %v2688_v0 = vld [vmem:[%s3941_s1 + $0x1c8] sm:$0xff]  }
  0x2e   : > { %1422 = vmatprep.mubr.bf16.mxu0 %v3156_v7  ;;  %v639_v31 = vrot.slane %v580_v21, 1  ;;  %v696_v32 = vrot.slane %v580_v21, 2  ;;  %vm3196_vm12 = vmand %vm3975_vm11, %vm3974_vm15  ;;  %v642_v40 = vrot.slane %v582_v36, 1  ;;  %v699_v49 = vrot.slane %v582_v36, 2  ;;  %2479 = vmatprep.subr.bf16.mxu1 %v2688_v0 }
  0x2f   : > { %2240 = vmatprep.mubr.msk.bf16.mxu1 %vm3095_vm14, %v3188_v33  ;;  %vm380_vm1 = vcmp.ge.s32.totalorder %v3047_v11, 1  ;;  %v583_v54 = vsel %vm3171_vm8, %v553_v20, 0.0  ;;  %vm3238_vm15 = vmand %vm3196_vm12, %vm404_vm2  ;;  %v490_v58 = vmul.f32 %v2973_v43, %v342_v27  ;;  %v3256_v62 = vpack.c.bf16 %v554_v53, %v553_v20 }
  0x30   : > { %2416 = vmatpush3.bf16.msra.mxu0 %v2682_v56  ;;  %v641_v52 = vsel %vm628_vm4, %v639_v31, %v640_v37  ;;  %v643_v61 = vsel %vm628_vm4, %v640_v37, %v642_v40  ;;  %v701_v56 = vrot.slane %v583_v54, 2  ;;  %v698_v57 = vsel %vm685_vm9, %v696_v32, %v697_v48  ;;  %vm3301_vm11 = vmand %vm379_vm3, %vm389_vm5  ;;  %v2692_v32 = vld [vmem:[%s3941_s1 + $0x1d0] sm:$0xff]   ;;  %v2693_v37 = vld [vmem:[%s3941_s1 + $0x120] sm:$0xff]  }
  0x31   : > { %2417 = vmatprep.subr.bf16.mxu0 %v2683_v41  ;;  %v3254_v60 = vpack.c.bf16 %v643_v61, %v641_v52  ;;  %v700_v63 = vsel %vm685_vm9, %v697_v48, %v699_v49  ;;  %v555_v2 = vmax.f32 %v525_v50, 0.0  ;;  %v584_v5 = vsel %vm3140_vm10, %v554_v53, 0.0  ;;  %vm3987_vm10 = vmmov %vm3982_vm13  ;;  %2480 = vmatpush3.bf16.msra.mxu1 %v2690_v42  ;;  %v2694_v48 = vld [vmem:[%s3941_s1 + $0x190] sm:$0xff]  }
  0x32   : > { %v3263_v4 = vpack.c.bf16 %v700_v63, %v698_v57  ;;  %v526_v41 = vadd.f32 %v2978_v44, %v489_v30  ;;  %v527_v8 = vadd.f32 %v2978_v44, %v490_v58  ;;  %v645_v12 = vrot.slane %v584_v5, 1  ;;  %vm3288_vm8 = vmand %vm3196_vm12, %vm3987_vm10  ;;  %2481 = vmatprep.subr.bf16.mxu1 %v2692_v32  ;;  %v347_v49 = vld [vmem:[%s2945_s7 + $0x90] sm:$0xff]  ;;  %v348_v58 = vld [vmem:[%s2945_s7 + $0x98] sm:$0xff] }
  0x33   : > { %2216 = vmatmul.mubr.msk.bf16.gmra.mrb[4].mxu0 %vm2214_vm6, %v3103_v47  ;;  %v644_v47 = vrot.slane %v583_v54, 1  ;;  %vm3273_vm6 = vmpackc.low %vm3196_vm12, %vm3238_vm15  ;;  %v585_v3 = vsel %vm3250_vm0, %v555_v2, 0.0  ;;  %v702_v13 = vrot.slane %v584_v5, 2  ;;  %v491_v16 = vmul.f32 %v2973_v43, %v343_v45  ;;  %v2695_v45 = vld [vmem:[%s3941_s1 + $0x168] sm:$0xff]   ;;  %v2699_v52 = vld [vmem:[%s3941_s1 + $0x170] sm:$0xff]  }
  0x34   : > { %1520 = vmatmul.mubr.bf16.gmra.mrb[4].mxu1 %v3165_v14  ;;  %2418 = vmatpush3.bf16.msra.mxu0 %v2685_v24  ;;  %v647_v19 = vrot.slane %v585_v3, 1  ;;  %v556_v21 = vmax.f32 %v526_v41, 0.0  ;;  %v557_v22 = vmax.f32 %v527_v8, 0.0  ;;  %v704_v24 = vrot.slane %v585_v3, 2  ;;  %vm3338_vm3 = vmand %vm3301_vm11, %vm404_vm2 }
  0x35   : > { %2419 = vmatprep.subr.bf16.mxu0 %v2687_v35  ;;  %1430 = vmatprep.mubr.bf16.mxu0 %v3254_v60  ;;  %v646_v27 = vsel %vm628_vm4, %v644_v47, %v645_v12  ;;  %v528_v30 = vadd.f32 %v2978_v44, %v491_v16  ;;  %v492_v31 = vmul.f32 %v2973_v43, %v344_v10  ;;  %vm390_vm13 = vcmp.le.s32.totalorder %v3047_v11, 16  ;;  %v2696_v11 = vld [vmem:[%s3941_s1 + $0x1d8] sm:$0xff]  }
  0x36   : > { %2243 = vmatprep.mubr.msk.bf16.mxu1 %vm3216_vm7, %v3256_v62  ;;  %v648_v1 = vsel %vm628_vm4, %v645_v12, %v647_v19  ;;  %v586_v28 = vsel %vm3238_vm15, %v556_v21, 0.0  ;;  %v3315_v35 = vpack.c.bf16 %v557_v22, %v556_v21  ;;  %v703_v36 = vsel %vm685_vm9, %v701_v56, %v702_v13  ;;  %vm3355_vm5 = vmand %vm380_vm1, %vm390_vm13  ;;  %2482 = vmatpush3.bf16.msra.mxu1 %v2694_v48 }
  0x37   : > { %v3324_v38 = vpack.c.bf16 %v648_v1, %v646_v27  ;;  %v649_v20 = vrot.slane %v586_v28, 1  ;;  %v706_v0 = vrot.slane %v586_v28, 2  ;;  %v705_v40 = vsel %vm685_vm9, %v702_v13, %v704_v24  ;;  %vm3996_vm1 = vmmov %vm3987_vm10  ;;  %2483 = vmatprep.subr.bf16.mxu1 %v2696_v11  ;;  %v349_v28 = vld [vmem:[%s2945_s7 + $0xa0] sm:$0x3] }
  0x38   : > { %2420 = vmatpush3.bf16.msra.mxu0 %v2689_v51  ;;  %v558_v50 = vmax.f32 %v528_v30, 0.0  ;;  %v587_v51 = vsel %vm3196_vm12, %v557_v22, 0.0  ;;  %v493_v53 = vmul.f32 %v2973_v43, %v345_v17  ;;  %v529_v54 = vadd.f32 %v2978_v44, %v492_v31  ;;  %vm3377_vm15 = vmand %vm3301_vm11, %vm3996_vm1  ;;  %v2697_v17 = vld [vmem:[%s3941_s1 + $0x128] sm:$0xff]  }
  0x39   : > { %2421 = vmatprep.subr.bf16.mxu0 %v2691_v18  ;;  %v650_v34 = vrot.slane %v587_v51, 1  ;;  %v707_v61 = vrot.slane %v587_v51, 2  ;;  %v494_v47 = vmul.f32 %v2973_v43, %v346_v55  ;;  %v495_v57 = vmul.f32 %v2973_v43, %v347_v49  ;;  %v2698_v18 = vld [vmem:[%s3941_s1 + $0x198] sm:$0xff]   ;;  %vm3401_vm0 = vmand %vm3355_vm5, %vm404_vm2 }
  0x3a   : > { %v3360_v59 = vpack.c.bf16 %v705_v40, %v703_v36  ;;  %v588_v63 = vsel %vm3288_vm8, %v558_v50, 0.0  ;;  %v530_v2 = vadd.f32 %v2978_v44, %v493_v53  ;;  %v559_v42 = vmax.f32 %v529_v54, 0.0  ;;  %vm3413_vm8 = vmpackc.low %vm3301_vm11, %vm3338_vm3  ;;  %2484 = vmatpush3.bf16.msra.mxu1 %v2698_v18  ;;  %v350_v36 = vld [vmem:[%s2945_s7 + $0xa8] sm:$0xff] }
  0x3b   : > { %2219 = vmatmul.mubr.msk.bf16.gmra.mrb[8].mxu0 %vm3095_vm14, %v3188_v33  ;;  %vm381_vm12 = vcmp.ge.s32.totalorder %v3154_v6, 1  ;;  %v651_v5 = vsel %vm628_vm4, %v649_v20, %v650_v34  ;;  %v652_v41 = vrot.slane %v588_v63, 1  ;;  %v709_v8 = vrot.slane %v588_v63, 2  ;;  %vm4005_vm13 = vmmov %vm3996_vm1 }
  0x3c   : > { %1528 = vmatmul.mubr.bf16.gmra.mrb[8].mxu1 %v3263_v4  ;;  %2422 = vmatpush3.bf16.msra.mxu0 %v2693_v37  ;;  %v496_v3 = vmul.f32 %v2973_v43, %v348_v58  ;;  %v560_v12 = vmax.f32 %v530_v2, 0.0  ;;  %v3384_v13 = vsel %vm3338_vm3, %v559_v42, 0.0  ;;  %v531_v15 = vadd.f32 %v2978_v44, %v494_v47  ;;  %vm3455_vm3 = vmand %vm3355_vm5, %vm4005_vm13  ;;  %v2700_v2 = vld [vmem:[%s3941_s1 + $0x1e0] sm:$0xff]  }
  0x3d   : > { %1438 = vmatprep.mubr.bf16.mxu0 %v3324_v38  ;;  %2246 = vmatprep.mubr.msk.bf16.mxu1 %vm3273_vm6, %v3315_v35  ;;  %v532_v16 = vadd.f32 %v2978_v44, %v495_v57  ;;  %v653_v19 = vsel %vm628_vm4, %v650_v34, %v652_v41  ;;  %v654_v21 = vrot.slane %v3384_v13, 1  ;;  %v708_v22 = vsel %vm685_vm9, %v706_v0, %v707_v61  ;;  %v351_v34 = vld [vmem:[%s2945_s7 + $0xb0] sm:$0xff] }
  0x3e   : > { %2423 = vmatprep.subr.bf16.mxu0 %v2695_v45  ;;  %vm391_vm10 = vcmp.le.s32.totalorder %v3154_v6, 16  ;;  %v3406_v27 = vpack.c.bf16 %v653_v19, %v651_v5  ;;  %v711_v30 = vrot.slane %v3384_v13, 2  ;;  %v3417_v32 = vpack.c.bf16 %v560_v12, %v559_v42  ;;  %v2701_v42 = vld [vmem:[%s3941_s1 + $0x130] sm:$0xff]   ;;  %2485 = vmatprep.subr.bf16.mxu1 %v2700_v2  ;;  %v2704_v19 = vld [vmem:[%s3941_s1 + $0x1a8] sm:$0xff]  }
  0x3f   : > { %v561_v1 = vmax.f32 %v531_v15, 0.0  ;;  %v590_v37 = vsel %vm3301_vm11, %v560_v12, 0.0  ;;  %v533_v20 = vadd.f32 %v2978_v44, %v496_v3  ;;  %v562_v0 = vmax.f32 %v532_v16, 0.0  ;;  %vm3437_vm11 = vmpackc.low %vm3355_vm5, %vm3401_vm0  ;;  %v2702_v3 = vld [vmem:[%s3941_s1 + $0x1a0] sm:$0xff]  }
  0x40   : > { %2424 = vmatpush3.bf16.msra.mxu0 %v2697_v17  ;;  %v497_v40 = vmul.f32 %v2973_v43, %v349_v28  ;;  %v710_v48 = vsel %vm685_vm9, %v707_v61, %v709_v8  ;;  %v655_v50 = vrot.slane %v590_v37, 1  ;;  %v712_v51 = vrot.slane %v590_v37, 2  ;;  %v2703_v17 = vld [vmem:[%s3941_s1 + $0x1e8] sm:$0xff]   ;;  %2486 = vmatpush3.bf16.msra.mxu1 %v2702_v3 }
  0x41   : > { %v591_v49 = vsel %vm3377_vm15, %v561_v1, 0.0  ;;  %v563_v54 = vmax.f32 %v533_v20, 0.0  ;;  %v3449_v55 = vsel %vm3401_vm0, %v562_v0, 0.0  ;;  %v498_v61 = vmul.f32 %v2973_v43, %v350_v36  ;;  %2425 = vmatprep.subr.bf16.mxu0 %v2699_v52  ;;  %2487 = vmatprep.subr.bf16.mxu1 %v2703_v17  ;;  %v353_v36 = vld [vmem:[%s2945_s7 + $0xc0] sm:$0xff]  ;;  %v354_v37 = vld [vmem:[%s2945_s7 + $0xc8] sm:$0xff]  ;;  %vm4012_vm15 = vmmov %vm4005_vm13 }
  0x42   : > { %v657_v53 = vrot.slane %v591_v49, 1  ;;  %v656_v47 = vsel %vm628_vm4, %v654_v21, %v655_v50  ;;  %v659_v57 = vrot.slane %v3449_v55, 1  ;;  %v714_v63 = vrot.slane %v591_v49, 2  ;;  %v352_v21 = vld [vmem:[%s2945_s7 + $0xb8] sm:$0x3] }
  0x43   : > { %2222 = vmatmul.mubr.msk.bf16.gmra.mrb[12].mxu0 %vm3216_vm7, %v3256_v62  ;;  %v534_v11 = vadd.f32 %v2978_v44, %v497_v40  ;;  %v3471_v5 = vpack.c.bf16 %v710_v48, %v708_v22  ;;  %v3477_v8 = vsel %vm3355_vm5, %v563_v54, 0.0  ;;  %v499_v10 = vmul.f32 %v2973_v43, %v351_v34  ;;  %vm3490_vm5 = vmand %vm381_vm12, %vm391_vm10  ;;  %v2705_v48 = vld [vmem:[%s3941_s1 + $0x178] sm:$0xff]  }
  0x44   : > { %1536 = vmatmul.mubr.bf16.gmra.mrb[12].mxu1 %v3360_v59  ;;  %1446 = vmatprep.mubr.bf16.mxu0 %v3406_v27  ;;  %v658_v45 = vsel %vm628_vm4, %v655_v50, %v657_v53  ;;  %v3483_v12 = vpack.c.bf16 %v563_v54, %v562_v0  ;;  %v660_v15 = vrot.slane %v3477_v8, 1  ;;  %v535_v16 = vadd.f32 %v2978_v44, %v498_v61  ;;  %vm3519_vm12 = vmand %vm3490_vm5, %vm404_vm2  ;;  %v2706_v61 = vld [vmem:[%s3941_s1 + $0x1f0] sm:$0xff]  }
  0x45   : > { %2249 = vmatprep.mubr.msk.bf16.mxu1 %vm3413_vm8, %v3417_v32  ;;  %v3473_v41 = vpack.c.bf16 %v658_v45, %v656_v47  ;;  %2426 = vmatpush3.bf16.msra.mxu0 %v2701_v42  ;;  %v564_v13 = vmax.f32 %v534_v11, 0.0  ;;  %v536_v18 = vadd.f32 %v2978_v44, %v499_v10  ;;  %v372_v6 = vadd.s32 8, %v2916_v26  ;;  %vm463_vm0 = vmand %vm3490_vm5, %vm4012_vm15 }
  0x46   : > { %v713_v22 = vsel %vm685_vm9, %v711_v30, %v712_v51  ;;  %v715_v24 = vsel %vm685_vm9, %v712_v51, %v714_v63  ;;  %v565_v28 = vmax.f32 %v535_v16, 0.0  ;;  %v500_v40 = vmul.f32 %v2973_v43, %v352_v21  ;;  %2488 = vmatpush3.bf16.msra.mxu1 %v2704_v19  ;;  %2427 = vmatprep.subr.bf16.mxu0 %v2705_v48  ;;  %vm3572_vm13 = vmpackc.low %vm3490_vm5, %vm3519_vm12 }
  0x47   : > { %v594_v1 = vsel %vm3455_vm3, %v564_v13, 0.0  ;;  %v566_v0 = vmax.f32 %v536_v18, 0.0  ;;  %v661_v49 = vsel %vm628_vm4, %v659_v57, %v660_v15  ;;  %v501_v51 = vmul.f32 %v2973_v43, %v353_v36  ;;  %2489 = vmatprep.subr.bf16.mxu1 %v2706_v61  ;;  %v2708_v13 = vld [vmem:[%s3941_s1 + $0x1b0] sm:$0xff]   ;;  %v2710_v18 = vld [vmem:[%s3941_s1 + $0x1b8] sm:$0xff]  }
  0x48   : > { %v662_v20 = vrot.slane %v594_v1, 1  ;;  %v3533_v50 = vsel %vm3519_vm12, %v565_v28, 0.0  ;;  %v502_v52 = vmul.f32 %v2973_v43, %v354_v37  ;;  %v716_v53 = vrot.slane %v3449_v55, 2  ;;  %v2707_v55 = vld [vmem:[%s3941_s1 + $0x138] sm:$0xff]  }
  0x49   : > { %v3538_v54 = vpack.c.bf16 %v715_v24, %v713_v22  ;;  %v717_v34 = vrot.slane %v3477_v8, 2  ;;  %v719_v47 = vrot.slane %v594_v1, 2  ;;  %v537_v57 = vadd.f32 %v2978_v44, %v500_v40  ;;  %2428 = vmatpush3.bf16.msra.mxu0 %v2707_v55  ;;  %v3594_v22 = vld [vmem:[%s3941_s1 + $0x200] sm:$0xff]  }
  0x4a   : > { %v663_v58 = vsel %vm628_vm4, %v660_v15, %v662_v20  ;;  %v596_v63 = vsel %vm3490_vm5, %v566_v0, 0.0  ;;  %vm382_vm1 = vcmp.ge.s32.totalorder %v372_v6, 1  ;;  %v664_v42 = vrot.slane %v3533_v50, 1  ;;  %v2709_v15 = vld [vmem:[%s3941_s1 + $0x1f8] sm:$0xff]   ;;  %2490 = vmatpush3.bf16.msra.mxu1 %v2708_v13  ;;  %2557 = vmatprep.subr.bf16.mxu0 %v3594_v22 }
  0x4b   : > { %2225 = vmatmul.mubr.msk.bf16.gmra.mrb[16].mxu0 %vm3273_vm6, %v3315_v35  ;;  %v3551_v2 = vpack.c.bf16 %v663_v58, %v661_v49  ;;  %v3554_v45 = vpack.c.bf16 %v566_v0, %v565_v28  ;;  %vm392_vm10 = vcmp.le.s32.totalorder %v372_v6, 16  ;;  %v567_v11 = vmax.f32 %v537_v57, 0.0  ;;  %2491 = vmatprep.subr.bf16.mxu1 %v2709_v15  ;;  %v357_v57 = vld [vmem:[%s2945_s7 + $0xe0] sm:$0xff] }
  0x4c   : > { %1544 = vmatmul.mubr.bf16.gmra.mrb[16].mxu1 %v3471_v5  ;;  %1454 = vmatprep.mubr.bf16.mxu0 %v3473_v41  ;;  %v665_v8 = vrot.slane %v596_v63, 1  ;;  %v538_v10 = vadd.f32 %v2978_v44, %v501_v51  ;;  %v539_v3 = vadd.f32 %v2978_v44, %v502_v52  ;;  %v718_v56 = vsel %vm685_vm9, %v716_v53, %v717_v34  ;;  %vm3587_vm3 = vmand %vm382_vm1, %vm392_vm10  ;;  %v355_v52 = vld [vmem:[%s2945_s7 + $0xd0] sm:$0x3] }
  0x4d   : > { %2252 = vmatprep.mubr.msk.bf16.mxu1 %vm3437_vm11, %v3483_v12  ;;  %v597_v17 = vsel %vm463_vm0, %v567_v11, 0.0  ;;  %v720_v24 = vsel %vm685_vm9, %v717_v34, %v719_v47  ;;  %v721_v37 = vrot.slane %v3533_v50, 2  ;;  %vm3608_vm5 = vmand %vm3587_vm3, %vm404_vm2  ;;  %v722_v40 = vrot.slane %v596_v63, 2  ;;  %v356_v34 = vld [vmem:[%s2945_s7 + $0xd8] sm:$0xff]  ;;  %v358_v63 = vld [vmem:[%s2945_s7 + $0xe8] sm:$0x3]  ;;  %s310_s7 = sadd.s32 %s2132_s28, %s2131_s20 }
  0x4e   : > { %v667_v19 = vrot.slane %v597_v17, 1  ;;  %v666_v1 = vsel %vm628_vm4, %v664_v42, %v665_v8  ;;  %v568_v28 = vmax.f32 %v538_v10, 0.0  ;;  %v569_v36 = vmax.f32 %v539_v3, 0.0  ;;  %2492 = vmatpush3.bf16.msra.mxu1 %v2710_v18  ;;  %vm3948_vm12 = vmpackc.low %vm3587_vm3, %vm3608_vm5  ;;  %s2133_s30 = sshll.u32 %s310_s7, 3 }
  0x4f   : > { %v3612_v30 = vpack.c.bf16 %v720_v24, %v718_v56  ;;  %v724_v48 = vrot.slane %v597_v17, 2  ;;  %2589 = vmatprep.subr.bf16.mxu1 %v3594_v22  ;;  %v373_v51 = vadd.s32 9, %v2916_v26  ;;  %v503_v58 = vmul.f32 %v2973_v43, %v355_v52  ;;  %s3875_s9 = scalar_lea.vmem %s3944_s4, %s2133_s30 }
  0x50   : > { %v668_v6 = vsel %vm628_vm4, %v665_v8, %v667_v19  ;;  %v598_v49 = vsel %vm3608_vm5, %v568_v28, 0.0  ;;  %v3619_v50 = vpack.c.bf16 %v569_v36, %v568_v28  ;;  %v599_v53 = vsel %vm3587_vm3, %v569_v36, 0.0 }
  0x51   : > { %v3614_v0 = vpack.c.bf16 %v668_v6, %v666_v1  ;;  %vm383_vm1 = vcmp.ge.s32.totalorder %v373_v51, 1  ;;  %vm393_vm15 = vcmp.le.s32.totalorder %v373_v51, 16  ;;  %v745_v26 = vrot.slane %v598_v49, 1 }
  0x52   : > { %v723_v61 = vsel %vm685_vm9, %v721_v37, %v722_v40  ;;  %v725_v47 = vsel %vm685_vm9, %v722_v40, %v724_v48  ;;  %vm3640_vm0 = vmand %vm383_vm1, %vm393_vm15  ;;  %v504_v42 = vmul.f32 %v2973_v43, %v356_v34  ;;  %v540_v11 = vadd.f32 %v2978_v44, %v503_v58 }
  0x53   : > { %2228 = vmatmul.mubr.msk.bf16.gmra.mrb[20].mxu0 %vm3413_vm8, %v3417_v32  ;;  %v746_v8 = vrot.slane %v599_v53, 1  ;;  %v505_v10 = vmul.f32 %v2973_v43, %v357_v57  ;;  %v506_v3 = vmul.f32 %v2973_v43, %v358_v63  ;;  %v752_v13 = vrot.slane %v598_v49, 2  ;;  %vm3663_vm15 = vmand %vm3640_vm0, %vm404_vm2 }
  0x54   : > { %1552 = vmatmul.mubr.bf16.gmra.mrb[20].mxu1 %v3538_v54  ;;  %1462 = vmatprep.mubr.bf16.mxu0 %v3551_v2  ;;  %vm4021_vm10 = vcmp.le.s32.totalorder %v2925_v29, 16  ;;  %v753_v15 = vrot.slane %v599_v53, 2  ;;  %v541_v17 = vadd.f32 %v2978_v44, %v504_v42  ;;  %v570_v18 = vmax.f32 %v540_v11, 0.0  ;;  %vm4024_vm2 = vmpackc.low %vm3587_vm3, %vm3608_vm5 }
  0x55   : > { %2255 = vmatprep.mubr.msk.bf16.mxu1 %vm3572_vm13, %v3554_v45  ;;  %vm466_vm1 = vmand %vm3587_vm3, %vm4021_vm10  ;;  %v542_v43 = vadd.f32 %v2978_v44, %v505_v10  ;;  %v543_v19 = vadd.f32 %v2978_v44, %v506_v3  ;;  %v3669_v24 = vpack.c.bf16 %v725_v47, %v723_v61  ;;  %v747_v23 = vsel %vm628_vm4, %v745_v26, %v746_v8 }
  0x56   : > { %v571_v1 = vmax.f32 %v541_v17, 0.0  ;;  %v600_v28 = vsel %vm466_vm1, %v570_v18, 0.0  ;;  %v754_v40 = vsel %vm685_vm9, %v752_v13, %v753_v15  ;;  %v2713_v17 = vld [vmem:[%s3941_s1 + $0x210] sm:$0xff]  }
  0x57   : > { %v572_v36 = vmax.f32 %v542_v43, 0.0  ;;  %v573_v6 = vmax.f32 %v543_v19, 0.0  ;;  %v748_v37 = vrot.slane %v600_v28, 1  ;;  %v755_v48 = vrot.slane %v600_v28, 2 }
  0x58   : > { %v601_v44 = vsel %vm3663_vm15, %v571_v1, 0.0 }
  0x59   : > { %v602_v29 = vsel %vm3640_vm0, %v572_v36, 0.0  ;;  %v762_v51 = vrot.slane %v601_v44, 1  ;;  %v3684_v52 = vpack.c.bf16 %v572_v36, %v571_v1  ;;  %v749_v53 = vsel %vm628_vm4, %v746_v8, %v748_v37 }
  0x5a   : > { %v756_v58 = vsel %vm685_vm9, %v753_v15, %v755_v48  ;;  %v763_v34 = vrot.slane %v602_v29, 1  ;;  %v3691_v61 = vpack.c.bf16 %v749_v53, %v747_v23  ;;  %v769_v57 = vrot.slane %v601_v44, 2  ;;  %v2712_v15 = vld [vmem:[%s3941_s1 + $0x208] sm:$0xff]  }
  0x5b   : > { %2231 = vmatmul.mubr.msk.bf16.gmra.mrb[24].mxu0 %vm3437_vm11, %v3483_v12  ;;  %v3693_v47 = vpack.c.bf16 %v756_v58, %v754_v40  ;;  %v770_v63 = vrot.slane %v602_v29, 2 }
  0x5c   : > { %1560 = vmatmul.mubr.bf16.gmra.mrb[24].mxu1 %v3612_v30  ;;  %1470 = vmatprep.mubr.bf16.mxu0 %v3614_v0  ;;  %v3696_v42 = vsel %vm628_vm4, %v762_v51, %v763_v34 }
  0x5d   : > { %2258 = vmatprep.mubr.msk.bf16.mxu1 %vm3948_vm12, %v3619_v50  ;;  %vm469_vm12 = vmand %vm3640_vm0, %vm4021_vm10  ;;  %v3704_v10 = vsel %vm685_vm9, %v769_v57, %v770_v63 }
  0x5e   : > { %v603_v49 = vsel %vm469_vm12, %v573_v6, 0.0 }
  0x5f   : > { %v765_v26 = vrot.slane %v603_v49, 1 }
  0x61   : > { %v3699_v11 = vsel %vm628_vm4, %v763_v34, %v765_v26  ;;  %vm2280_vm4 = vmpackc.low %vm3640_vm0, %vm3663_vm15 }
  0x62   : > { %v804_v8 = vpack.c.bf16 %v3699_v11, %v3696_v42 }
  0x63   : > { %2234 = vmatmul.mubr.msk.bf16.gmra.mrb[28].mxu0 %vm3572_vm13, %v3554_v45 }
  0x64   : > { %1568 = vmatmul.mubr.bf16.gmra.mrb[28].mxu1 %v3669_v24  ;;  %1608 = vmatprep.mubr.bf16.mxu0 %v3165_v14  ;;  %v772_v14 = vrot.slane %v603_v49, 2 }
  0x65   : > { %1705 = vmatprep.mubr.bf16.mxu1 %v3254_v60 }
  0x66   : > { %v3707_v3 = vsel %vm685_vm9, %v770_v63, %v772_v14 }
  0x67   : > { %v805_v13 = vpack.c.bf16 %v3707_v3, %v3704_v10 }
  0x6b   : > { %1609 = vmatmul.mubr.bf16.vlgmr.msra.gmra.mrb[32].mxu0 %v3156_v7  ;;  %v2715_v7 = vld [vmem:[%s3941_s1 + $0x220] sm:$0xff]  }
  0x6c   : > { %2261 = vmatmul.mubr.msk.bf16.vlgmr.msra.gmra.mrb[32].mxu1 %vm3095_vm14, %v3188_v33  ;;  %2558 = vmatpush3.bf16.msra.mxu0 %v3594_v22  ;;  %v2716_v33 = vld [vmem:[%s3941_s1 + $0x228] sm:$0xff]  }
  0x6d   : > { %1616 = vmatprep.mubr.bf16.mxu0 %v3263_v4  ;;  %1713 = vmatprep.mubr.bf16.mxu1 %v3324_v38 }
  0x6e   : > { %2559 = vmatprep.subr.bf16.mxu0 %v2712_v15  ;;  %2597 = vmatpush3.bf16.msra.mxu1 %v3594_v22 }
  0x6f   : > { %2590 = vmatprep.subr.bf16.mxu1 %v2712_v15 }
  0x70   : > { %2560 = vmatpush3.bf16.msra.mxu0 %v2712_v15 }
  0x71   : > { %2561 = vmatprep.subr.bf16.mxu0 %v2713_v17 }
  0x72   : > { %2598 = vmatpush3.bf16.msra.mxu1 %v2712_v15 }
  0x73   : > { %1617 = vmatmul.mubr.bf16.gmra.mrb[36].mxu0 %v3254_v60  ;;  %2591 = vmatprep.subr.bf16.mxu1 %v2713_v17  ;;  %v2718_v60 = vld [vmem:[%s3941_s1 + $0x238] sm:$0xff]  }
  0x74   : > { %2264 = vmatmul.mubr.msk.bf16.gmra.mrb[36].mxu1 %vm3216_vm7, %v3256_v62  ;;  %1624 = vmatprep.mubr.bf16.mxu0 %v3360_v59 }
  0x75   : > { %1721 = vmatprep.mubr.bf16.mxu1 %v3406_v27  ;;  %2562 = vmatpush3.bf16.msra.mxu0 %v2713_v17 }
  0x76   : > { %2563 = vmatprep.subr.bf16.mxu0 %v2714_v39  ;;  %2599 = vmatpush3.bf16.msra.mxu1 %v2713_v17 }
  0x77   : > { %2592 = vmatprep.subr.bf16.mxu1 %v2714_v39 }
  0x79   : > { %2564 = vmatpush3.bf16.msra.mxu0 %v2714_v39 }
  0x7a   : > { %2565 = vmatprep.subr.bf16.mxu0 %v2715_v7  ;;  %2600 = vmatpush3.bf16.msra.mxu1 %v2714_v39 }
  0x7b   : > { %1625 = vmatmul.mubr.bf16.gmra.mrb[40].mxu0 %v3324_v38  ;;  %2593 = vmatprep.subr.bf16.mxu1 %v2715_v7 }
  0x7c   : > { %2267 = vmatmul.mubr.msk.bf16.gmra.mrb[40].mxu1 %vm3273_vm6, %v3315_v35  ;;  %1632 = vmatprep.mubr.bf16.mxu0 %v3471_v5 }
  0x7d   : > { %1729 = vmatprep.mubr.bf16.mxu1 %v3473_v41  ;;  %2566 = vmatpush3.bf16.msra.mxu0 %v2715_v7 }
  0x7e   : > { %2567 = vmatprep.subr.bf16.mxu0 %v2716_v33  ;;  %2601 = vmatpush3.bf16.msra.mxu1 %v2715_v7 }
  0x7f   : > { %2594 = vmatprep.subr.bf16.mxu1 %v2716_v33 }
  0x81   : > { %2568 = vmatpush3.bf16.msra.mxu0 %v2716_v33 }
  0x82   : > { %2569 = vmatprep.subr.bf16.mxu0 %v2717_v46  ;;  %2602 = vmatpush3.bf16.msra.mxu1 %v2716_v33 }
  0x83   : > { %1633 = vmatmul.mubr.bf16.gmra.mrb[44].mxu0 %v3406_v27  ;;  %2595 = vmatprep.subr.bf16.mxu1 %v2717_v46 }
  0x84   : > { %2270 = vmatmul.mubr.msk.bf16.gmra.mrb[44].mxu1 %vm3413_vm8, %v3417_v32  ;;  %1640 = vmatprep.mubr.bf16.mxu0 %v3538_v54 }
  0x85   : > { %1737 = vmatprep.mubr.bf16.mxu1 %v3551_v2  ;;  %2570 = vmatpush3.bf16.msra.mxu0 %v2717_v46 }
  0x86   : > { %2571 = vmatprep.subr.bf16.mxu0 %v2718_v60  ;;  %2603 = vmatpush3.bf16.msra.mxu1 %v2717_v46 }
  0x87   : > { %2596 = vmatprep.subr.bf16.mxu1 %v2718_v60 }
  0x89   : > { %2572 = vmatpush3.bf16.msra.mxu0 %v2718_v60 }
  0x8a   : > { %2604 = vmatpush3.bf16.msra.mxu1 %v2718_v60 }
  0x8b   : > { %1641 = vmatmul.mubr.bf16.gmra.mrb[48].mxu0 %v3473_v41 }
  0x8c   : > { %2273 = vmatmul.mubr.msk.bf16.gmra.mrb[48].mxu1 %vm3437_vm11, %v3483_v12  ;;  %1648 = vmatprep.mubr.bf16.mxu0 %v3612_v30 }
  0x8d   : > { %1745 = vmatprep.mubr.bf16.mxu1 %v3614_v0 }
  0x93   : > { %1649 = vmatmul.mubr.bf16.gmra.mrb[52].mxu0 %v3551_v2 }
  0x94   : > { %2276 = vmatmul.mubr.msk.bf16.gmra.mrb[52].mxu1 %vm3572_vm13, %v3554_v45  ;;  %1656 = vmatprep.mubr.bf16.mxu0 %v3669_v24 }
  0x95   : > { %1753 = vmatprep.mubr.bf16.mxu1 %v3691_v61 }
  0x9b   : > { %1657 = vmatmul.mubr.bf16.gmra.mrb[56].mxu0 %v3614_v0 }
  0x9c   : > { %2279 = vmatmul.mubr.msk.bf16.gmra.mrb[56].mxu1 %vm4024_vm2, %v3619_v50  ;;  %1664 = vmatprep.mubr.bf16.mxu0 %v3693_v47 }
  0x9d   : > { %1761 = vmatprep.mubr.bf16.mxu1 %v804_v8 }
  0xa3   : > { %1665 = vmatmul.mubr.bf16.gmra.mrb[60].mxu0 %v3691_v61 }
  0xa4   : > { %2282 = vmatmul.mubr.msk.bf16.gmra.mrb[60].mxu1 %vm2280_vm4, %v3684_v52  ;;  %2573 = vmatprep.mubr.bf16.mxu0 %v3263_v4 }
  0xa5   : > { %2581 = vmatprep.mubr.bf16.mxu1 %v3612_v30 }
  0xab   : > { %2574 = vmatmul.mubr.bf16.vlgmr.msra.gmra.mrb[64].mxu0 %v3360_v59 }
  0xac   : > { %2582 = vmatmul.mubr.bf16.vlgmr.msra.gmra.mrb[64].mxu1 %v3669_v24  ;;  %2577 = vmatprep.mubr.bf16.mxu0 %v3471_v5 }
  0xad   : > { %2585 = vmatprep.mubr.bf16.mxu1 %v3693_v47 }
  0xb3   : > { %2578 = vmatmul.mubr.bf16.gmra.mrb[68].mxu0 %v3538_v54 }
  0xb4   : > { %2586 = vmatmul.mubr.bf16.gmra.mrb[68].mxu1 %v805_v13 }
  0xfe   : > { %v2301_v62 = vpop.f32.mrb[0].mxu0 }
  0xff   : > { %v2365_v9 = vpop.f32.mrb[0].mxu1  ;;  %v2302_v35 = vpop.f32.mrb[1].mxu0 }
 0x100   : > { %v2303_v4 = vadd.f32 %v2302_v35, %v2301_v62  ;;  %v2366_v38 = vpop.f32.mrb[1].mxu1  ;;  %v2304_v27 = vpop.f32.mrb[2].mxu0 }
 0x101   : > { %v2367_v31 = vadd.f32 %v2366_v38, %v2365_v9  ;;  %v2368_v59 = vpop.f32.mrb[2].mxu1  ;;  %v2305_v32 = vpop.f32.mrb[3].mxu0 }
 0x102   : > { %v2306_v25 = vadd.f32 %v2305_v32, %v2304_v27  ;;  %v2369_v41 = vpop.f32.mrb[3].mxu1 }
 0x103   : > { %v3797_v5 = vadd.f32 %v2367_v31, %v2303_v4  ;;  %v2370_v12 = vadd.f32 %v2369_v41, %v2368_v59 }
 0x105   : > { %v3799_v2 = vadd.f32 %v2370_v12, %v2306_v25 }
 0x106   : > { %v2307_v54 = vpop.f32.mrb[4].mxu0 }
 0x107   : > { %v2371_v45 = vpop.f32.mrb[4].mxu1  ;;  %v2308_v16 = vpop.f32.mrb[5].mxu0 }
 0x108   : > { %v2309_v21 = vadd.f32 %v2308_v16, %v2307_v54  ;;  %v2372_v22 = vpop.f32.mrb[5].mxu1  ;;  %v2310_v20 = vpop.f32.mrb[6].mxu0 }
 0x109   : > { %v2373_v30 = vadd.f32 %v2372_v22, %v2371_v45  ;;  %v2374_v0 = vpop.f32.mrb[6].mxu1  ;;  %v2311_v50 = vpop.f32.mrb[7].mxu0 }
 0x10a   : > { %v2312_v55 = vadd.f32 %v2311_v50, %v2310_v20  ;;  %v2375_v18 = vpop.f32.mrb[7].mxu1 }
 0x10b   : > { %v3801_v56 = vadd.f32 %v2373_v30, %v2309_v21  ;;  %v2376_v43 = vadd.f32 %v2375_v18, %v2374_v0 }
 0x10d   : > { %v3803_v19 = vadd.f32 %v2376_v43, %v2312_v55 }
 0x10e   : > { %v2313_v24 = vpop.f32.mrb[8].mxu0 }
 0x10f   : > { %v2377_v1 = vpop.f32.mrb[8].mxu1  ;;  %v2314_v28 = vpop.f32.mrb[9].mxu0 }
 0x110   : > { %v2315_v23 = vadd.f32 %v2314_v28, %v2313_v24  ;;  %v2378_v36 = vpop.f32.mrb[9].mxu1  ;;  %v2316_v6 = vpop.f32.mrb[10].mxu0 }
 0x111   : > { %v2379_v37 = vadd.f32 %v2378_v36, %v2377_v1  ;;  %v2380_v40 = vpop.f32.mrb[10].mxu1  ;;  %v2317_v48 = vpop.f32.mrb[11].mxu0 }
 0x112   : > { %v2318_v44 = vadd.f32 %v2317_v48, %v2316_v6  ;;  %v2381_v29 = vpop.f32.mrb[11].mxu1 }
 0x113   : > { %v3805_v49 = vadd.f32 %v2379_v37, %v2315_v23  ;;  %v2382_v51 = vadd.f32 %v2381_v29, %v2380_v40 }
 0x115   : > { %v3807_v52 = vadd.f32 %v2382_v51, %v2318_v44 }
 0x116   : > { %v2319_v53 = vpop.f32.mrb[12].mxu0 }
 0x117   : > { %v2383_v58 = vpop.f32.mrb[12].mxu1  ;;  %v2320_v34 = vpop.f32.mrb[13].mxu0 }
 0x118   : > { %v2321_v26 = vadd.f32 %v2320_v34, %v2319_v53  ;;  %v2384_v61 = vpop.f32.mrb[13].mxu1  ;;  %v2322_v47 = vpop.f32.mrb[14].mxu0 }
 0x119   : > { %v2385_v57 = vadd.f32 %v2384_v61, %v2383_v58  ;;  %v2386_v63 = vpop.f32.mrb[14].mxu1  ;;  %v2323_v42 = vpop.f32.mrb[15].mxu0 }
 0x11a   : > { %v2324_v11 = vadd.f32 %v2323_v42, %v2322_v47  ;;  %v2387_v14 = vpop.f32.mrb[15].mxu1 }
 0x11b   : > { %v3809_v8 = vadd.f32 %v2385_v57, %v2321_v26  ;;  %v2388_v10 = vadd.f32 %v2387_v14, %v2386_v63 }
 0x11d   : > { %v3811_v3 = vadd.f32 %v2388_v10, %v2324_v11 }
 0x11e   : > { %v2325_v13 = vpop.f32.mrb[16].mxu0 }
 0x11f   : > { %v2389_v15 = vpop.f32.mrb[16].mxu1  ;;  %v2326_v17 = vpop.f32.mrb[17].mxu0 }
 0x120   : > { %v2327_v39 = vadd.f32 %v2326_v17, %v2325_v13  ;;  %v2390_v7 = vpop.f32.mrb[17].mxu1  ;;  %v2328_v33 = vpop.f32.mrb[18].mxu0 }
 0x121   : > { %v2391_v46 = vadd.f32 %v2390_v7, %v2389_v15  ;;  %v2392_v60 = vpop.f32.mrb[18].mxu1  ;;  %v2329_v62 = vpop.f32.mrb[19].mxu0 }
 0x122   : > { %v2330_v9 = vadd.f32 %v2329_v62, %v2328_v33  ;;  %v2393_v35 = vpop.f32.mrb[19].mxu1 }
 0x123   : > { %v3813_v4 = vadd.f32 %v2391_v46, %v2327_v39  ;;  %v2394_v38 = vadd.f32 %v2393_v35, %v2392_v60 }
 0x125   : > { %v3815_v27 = vadd.f32 %v2394_v38, %v2330_v9 }
 0x126   : > { %v2331_v31 = vpop.f32.mrb[20].mxu0 }
 0x127   : > { %v2395_v59 = vpop.f32.mrb[20].mxu1  ;;  %v2332_v32 = vpop.f32.mrb[21].mxu0 }
 0x128   : > { %v2333_v25 = vadd.f32 %v2332_v32, %v2331_v31  ;;  %v2396_v41 = vpop.f32.mrb[21].mxu1  ;;  %v2334_v12 = vpop.f32.mrb[22].mxu0 }
 0x129   : > { %v2397_v54 = vadd.f32 %v2396_v41, %v2395_v59  ;;  %v2398_v45 = vpop.f32.mrb[22].mxu1  ;;  %v2335_v16 = vpop.f32.mrb[23].mxu0 }
 0x12a   : > { %v2336_v21 = vadd.f32 %v2335_v16, %v2334_v12  ;;  %v2399_v22 = vpop.f32.mrb[23].mxu1 }
 0x12b   : > { %v3817_v20 = vadd.f32 %v2397_v54, %v2333_v25  ;;  %v2400_v30 = vadd.f32 %v2399_v22, %v2398_v45 }
 0x12d   : > { %v3819_v0 = vadd.f32 %v2400_v30, %v2336_v21 }
 0x12e   : > { %v2337_v50 = vpop.f32.mrb[24].mxu0 }
 0x12f   : > { %v2401_v55 = vpop.f32.mrb[24].mxu1  ;;  %v2338_v18 = vpop.f32.mrb[25].mxu0 }
 0x130   : > { %v2339_v43 = vadd.f32 %v2338_v18, %v2337_v50  ;;  %v2402_v24 = vpop.f32.mrb[25].mxu1  ;;  %v2340_v1 = vpop.f32.mrb[26].mxu0 }
 0x131   : > { %v2403_v28 = vadd.f32 %v2402_v24, %v2401_v55  ;;  %v2404_v23 = vpop.f32.mrb[26].mxu1  ;;  %v2341_v36 = vpop.f32.mrb[27].mxu0 }
 0x132   : > { %v2342_v6 = vadd.f32 %v2341_v36, %v2340_v1  ;;  %v2405_v37 = vpop.f32.mrb[27].mxu1 }
 0x133   : > { %v3821_v40 = vadd.f32 %v2403_v28, %v2339_v43  ;;  %v2406_v48 = vadd.f32 %v2405_v37, %v2404_v23 }
 0x135   : > { %v3823_v44 = vadd.f32 %v2406_v48, %v2342_v6 }
 0x136   : > { %v2343_v29 = vpop.f32.mrb[28].mxu0 }
 0x137   : > { %v2407_v51 = vpop.f32.mrb[28].mxu1  ;;  %v2344_v53 = vpop.f32.mrb[29].mxu0 }
 0x138   : > { %v2345_v58 = vadd.f32 %v2344_v53, %v2343_v29  ;;  %v2408_v34 = vpop.f32.mrb[29].mxu1  ;;  %v2346_v26 = vpop.f32.mrb[30].mxu0 }
 0x139   : > { %v2409_v61 = vadd.f32 %v2408_v34, %v2407_v51  ;;  %v2410_v47 = vpop.f32.mrb[30].mxu1  ;;  %v2347_v57 = vpop.f32.mrb[31].mxu0 }
 0x13a   : > { %v2348_v63 = vadd.f32 %v2347_v57, %v2346_v26  ;;  %v2411_v42 = vpop.f32.mrb[31].mxu1 }
 0x13b   : > { %v3825_v11 = vadd.f32 %v2409_v61, %v2345_v58  ;;  %v2412_v14 = vadd.f32 %v2411_v42, %v2410_v47 }
 0x13d   : > { %v3827_v10 = vadd.f32 %v2412_v14, %v2348_v63 }
 0x13e   : > { %v2429_v13 = vpop.f32.mrb[32].mxu0 }
 0x13f   : > { %v2430_v15 = vpop.f32.mrb[33].mxu0  ;;  %v2493_v17 = vpop.f32.mrb[32].mxu1 }
 0x140   : > { %v2431_v39 = vadd.f32 %v2430_v15, %v2429_v13  ;;  %v2432_v7 = vpop.f32.mrb[34].mxu0  ;;  %v2494_v33 = vpop.f32.mrb[33].mxu1 }
 0x141   : > { %v2433_v46 = vpop.f32.mrb[35].mxu0  ;;  %v2495_v60 = vadd.f32 %v2494_v33, %v2493_v17  ;;  %v2496_v62 = vpop.f32.mrb[34].mxu1 }
 0x142   : > { %v1611_v9 = vadd.f32 %v2431_v39, %v3797_v5  ;;  %v2434_v35 = vadd.f32 %v2433_v46, %v2432_v7  ;;  %v2497_v38 = vpop.f32.mrb[35].mxu1 }
 0x143   : > { %v2498_v31 = vadd.f32 %v2497_v38, %v2496_v62 }
 0x144   : > { %v1614_v59 = vadd.f32 %v2434_v35, %v3799_v2  ;;  %v3831_v32 = vadd.f32 %v2495_v60, %v1611_v9 }
 0x146   : > { %v2435_v25 = vpop.f32.mrb[36].mxu0  ;;  %v3833_v41 = vadd.f32 %v2498_v31, %v1614_v59 }
 0x147   : > { %v2436_v12 = vpop.f32.mrb[37].mxu0  ;;  %v2499_v54 = vpop.f32.mrb[36].mxu1 }
 0x148   : > { %v2437_v45 = vadd.f32 %v2436_v12, %v2435_v25  ;;  %v2438_v16 = vpop.f32.mrb[38].mxu0  ;;  %v2500_v21 = vpop.f32.mrb[37].mxu1 }
 0x149   : > { %v2439_v22 = vpop.f32.mrb[39].mxu0  ;;  %v2501_v30 = vadd.f32 %v2500_v21, %v2499_v54  ;;  %v2502_v50 = vpop.f32.mrb[38].mxu1 }
 0x14a   : > { %v1619_v5 = vadd.f32 %v2437_v45, %v3801_v56  ;;  %v2440_v55 = vadd.f32 %v2439_v22, %v2438_v16  ;;  %v2503_v18 = vpop.f32.mrb[39].mxu1 }
 0x14b   : > { %v2504_v43 = vadd.f32 %v2503_v18, %v2502_v50 }
 0x14c   : > { %v1622_v2 = vadd.f32 %v2440_v55, %v3803_v19  ;;  %v3837_v24 = vadd.f32 %v2501_v30, %v1619_v5 }
 0x14e   : > { %v2441_v1 = vpop.f32.mrb[40].mxu0  ;;  %v3839_v28 = vadd.f32 %v2504_v43, %v1622_v2 }
 0x14f   : > { %v2442_v23 = vpop.f32.mrb[41].mxu0  ;;  %v2505_v36 = vpop.f32.mrb[40].mxu1 }
 0x150   : > { %v2443_v6 = vadd.f32 %v2442_v23, %v2441_v1  ;;  %v2444_v37 = vpop.f32.mrb[42].mxu0  ;;  %v2506_v48 = vpop.f32.mrb[41].mxu1 }
 0x151   : > { %v2445_v29 = vpop.f32.mrb[43].mxu0  ;;  %v2507_v51 = vadd.f32 %v2506_v48, %v2505_v36  ;;  %v2508_v53 = vpop.f32.mrb[42].mxu1 }
 0x152   : > { %v1627_v56 = vadd.f32 %v2443_v6, %v3805_v49  ;;  %v2446_v58 = vadd.f32 %v2445_v29, %v2444_v37  ;;  %v2509_v34 = vpop.f32.mrb[43].mxu1 }
 0x153   : > { %v2510_v26 = vadd.f32 %v2509_v34, %v2508_v53 }
 0x154   : > { %v1630_v19 = vadd.f32 %v2446_v58, %v3807_v52  ;;  %v3843_v61 = vadd.f32 %v2507_v51, %v1627_v56 }
 0x156   : > { %v2447_v47 = vpop.f32.mrb[44].mxu0  ;;  %v3845_v57 = vadd.f32 %v2510_v26, %v1630_v19 }
 0x157   : > { %v2448_v63 = vpop.f32.mrb[45].mxu0  ;;  %v2511_v42 = vpop.f32.mrb[44].mxu1 }
 0x158   : > { %v2449_v14 = vadd.f32 %v2448_v63, %v2447_v47  ;;  %v2450_v13 = vpop.f32.mrb[46].mxu0  ;;  %v2512_v15 = vpop.f32.mrb[45].mxu1 }
 0x159   : > { %v2451_v17 = vpop.f32.mrb[47].mxu0  ;;  %v2513_v39 = vadd.f32 %v2512_v15, %v2511_v42  ;;  %v2514_v7 = vpop.f32.mrb[46].mxu1 }
 0x15a   : > { %v1635_v49 = vadd.f32 %v2449_v14, %v3809_v8  ;;  %v2452_v33 = vadd.f32 %v2451_v17, %v2450_v13  ;;  %v2515_v46 = vpop.f32.mrb[47].mxu1 }
 0x15b   : > { %v2516_v60 = vadd.f32 %v2515_v46, %v2514_v7 }
 0x15c   : > { %v1638_v52 = vadd.f32 %v2452_v33, %v3811_v3  ;;  %v3849_v62 = vadd.f32 %v2513_v39, %v1635_v49 }
 0x15e   : > { %v2453_v9 = vpop.f32.mrb[48].mxu0  ;;  %v3851_v35 = vadd.f32 %v2516_v60, %v1638_v52 }
 0x15f   : > { %v2454_v38 = vpop.f32.mrb[49].mxu0  ;;  %v2517_v31 = vpop.f32.mrb[48].mxu1 }
 0x160   : > { %v2455_v59 = vadd.f32 %v2454_v38, %v2453_v9  ;;  %v2456_v25 = vpop.f32.mrb[50].mxu0  ;;  %v2518_v12 = vpop.f32.mrb[49].mxu1 }
 0x161   : > { %v2457_v54 = vpop.f32.mrb[51].mxu0  ;;  %v2519_v45 = vadd.f32 %v2518_v12, %v2517_v31  ;;  %v2520_v16 = vpop.f32.mrb[50].mxu1 }
 0x162   : > { %v1643_v8 = vadd.f32 %v2455_v59, %v3813_v4  ;;  %v2458_v21 = vadd.f32 %v2457_v54, %v2456_v25  ;;  %v2521_v22 = vpop.f32.mrb[51].mxu1 }
 0x163   : > { %v2522_v30 = vadd.f32 %v2521_v22, %v2520_v16 }
 0x164   : > { %v1646_v3 = vadd.f32 %v2458_v21, %v3815_v27  ;;  %v3855_v50 = vadd.f32 %v2519_v45, %v1643_v8 }
 0x166   : > { %v2459_v5 = vpop.f32.mrb[52].mxu0  ;;  %v3857_v55 = vadd.f32 %v2522_v30, %v1646_v3 }
 0x167   : > { %v2460_v18 = vpop.f32.mrb[53].mxu0  ;;  %v2523_v43 = vpop.f32.mrb[52].mxu1 }
 0x168   : > { %v2461_v2 = vadd.f32 %v2460_v18, %v2459_v5  ;;  %v2462_v1 = vpop.f32.mrb[54].mxu0  ;;  %v2524_v23 = vpop.f32.mrb[53].mxu1 }
 0x169   : > { %v2463_v36 = vpop.f32.mrb[55].mxu0  ;;  %v2525_v6 = vadd.f32 %v2524_v23, %v2523_v43  ;;  %v2526_v4 = vpop.f32.mrb[54].mxu1 }
 0x16a   : > { %v1651_v37 = vadd.f32 %v2461_v2, %v3817_v20  ;;  %v2464_v48 = vadd.f32 %v2463_v36, %v2462_v1  ;;  %v2527_v29 = vpop.f32.mrb[55].mxu1 }
 0x16b   : > { %v2528_v27 = vadd.f32 %v2527_v29, %v2526_v4 }
 0x16c   : > { %v1654_v51 = vadd.f32 %v2464_v48, %v3819_v0  ;;  %v1748_v53 = vadd.f32 %v2525_v6, %v1651_v37 }
 0x16e   : > { %v2465_v56 = vpop.f32.mrb[56].mxu0  ;;  %v1751_v58 = vadd.f32 %v2528_v27, %v1654_v51 }
 0x16f   : > { %v2466_v34 = vpop.f32.mrb[57].mxu0  ;;  %v2529_v26 = vpop.f32.mrb[56].mxu1 }
 0x170   : > { %v2467_v19 = vadd.f32 %v2466_v34, %v2465_v56  ;;  %v2468_v47 = vpop.f32.mrb[58].mxu0  ;;  %v2530_v63 = vpop.f32.mrb[57].mxu1 }
 0x171   : > { %v2469_v42 = vpop.f32.mrb[59].mxu0  ;;  %v2531_v14 = vadd.f32 %v2530_v63, %v2529_v26  ;;  %v2532_v13 = vpop.f32.mrb[58].mxu1 }
 0x172   : > { %v1659_v20 = vadd.f32 %v2467_v19, %v3821_v40  ;;  %v2470_v15 = vadd.f32 %v2469_v42, %v2468_v47  ;;  %v2533_v17 = vpop.f32.mrb[59].mxu1 }
 0x173   : > { %v2534_v39 = vadd.f32 %v2533_v17, %v2532_v13 }
 0x174   : > { %v1662_v0 = vadd.f32 %v2470_v15, %v3823_v44  ;;  %v3865_v7 = vadd.f32 %v2531_v14, %v1659_v20 }
 0x176   : > { %v2471_v49 = vpop.f32.mrb[60].mxu0  ;;  %v3868_v33 = vadd.f32 %v2534_v39, %v1662_v0 }
 0x177   : > { %v2472_v46 = vpop.f32.mrb[61].mxu0  ;;  %v2535_v60 = vpop.f32.mrb[60].mxu1 }
 0x178   : > { %v2473_v52 = vadd.f32 %v2472_v46, %v2471_v49  ;;  %v2474_v9 = vpop.f32.mrb[62].mxu0  ;;  %v2536_v38 = vpop.f32.mrb[61].mxu1 }
 0x179   : > { %v2475_v31 = vpop.f32.mrb[63].mxu0  ;;  %v2537_v40 = vadd.f32 %v2536_v38, %v2535_v60  ;;  %v2538_v59 = vpop.f32.mrb[62].mxu1 }
 0x17a   : > { %v1667_v25 = vadd.f32 %v2473_v52, %v3825_v11  ;;  %v2476_v12 = vadd.f32 %v2475_v31, %v2474_v9  ;;  %v2539_v44 = vpop.f32.mrb[63].mxu1 }
 0x17b   : > { %v2540_v54 = vadd.f32 %v2539_v44, %v2538_v59 }
 0x17c   : > { %v1670_v45 = vadd.f32 %v2476_v12, %v3827_v10  ;;  %v1764_v16 = vadd.f32 %v2537_v40, %v1667_v25 }
 0x17e   : > { %v2575_v8 = vpop.f32.mrb[64].mxu0  ;;  %v1767_v21 = vadd.f32 %v2540_v54, %v1670_v45 }
 0x17f   : > { %v1813_v22 = vadd.f32 %v2575_v8, %v3837_v24  ;;  %v2583_v11 = vpop.f32.mrb[64].mxu1  ;;  %v1804_v30 = vpop.f32.mrb[65].mxu0 }
 0x180   : > { %v3878_v3 = vadd.f32 %v2583_v11, %v1748_v53  ;;  %v1805_v10 = vadd.f32 %v1804_v30, %v3831_v32  ;;  %v1836_v5 = vpop.f32.mrb[65].mxu1  ;;  %v2576_v18 = vpop.f32.mrb[66].mxu0 }
 0x181   : > { %1869 = vst [vmem:[%s3875_s9 + $0x10] sm:$0xff] %v1813_v22  ;;  %v1837_v43 = vadd.f32 %v1836_v5, %v3855_v50  ;;  %v1816_v2 = vadd.f32 %v2576_v18, %v3839_v28  ;;  %v2584_v1 = vpop.f32.mrb[66].mxu1  ;;  %v1807_v24 = vpop.f32.mrb[67].mxu0  ;;  %v1907_v37 = vmul.f32 %v1813_v22, %v1813_v22 }
 0x182   : > { %1877 = vst [vmem:[%s3875_s9 + $0x50] sm:$0xff] %v3878_v3  ;;  %1867 = vst [vmem:[%s3875_s9] sm:$0xff] %v1805_v10  ;;  %v3887_v23 = vadd.f32 %v2584_v1, %v1751_v58  ;;  %v1808_v36 = vadd.f32 %v1807_v24, %v3833_v41  ;;  %v1839_v32 = vpop.f32.mrb[67].mxu1  ;;  %v1905_v4 = vmul.f32 %v1805_v10, %v1805_v10 }
 0x183   : > { %1875 = vst [vmem:[%s3875_s9 + $0x40] sm:$0xff] %v1837_v43  ;;  %1870 = vst [vmem:[%s3875_s9 + $0x18] sm:$0xff] %v1816_v2  ;;  %v1840_v6 = vadd.f32 %v1839_v32, %v3857_v55  ;;  %v1908_v51 = vmul.f32 %v1816_v2, %v1816_v2  ;;  %v1913_v40 = vmul.f32 %v1837_v43, %v1837_v43 }
 0x184   : > { %1878 = vst [vmem:[%s3875_s9 + $0x58] sm:$0xff] %v3887_v23  ;;  %1868 = vst [vmem:[%s3875_s9 + $0x8] sm:$0xff] %v1808_v36  ;;  %v1883_v28 = vadd.f32 %v1808_v36, %v1805_v10  ;;  %v1906_v50 = vmul.f32 %v1808_v36, %v1808_v36 }
 0x185   : > { %1876 = vst [vmem:[%s3875_s9 + $0x48] sm:$0xff] %v1840_v6  ;;  %v1914_v12 = vmul.f32 %v1840_v6, %v1840_v6 }
 0x186   : > { %v1884_v48 = vadd.f32 %v1883_v28, %v1813_v22  ;;  %v1921_v29 = vadd.f32 %v1906_v50, %v1905_v4  ;;  %v2579_v27 = vpop.f32.mrb[68].mxu0 }
 0x187   : > { %v1829_v41 = vadd.f32 %v2579_v27, %v3849_v62  ;;  %v2587_v53 = vpop.f32.mrb[68].mxu1  ;;  %v1820_v56 = vpop.f32.mrb[69].mxu0 }
 0x188   : > { %v1922_v55 = vadd.f32 %v1921_v29, %v1907_v37  ;;  %v1861_v58 = vadd.f32 %v2587_v53, %v1764_v16  ;;  %v1821_v34 = vadd.f32 %v1820_v56, %v3843_v61  ;;  %v1885_v26 = vadd.f32 %v1884_v48, %v1816_v2  ;;  %v1852_v19 = vpop.f32.mrb[69].mxu1  ;;  %v2580_v47 = vpop.f32.mrb[70].mxu0 }
 0x189   : > { %1873 = vst [vmem:[%s3875_s9 + $0x30] sm:$0xff] %v1829_v41  ;;  %v1853_v63 = vadd.f32 %v1852_v19, %v3865_v7  ;;  %v1832_v42 = vadd.f32 %v2580_v47, %v3851_v35  ;;  %v2588_v14 = vpop.f32.mrb[70].mxu1  ;;  %v1823_v62 = vpop.f32.mrb[71].mxu0  ;;  %v1911_v46 = vmul.f32 %v1829_v41, %v1829_v41  ;;  %v1916_v16 = vmul.f32 %v3887_v23, %v3887_v23 }
 0x18a   : > { %1881 = vst [vmem:[%s3875_s9 + $0x70] sm:$0xff] %v1861_v58  ;;  %1871 = vst [vmem:[%s3875_s9 + $0x20] sm:$0xff] %v1821_v34  ;;  %v1886_v13 = vadd.f32 %v1885_v26, %v1821_v34  ;;  %v1909_v20 = vmul.f32 %v1821_v34, %v1821_v34  ;;  %v1923_v15 = vadd.f32 %v1922_v55, %v1908_v51  ;;  %v1855_v61 = vpop.f32.mrb[71].mxu1 }
 0x18b   : > { %1879 = vst [vmem:[%s3875_s9 + $0x60] sm:$0xff] %v1853_v63  ;;  %1874 = vst [vmem:[%s3875_s9 + $0x38] sm:$0xff] %v1832_v42  ;;  %v1864_v17 = vadd.f32 %v2588_v14, %v1767_v21  ;;  %v1824_v39 = vadd.f32 %v1823_v62, %v3845_v57  ;;  %v1856_v7 = vadd.f32 %v1855_v61, %v3868_v33 }
 0x18c   : > { %v1924_v0 = vadd.f32 %v1923_v15, %v1909_v20  ;;  %v1912_v9 = vmul.f32 %v1832_v42, %v1832_v42  ;;  %v1915_v33 = vmul.f32 %v3878_v3, %v3878_v3  ;;  %v1917_v22 = vmul.f32 %v1853_v63, %v1853_v63 }
 0x18d   : > { %1882 = vst [vmem:[%s3875_s9 + $0x78] sm:$0xff] %v1864_v17  ;;  %1872 = vst [vmem:[%s3875_s9 + $0x28] sm:$0xff] %v1824_v39  ;;  %v1887_v35 = vadd.f32 %v1886_v13, %v1824_v39  ;;  %v1910_v49 = vmul.f32 %v1824_v39, %v1824_v39  ;;  %v1918_v5 = vmul.f32 %v1856_v7, %v1856_v7 }
 0x18e   : > { %1880 = vst [vmem:[%s3875_s9 + $0x68] sm:$0xff] %v1856_v7  ;;  %v1920_v24 = vmul.f32 %v1864_v17, %v1864_v17 }
 0x18f   : > { %v1888_v60 = vadd.f32 %v1887_v35, %v1829_v41  ;;  %v1925_v52 = vadd.f32 %v1924_v0, %v1910_v49 }
 0x191   : > { %v1889_v38 = vadd.f32 %v1888_v60, %v1832_v42  ;;  %v1926_v31 = vadd.f32 %v1925_v52, %v1911_v46 }
 0x193   : > { %v1890_v59 = vadd.f32 %v1889_v38, %v1837_v43  ;;  %v1927_v25 = vadd.f32 %v1926_v31, %v1912_v9  ;;  %v1919_v43 = vmul.f32 %v1861_v58, %v1861_v58 }
 0x195   : > { %v1928_v44 = vadd.f32 %v1927_v25, %v1913_v40  ;;  %v1891_v57 = vadd.f32 %v1890_v59, %v1840_v6 }
 0x197   : > { %v1892_v54 = vadd.f32 %v1891_v57, %v3878_v3  ;;  %v1929_v45 = vadd.f32 %v1928_v44, %v1914_v12 }
 0x199   : > { %v1893_v8 = vadd.f32 %v1892_v54, %v3887_v23  ;;  %v1930_v21 = vadd.f32 %v1929_v45, %v1915_v33 }
 0x19b   : > { %v1894_v11 = vadd.f32 %v1893_v8, %v1853_v63  ;;  %v1931_v30 = vadd.f32 %v1930_v21, %v1916_v16 }
 0x19d   : > { %v1895_v10 = vadd.f32 %v1894_v11, %v1856_v7  ;;  %v1932_v18 = vadd.f32 %v1931_v30, %v1917_v22 }
 0x19f   : > { %v1896_v2 = vadd.f32 %v1895_v10, %v1861_v58  ;;  %v1933_v1 = vadd.f32 %v1932_v18, %v1918_v5 }
 0x1a1   : > { %v1897_v3 = vadd.f32 %v1896_v2, %v1864_v17  ;;  %v1934_v36 = vadd.f32 %v1933_v1, %v1919_v43 }
 0x1a3   : > { %v1898_v32 = vrot.slane %v1897_v3, 4  ;;  %v1935_v6 = vadd.f32 %v1934_v36, %v1920_v24 }
 0x1a5   : > { %v1899_v4 = vadd.f32 %v1898_v32, %v1897_v3  ;;  %v1936_v28 = vrot.slane %v1935_v6, 4 }
 0x1a7   : > { %v1900_v23 = vrot.slane %v1899_v4, 2  ;;  %v1937_v50 = vadd.f32 %v1936_v28, %v1935_v6 }
 0x1a9   : > { %v1901_v37 = vadd.f32 %v1900_v23, %v1899_v4  ;;  %v1938_v48 = vrot.slane %v1937_v50, 2 }
 0x1ab   : > { %v1902_v29 = vrot.slane %v1901_v37, 1  ;;  %v1939_v27 = vadd.f32 %v1938_v48, %v1937_v50 }
 0x1ad   : > { %v1903_v51 = vadd.f32 %v1902_v29, %v1901_v37  ;;  %v1940_v41 = vrot.slane %v1939_v27, 1 }
 0x1af   : > { %1904 = vst [vmem:[%s320_s12] sm:$0x1] %v1903_v51  ;;  %v1941_v53 = vadd.f32 %v1940_v41, %v1939_v27 }
 0x1b1   : > { %1942 = vst [vmem:[%s327_s17] sm:$0x1] %v1941_v53 }
 0x1b2 PF: > { %s17_s25 = sadd.s32 1, %s2757_s25   ;;  %s4025_s21 = smov %s2749_s23 }
 0x1b3   : > { %p14_p8 = scmp.ge.s32.totalorder %s17_s25, 6   ;;  %s4026_s22 = smov %s2753_s24 }
 0x1b4   : > { %s4027_s23 = smov %s4030_s26  ;;  %s4028_s24 = smov %s4034_s27 }
 0x1b5   :  { %16 = sbr.rel (!%p14_p8) target bundleno = 3 (0x3), region = 90 }

</bundles_post_ra>
